<compile_context>
chip_gen: v7x
topology: tpu7x:2x2x1
jax: 0.10.0
libtpu: 0.0.40
codegen_flags: <defaults>
</compile_context>

<pallas_src>
import jax
import jax.numpy as jnp
from jax import lax
from jax.experimental import pallas as pl
from jax.experimental.pallas import tpu as pltpu

EPS = 1e-5
LANE = 128                       # lane width -> lane-dense matmul output columns
ROW_TILE_TARGET = 1024           # pixel-axis tile target (rows), multiple of 8
VMEM_LIMIT = 32 * 1024 * 1024    # explicit scoped-VMEM budget (v5e/v6e/v7x safe)

# ---- scaled-down DenseNet-121 config (synthetic) ----
GROWTH = 8
BN_SIZE = 4
INIT_FEAT = 16
BLOCK_CONFIG = (2, 2, 2)
NUM_CLASSES = 10


# ----------------------------- Pallas kernels ------------------------------

def _bn_relu_kernel(x_ref, s_ref, b_ref, o_ref):
    # Lane-dense elementwise BN(eval)+ReLU. x: (TR, 128) f32-ish; s/b: (1, 128) resident.
    x = x_ref[...].astype(jnp.float32)
    o_ref[...] = jnp.maximum(x * s_ref[...] + b_ref[...], 0.0).astype(o_ref.dtype)


def _bn_relu_matmul_kernel(x_ref, s_ref, b_ref, w_ref, o_ref):
    # Transition: BN -> ReLU -> 1x1 conv (MXU, bf16 operands, f32 accumulate).
    x = x_ref[...].astype(jnp.float32)
    h = jnp.maximum(x * s_ref[...] + b_ref[...], 0.0)
    o_ref[...] = jnp.dot(h.astype(jnp.bfloat16), w_ref[...],
                         preferred_element_type=jnp.float32).astype(o_ref.dtype)


def _bottleneck_kernel(x_ref, s1_ref, b1_ref, w_ref, b2_ref, o_ref):
    # Fused BN1 -> ReLU -> 1x1 conv (BN2 scale folded into w) -> +bias -> ReLU.
    x = x_ref[...].astype(jnp.float32)
    h = jnp.maximum(x * s1_ref[...] + b1_ref[...], 0.0)
    y = jnp.dot(h.astype(jnp.bfloat16), w_ref[...],
                preferred_element_type=jnp.float32)
    o_ref[...] = jnp.maximum(y + b2_ref[...], 0.0).astype(o_ref.dtype)


def _head_kernel(x_ref, s_ref, b_ref, w_ref, bias_ref, o_ref):
    # Per image: final BN -> ReLU -> avg_pool2d(7) as an exact f32 row-mean -> Linear.
    x = x_ref[0].astype(jnp.float32)                       # (HW, C)
    h = jnp.maximum(x * s_ref[...] + b_ref[...], 0.0)
    pooled = jnp.sum(h, axis=0, keepdims=True) * (1.0 / x.shape[0])   # (1, C) f32
    o_ref[0] = jnp.dot(pooled.astype(jnp.bfloat16), w_ref[...],
                       preferred_element_type=jnp.float32) + bias_ref[...]


# ------------------------------ helpers -------------------------------------

def _bn_scale_shift(bn):
    scale = bn["gamma"] / jnp.sqrt(bn["var"] + EPS)
    shift = bn["beta"] - bn["mean"] * scale
    return scale, shift


def _pad_cols(a, mult=LANE):
    """Zero-pad last axis to a multiple of `mult`."""
    pad = (-a.shape[-1]) % mult
    if pad:
        a = jnp.pad(a, [(0, 0)] * (a.ndim - 1) + [(0, pad)])
    return a


def _row_tile(p, target=ROW_TILE_TARGET):
    """Row-axis tile: largest multiple-of-8 divisor of p that is <= target.

    Prefers a >=2-step grid when a reasonable divisor exists (so a v7x megacore can
    shard the row axis; one extra ~0.35us step costs nothing on v5e/v6e). If p has
    no multiple-of-8 divisor: small p runs as one full block (legal: block == full
    dim), large p falls back to a fixed tile with a masked final block (pl.cdiv grid).
    """
    cap = min(target, p)
    cand = [t for t in range(8, cap + 1, 8) if p % t == 0]
    if not cand:
        return p if p <= target else target
    best = max(cand)
    if best == p:                                  # grid would be 1 -> try to split
        split = [t for t in cand if t <= p // 2 and t >= 32]
        if split:
            best = max(split)
    return best


def _cparams():
    return pltpu.CompilerParams(dimension_semantics=("parallel",),
                                vmem_limit_bytes=VMEM_LIMIT)


# --------------------------- Pallas call wrappers ---------------------------

def bn_relu(x, bn):
    """Fused BN->ReLU, lane-dense: pack 8 pixels per row so the last dim is 128."""
    B, H, W, C = x.shape
    P = B * H * W
    scale, shift = _bn_scale_shift(bn)
    fold = 8 if (P % 8 == 0 and (C * 8) % LANE == 0) else 1
    R, C2 = P // fold, C * fold
    TR = _row_tile(R)
    sc = jnp.tile(scale, fold).reshape(1, C2)
    sh = jnp.tile(shift, fold).reshape(1, C2)
    out = pl.pallas_call(
        _bn_relu_kernel,
        out_shape=jax.ShapeDtypeStruct((R, C2), jnp.bfloat16),   # bf16 HBM activations
        grid=(pl.cdiv(R, TR),),
        in_specs=[
            pl.BlockSpec((TR, C2), lambda i: (i, 0)),
            pl.BlockSpec((1, C2), lambda i: (0, 0)),
            pl.BlockSpec((1, C2), lambda i: (0, 0)),
        ],
        out_specs=pl.BlockSpec((TR, C2), lambda i: (i, 0)),
        compiler_params=_cparams(),
    )(x.reshape(R, C2), sc, sh)
    return out.reshape(B, H, W, C)


def bottleneck(x, bn1, w1, bn2):
    """Fused BN1->ReLU->1x1conv(+folded BN2 scale)->bias->ReLU.

    `x` is the channel-padded dense-block buffer (Ct channels). Layer params cover
    only the first c_real channels; they are zero-padded to Ct, which is exact since
    the unwritten buffer channels are zero. Output keeps its lane-padded 128 columns
    (padded columns are exactly zero) — the downstream 3x3 conv consumes them with
    zero-padded input-channel weights instead of an XLA slice (no extra HBM round trip).
    """
    B, H, W, Ct = x.shape
    c_real, inter = w1.shape
    P = B * H * W
    TP = _row_tile(P)
    s1, b1 = _bn_scale_shift(bn1)
    s2, b2 = _bn_scale_shift(bn2)
    s1p = jnp.pad(s1, (0, Ct - c_real)).reshape(1, Ct)
    b1p = jnp.pad(b1, (0, Ct - c_real)).reshape(1, Ct)
    w_rows = jnp.pad(w1, ((0, Ct - c_real), (0, 0)))             # (Ct, inter)
    w_fold = w_rows * s2[None, :]                                 # fold BN2 scale
    w_p = _pad_cols(w_fold).astype(jnp.bfloat16)                  # (Ct, 128) lane-dense
    b2p = _pad_cols(b2.reshape(1, inter))                         # (1, 128) f32, zero-padded
    Cp = w_p.shape[1]
    out = pl.pallas_call(
        _bottleneck_kernel,
        out_shape=jax.ShapeDtypeStruct((P, Cp), jnp.bfloat16),
        grid=(pl.cdiv(P, TP),),
        in_specs=[
            pl.BlockSpec((TP, Ct), lambda i: (i, 0)),
            pl.BlockSpec((1, Ct), lambda i: (0, 0)),
            pl.BlockSpec((1, Ct), lambda i: (0, 0)),
            pl.BlockSpec((Ct, Cp), lambda i: (0, 0)),
            pl.BlockSpec((1, Cp), lambda i: (0, 0)),
        ],
        out_specs=pl.BlockSpec((TP, Cp), lambda i: (i, 0)),
        compiler_params=_cparams(),
    )(x.reshape(P, Ct), s1p, b1p, w_p, b2p)
    return out.reshape(B, H, W, Cp)                               # no slice


def bn_relu_conv1x1(x, bn, w, out_cols):
    """Transition: BN->ReLU->1x1conv. Columns are zero-padded to `out_cols` (the next
    dense block's buffer width), so the avg-pooled result IS the next buffer — no slice."""
    B, H, W, Cin = x.shape
    Cout = w.shape[1]
    P = B * H * W
    TP = _row_tile(P)
    scale, shift = _bn_scale_shift(bn)
    w_p = jnp.pad(w, ((0, 0), (0, out_cols - Cout))).astype(jnp.bfloat16)
    out = pl.pallas_call(
        _bn_relu_matmul_kernel,
        out_shape=jax.ShapeDtypeStruct((P, out_cols), jnp.bfloat16),
        grid=(pl.cdiv(P, TP),),
        in_specs=[
            pl.BlockSpec((TP, Cin), lambda i: (i, 0)),
            pl.BlockSpec((1, Cin), lambda i: (0, 0)),
            pl.BlockSpec((1, Cin), lambda i: (0, 0)),
            pl.BlockSpec((Cin, out_cols), lambda i: (0, 0)),
        ],
        out_specs=pl.BlockSpec((TP, out_cols), lambda i: (i, 0)),
        compiler_params=_cparams(),
    )(x.reshape(P, Cin), scale.reshape(1, Cin), shift.reshape(1, Cin), w_p)
    return out.reshape(B, H, W, out_cols)


def classify_head(feats, bn, w, b):
    """Per-image fused head: final BN -> ReLU -> avg_pool2d(7) -> view -> Linear."""
    B, H, W, C = feats.shape
    assert H == 7 and W == 7, "head expects 7x7 features (avg_pool2d kernel_size=7)"
    HW = H * W
    n_out = w.shape[1]
    scale, shift = _bn_scale_shift(bn)
    w_p = _pad_cols(w).astype(jnp.bfloat16)              # (C, 128) lane-dense
    b_p = _pad_cols(b.reshape(1, n_out))                 # (1, 128) f32
    n_p = w_p.shape[1]
    out = pl.pallas_call(
        _head_kernel,
        out_shape=jax.ShapeDtypeStruct((B, 1, n_p), jnp.float32),
        grid=(B,),
        in_specs=[
            pl.BlockSpec((1, HW, C), lambda i: (i, 0, 0)),
            pl.BlockSpec((1, C), lambda i: (0, 0)),
            pl.BlockSpec((1, C), lambda i: (0, 0)),
            pl.BlockSpec((C, n_p), lambda i: (0, 0)),
            pl.BlockSpec((1, n_p), lambda i: (0, 0)),
        ],
        out_specs=pl.BlockSpec((1, 1, n_p), lambda i: (i, 0, 0)),
        compiler_params=_cparams(),
    )(feats.reshape(B, HW, C), scale.reshape(1, C), shift.reshape(1, C), w_p, b_p)
    return out.reshape(B, n_p)[:, :n_out]                # tiny (B,128)->(B,10) slice


# ------------------------------- JAX glue ----------------------------------
# TODO(synk): spatial (7x7 stem / 3x3 dense) convolutions and pooling windows stay in
# lax (no clean rectangular-tile Pallas mapping at this scale).

def conv2d(x, w, stride, pad):
    return lax.conv_general_dilated(
        x, w, window_strides=(stride, stride),
        padding=[(pad, pad), (pad, pad)],
        dimension_numbers=("NHWC", "HWIO", "NHWC"),
        preferred_element_type=jnp.float32)


def max_pool_3x3_s2(x):
    return lax.reduce_window(x, jnp.array(-jnp.inf, x.dtype), lax.max,
                             (1, 3, 3, 1), (1, 2, 2, 1),
                             [(0, 0), (1, 1), (1, 1), (0, 0)])


def avg_pool_2x2_s2(x):
    s = lax.reduce_window(x.astype(jnp.float32), 0.0, lax.add,
                          (1, 2, 2, 1), (1, 2, 2, 1), "VALID")
    return (s * 0.25).astype(x.dtype)


# ----------------------------- parameter init ------------------------------

def make_params(key):
    keys = iter(jax.random.split(key, 512))

    def nk():
        return next(keys)

    def conv_w(shape):
        fan_in = shape[0] * shape[1] * shape[2] if len(shape) == 4 else shape[0]
        return jax.random.normal(nk(), shape, jnp.float32) * jnp.sqrt(2.0 / fan_in)

    def bn(c):
        return {
            "gamma": 1.0 + 0.1 * jax.random.normal(nk(), (c,), jnp.float32),
            "beta": 0.1 * jax.random.normal(nk(), (c,), jnp.float32),
            "mean": 0.1 * jax.random.normal(nk(), (c,), jnp.float32),
            "var": jnp.abs(1.0 + 0.1 * jax.random.normal(nk(), (c,), jnp.float32)),
        }

    params = {"conv0": conv_w((7, 7, 3, INIT_FEAT)), "norm0": bn(INIT_FEAT)}
    c = INIT_FEAT
    blocks, transitions = [], []
    for bi, nlayers in enumerate(BLOCK_CONFIG):
        layers = []
        for _ in range(nlayers):
            inter = BN_SIZE * GROWTH
            layers.append({
                "norm1": bn(c),
                "conv1": conv_w((c, inter)),            # 1x1 conv as (Cin, Cout) matmul
                "norm2": bn(inter),
                "conv2": conv_w((3, 3, inter, GROWTH)),
            })
            c += GROWTH
        blocks.append(layers)
        if bi < len(BLOCK_CONFIG) - 1:
            transitions.append({"norm": bn(c), "conv": conv_w((c, c // 2))})
            c = c // 2
    params["blocks"] = blocks
    params["transitions"] = transitions
    params["norm5"] = bn(c)
    params["cls_w"] = jax.random.normal(nk(), (c, NUM_CLASSES), jnp.float32) * 0.05
    params["cls_b"] = jnp.zeros((NUM_CLASSES,), jnp.float32)
    return params


# ------------------------------ forward pass --------------------------------

def forward(params, x_nchw):
    x = jnp.transpose(x_nchw, (0, 2, 3, 1)).astype(jnp.float32)   # NCHW -> NHWC

    # stem: conv7x7/s2 -> BN -> ReLU (Pallas, lane-dense, bf16 out) -> maxpool3x3/s2
    x = conv2d(x, params["conv0"], stride=2, pad=3)
    x = bn_relu(x, params["norm0"])
    x = max_pool_3x3_s2(x)

    c = INIT_FEAT
    for bi, block in enumerate(params["blocks"]):
        c_tot = c + len(block) * GROWTH
        # Channel-padded dense-feature buffer (concat-free dense connectivity).
        if x.shape[-1] < c_tot:
            x = jnp.pad(x, ((0, 0), (0, 0), (0, 0), (0, c_tot - x.shape[-1])))
        c_cur = c
        for layer in block:
            # Fused BN1->ReLU->1x1conv->bias->ReLU reading the full buffer; output keeps
            # its 128 lane-padded channels (padded columns are exactly zero).
            h = bottleneck(x, layer["norm1"], layer["conv1"], layer["norm2"])
            # 3x3 conv consumes the padded slab via zero-padded input-channel weights.
            w2 = jnp.pad(layer["conv2"],
                         ((0, 0), (0, 0),
                          (0, h.shape[-1] - layer["conv2"].shape[2]), (0, 0))
                         ).astype(jnp.bfloat16)
            hc = conv2d(h, w2, stride=1, pad=1).astype(jnp.bfloat16)
            # Dense connectivity: write the new GROWTH channels into their slice of the
            # pre-allocated buffer instead of concatenating the whole feature map.
            # TODO(synk): a Pallas writeback kernel with input_output_aliases would make
            # the in-place channel update explicit rather than relying on XLA's DUS.
            x = lax.dynamic_update_slice(x, hc, (0, 0, 0, c_cur))
            c_cur += GROWTH
        c = c_tot
        if bi < len(params["blocks"]) - 1:
            t = params["transitions"][bi]
            c_half = c // 2
            next_tot = c_half + len(params["blocks"][bi + 1]) * GROWTH
            # Transition output is zero-padded to the next block's buffer width, so the
            # avg-pooled result is directly the next dense-block buffer (no slice, no pad).
            x = bn_relu_conv1x1(x, t["norm"], t["conv"], out_cols=next_tot)
            x = avg_pool_2x2_s2(x)
            c = c_half

    # ModifiedDenseNet head: final BN -> relu -> avg_pool2d(7) -> view -> classifier,
    # fused in one per-image Pallas kernel.
    return classify_head(x, params["norm5"], params["cls_w"], params["cls_b"])


if __name__ == "__main__":
    key = jax.random.PRNGKey(0)
    pkey, xkey = jax.random.split(key)
    params = make_params(pkey)
    x = jax.random.normal(xkey, (2, 3, 112, 112), jnp.float32)    # NCHW like PyTorch

    out = jax.jit(forward)(params, x)
    out = jax.block_until_ready(out)
    assert out.shape == (2, NUM_CLASSES)
    assert bool(jnp.all(jnp.isfinite(out)))
    print("KERNEL_OK")
</pallas_src>

<mosaic_0001>
module attributes {stable_mosaic.version = 11 : i64} {
  func.func @_bn_relu_kernel(%arg0: i32, %arg1: memref<392x128xf32, #tpu.memory_space<vmem>>, %arg2: memref<1x128xf32, #tpu.memory_space<vmem>>, %arg3: memref<1x128xf32, #tpu.memory_space<vmem>>, %arg4: memref<392x128xbf16, #tpu.memory_space<vmem>>) attributes {dimension_semantics = [#tpu.dimension_semantics<parallel>], iteration_bounds = array<i64: 2>, scalar_prefetch = 0 : i64, scratch_operands = 0 : i64, tpu.core_type = #tpu.core_type<tc>, window_params = [{transform_indices = @transform_0, window_bounds = array<i64: 392, 128>}, {pipeline_mode = #tpu.pipeline_mode<synchronous>, transform_indices = @transform_1, window_bounds = array<i64: 1, 128>}, {pipeline_mode = #tpu.pipeline_mode<synchronous>, transform_indices = @transform_2, window_bounds = array<i64: 1, 128>}, {transform_indices = @transform_3, window_bounds = array<i64: 392, 128>}]} {
    %c0 = arith.constant 0 : index
    %c0_0 = arith.constant 0 : index
    %0 = vector.load %arg1[%c0, %c0_0] : memref<392x128xf32, #tpu.memory_space<vmem>>, vector<392x128xf32>
    %c0_1 = arith.constant 0 : index
    %c0_2 = arith.constant 0 : index
    %1 = vector.load %arg2[%c0_1, %c0_2] : memref<1x128xf32, #tpu.memory_space<vmem>>, vector<1x128xf32>
    %2 = vector.broadcast %1 : vector<1x128xf32> to vector<392x128xf32>
    %3 = arith.mulf %0, %2 : vector<392x128xf32>
    %c0_3 = arith.constant 0 : index
    %c0_4 = arith.constant 0 : index
    %4 = vector.load %arg3[%c0_3, %c0_4] : memref<1x128xf32, #tpu.memory_space<vmem>>, vector<1x128xf32>
    %5 = vector.broadcast %4 : vector<1x128xf32> to vector<392x128xf32>
    %6 = arith.addf %3, %5 : vector<392x128xf32>
    %cst = arith.constant 0.000000e+00 : f32
    %7 = vector.broadcast %cst : f32 to vector<392x128xf32>
    %8 = arith.maximumf %6, %7 : vector<392x128xf32>
    %9 = arith.truncf %8 : vector<392x128xf32> to vector<392x128xbf16>
    %c0_5 = arith.constant 0 : index
    %c0_6 = arith.constant 0 : index
    %10 = vector.load %arg4[%c0_5, %c0_6] : memref<392x128xbf16, #tpu.memory_space<vmem>>, vector<392x128xbf16>
    tpu.vector_store %arg4[%c0_5, %c0_6], %9 {strides = array<i32>} : memref<392x128xbf16, #tpu.memory_space<vmem>>, vector<392x128xbf16>,
    return
  }
  func.func @transform_0(%arg0: i32) -> (i32, i32) {
    %c0_i32 = arith.constant 0 : i32
    %c0_i32_0 = arith.constant 0 : i32
    return %arg0, %c0_i32 : i32, i32
  }
  func.func @transform_1(%arg0: i32) -> (i32, i32) {
    %c0_i32 = arith.constant 0 : i32
    %c0_i32_0 = arith.constant 0 : i32
    %c0_i32_1 = arith.constant 0 : i32
    return %c0_i32, %c0_i32_0 : i32, i32
  }
  func.func @transform_2(%arg0: i32) -> (i32, i32) {
    %c0_i32 = arith.constant 0 : i32
    %c0_i32_0 = arith.constant 0 : i32
    %c0_i32_1 = arith.constant 0 : i32
    return %c0_i32, %c0_i32_0 : i32, i32
  }
  func.func @transform_3(%arg0: i32) -> (i32, i32) {
    %c0_i32 = arith.constant 0 : i32
    %c0_i32_0 = arith.constant 0 : i32
    return %arg0, %c0_i32 : i32, i32
  }
}

module attributes {stable_mosaic.version = 11 : i64} {
  func.func @_bottleneck_kernel(%arg0: i32, %arg1: memref<784x32xbf16, #tpu.memory_space<vmem>>, %arg2: memref<1x32xf32, #tpu.memory_space<vmem>>, %arg3: memref<1x32xf32, #tpu.memory_space<vmem>>, %arg4: memref<32x128xbf16, #tpu.memory_space<vmem>>, %arg5: memref<1x128xf32, #tpu.memory_space<vmem>>, %arg6: memref<784x128xbf16, #tpu.memory_space<vmem>>) attributes {dimension_semantics = [#tpu.dimension_semantics<parallel>], iteration_bounds = array<i64: 2>, scalar_prefetch = 0 : i64, scratch_operands = 0 : i64, tpu.core_type = #tpu.core_type<tc>, window_params = [{transform_indices = @transform_0, window_bounds = array<i64: 784, 32>}, {pipeline_mode = #tpu.pipeline_mode<synchronous>, transform_indices = @transform_1, window_bounds = array<i64: 1, 32>}, {pipeline_mode = #tpu.pipeline_mode<synchronous>, transform_indices = @transform_2, window_bounds = array<i64: 1, 32>}, {pipeline_mode = #tpu.pipeline_mode<synchronous>, transform_indices = @transform_3, window_bounds = array<i64: 32, 128>}, {pipeline_mode = #tpu.pipeline_mode<synchronous>, transform_indices = @transform_4, window_bounds = array<i64: 1, 128>}, {transform_indices = @transform_5, window_bounds = array<i64: 784, 128>}]} {
    %c0 = arith.constant 0 : index
    %c0_0 = arith.constant 0 : index
    %0 = vector.load %arg1[%c0, %c0_0] : memref<784x32xbf16, #tpu.memory_space<vmem>>, vector<784x32xbf16>
    %1 = arith.extf %0 : vector<784x32xbf16> to vector<784x32xf32>
    %c0_1 = arith.constant 0 : index
    %c0_2 = arith.constant 0 : index
    %2 = vector.load %arg2[%c0_1, %c0_2] : memref<1x32xf32, #tpu.memory_space<vmem>>, vector<1x32xf32>
    %3 = vector.broadcast %2 : vector<1x32xf32> to vector<784x32xf32>
    %4 = arith.mulf %1, %3 : vector<784x32xf32>
    %c0_3 = arith.constant 0 : index
    %c0_4 = arith.constant 0 : index
    %5 = vector.load %arg3[%c0_3, %c0_4] : memref<1x32xf32, #tpu.memory_space<vmem>>, vector<1x32xf32>
    %6 = vector.broadcast %5 : vector<1x32xf32> to vector<784x32xf32>
    %7 = arith.addf %4, %6 : vector<784x32xf32>
    %cst = arith.constant 0.000000e+00 : f32
    %8 = vector.broadcast %cst : f32 to vector<784x32xf32>
    %9 = arith.maximumf %7, %8 : vector<784x32xf32>
    %10 = arith.truncf %9 : vector<784x32xf32> to vector<784x32xbf16>
    %c0_5 = arith.constant 0 : index
    %c0_6 = arith.constant 0 : index
    %11 = vector.load %arg4[%c0_5, %c0_6] : memref<32x128xbf16, #tpu.memory_space<vmem>>, vector<32x128xbf16>
    %cst_7 = arith.constant dense<0.000000e+00> : vector<784x128xf32>
    %12 = tpu.matmul %10, %11, %cst_7 {dimension_numbers = #tpu.dot_dimension_numbers<[1], [0], [0], [1], [0, 0, 1, 1], [], []>} : vector<784x32xbf16>, vector<32x128xbf16>, vector<784x128xf32> -> vector<784x128xf32>
    %c0_8 = arith.constant 0 : index
    %c0_9 = arith.constant 0 : index
    %13 = vector.load %arg5[%c0_8, %c0_9] : memref<1x128xf32, #tpu.memory_space<vmem>>, vector<1x128xf32>
    %14 = vector.broadcast %13 : vector<1x128xf32> to vector<784x128xf32>
    %15 = arith.addf %12, %14 : vector<784x128xf32>
    %cst_10 = arith.constant 0.000000e+00 : f32
    %16 = vector.broadcast %cst_10 : f32 to vector<784x128xf32>
    %17 = arith.maximumf %15, %16 : vector<784x128xf32>
    %18 = arith.truncf %17 : vector<784x128xf32> to vector<784x128xbf16>
    %c0_11 = arith.constant 0 : index
    %c0_12 = arith.constant 0 : index
    %19 = vector.load %arg6[%c0_11, %c0_12] : memref<784x128xbf16, #tpu.memory_space<vmem>>, vector<784x128xbf16>
    tpu.vector_store %arg6[%c0_11, %c0_12], %18 {strides = array<i32>} : memref<784x128xbf16, #tpu.memory_space<vmem>>, vector<784x128xbf16>,
    return
  }
  func.func @transform_0(%arg0: i32) -> (i32, i32) {
    %c0_i32 = arith.constant 0 : i32
    %c0_i32_0 = arith.constant 0 : i32
    return %arg0, %c0_i32 : i32, i32
  }
  func.func @transform_1(%arg0: i32) -> (i32, i32) {
    %c0_i32 = arith.constant 0 : i32
    %c0_i32_0 = arith.constant 0 : i32
    %c0_i32_1 = arith.constant 0 : i32
    return %c0_i32, %c0_i32_0 : i32, i32
  }
  func.func @transform_2(%arg0: i32) -> (i32, i32) {
    %c0_i32 = arith.constant 0 : i32
    %c0_i32_0 = arith.constant 0 : i32
    %c0_i32_1 = arith.constant 0 : i32
    return %c0_i32, %c0_i32_0 : i32, i32
  }
  func.func @transform_3(%arg0: i32) -> (i32, i32) {
    %c0_i32 = arith.constant 0 : i32
    %c0_i32_0 = arith.constant 0 : i32
    %c0_i32_1 = arith.constant 0 : i32
    return %c0_i32, %c0_i32_0 : i32, i32
  }
  func.func @transform_4(%arg0: i32) -> (i32, i32) {
    %c0_i32 = arith.constant 0 : i32
    %c0_i32_0 = arith.constant 0 : i32
    %c0_i32_1 = arith.constant 0 : i32
    return %c0_i32, %c0_i32_0 : i32, i32
  }
  func.func @transform_5(%arg0: i32) -> (i32, i32) {
    %c0_i32 = arith.constant 0 : i32
    %c0_i32_0 = arith.constant 0 : i32
    return %arg0, %c0_i32 : i32, i32
  }
}

module attributes {stable_mosaic.version = 11 : i64} {
  func.func @_bn_relu_matmul_kernel(%arg0: i32, %arg1: memref<784x32xbf16, #tpu.memory_space<vmem>>, %arg2: memref<1x32xf32, #tpu.memory_space<vmem>>, %arg3: memref<1x32xf32, #tpu.memory_space<vmem>>, %arg4: memref<32x32xbf16, #tpu.memory_space<vmem>>, %arg5: memref<784x32xbf16, #tpu.memory_space<vmem>>) attributes {dimension_semantics = [#tpu.dimension_semantics<parallel>], iteration_bounds = array<i64: 2>, scalar_prefetch = 0 : i64, scratch_operands = 0 : i64, tpu.core_type = #tpu.core_type<tc>, window_params = [{transform_indices = @transform_0, window_bounds = array<i64: 784, 32>}, {pipeline_mode = #tpu.pipeline_mode<synchronous>, transform_indices = @transform_1, window_bounds = array<i64: 1, 32>}, {pipeline_mode = #tpu.pipeline_mode<synchronous>, transform_indices = @transform_2, window_bounds = array<i64: 1, 32>}, {pipeline_mode = #tpu.pipeline_mode<synchronous>, transform_indices = @transform_3, window_bounds = array<i64: 32, 32>}, {transform_indices = @transform_4, window_bounds = array<i64: 784, 32>}]} {
    %c0 = arith.constant 0 : index
    %c0_0 = arith.constant 0 : index
    %0 = vector.load %arg1[%c0, %c0_0] : memref<784x32xbf16, #tpu.memory_space<vmem>>, vector<784x32xbf16>
    %1 = arith.extf %0 : vector<784x32xbf16> to vector<784x32xf32>
    %c0_1 = arith.constant 0 : index
    %c0_2 = arith.constant 0 : index
    %2 = vector.load %arg2[%c0_1, %c0_2] : memref<1x32xf32, #tpu.memory_space<vmem>>, vector<1x32xf32>
    %3 = vector.broadcast %2 : vector<1x32xf32> to vector<784x32xf32>
    %4 = arith.mulf %1, %3 : vector<784x32xf32>
    %c0_3 = arith.constant 0 : index
    %c0_4 = arith.constant 0 : index
    %5 = vector.load %arg3[%c0_3, %c0_4] : memref<1x32xf32, #tpu.memory_space<vmem>>, vector<1x32xf32>
    %6 = vector.broadcast %5 : vector<1x32xf32> to vector<784x32xf32>
    %7 = arith.addf %4, %6 : vector<784x32xf32>
    %cst = arith.constant 0.000000e+00 : f32
    %8 = vector.broadcast %cst : f32 to vector<784x32xf32>
    %9 = arith.maximumf %7, %8 : vector<784x32xf32>
    %10 = arith.truncf %9 : vector<784x32xf32> to vector<784x32xbf16>
    %c0_5 = arith.constant 0 : index
    %c0_6 = arith.constant 0 : index
    %11 = vector.load %arg4[%c0_5, %c0_6] : memref<32x32xbf16, #tpu.memory_space<vmem>>, vector<32x32xbf16>
    %cst_7 = arith.constant dense<0.000000e+00> : vector<784x32xf32>
    %12 = tpu.matmul %10, %11, %cst_7 {dimension_numbers = #tpu.dot_dimension_numbers<[1], [0], [0], [1], [0, 0, 1, 1], [], []>} : vector<784x32xbf16>, vector<32x32xbf16>, vector<784x32xf32> -> vector<784x32xf32>
    %13 = arith.truncf %12 : vector<784x32xf32> to vector<784x32xbf16>
    %c0_8 = arith.constant 0 : index
    %c0_9 = arith.constant 0 : index
    %14 = vector.load %arg5[%c0_8, %c0_9] : memref<784x32xbf16, #tpu.memory_space<vmem>>, vector<784x32xbf16>
    tpu.vector_store %arg5[%c0_8, %c0_9], %13 {strides = array<i32>} : memref<784x32xbf16, #tpu.memory_space<vmem>>, vector<784x32xbf16>,
    return
  }
  func.func @transform_0(%arg0: i32) -> (i32, i32) {
    %c0_i32 = arith.constant 0 : i32
    %c0_i32_0 = arith.constant 0 : i32
    return %arg0, %c0_i32 : i32, i32
  }
  func.func @transform_1(%arg0: i32) -> (i32, i32) {
    %c0_i32 = arith.constant 0 : i32
    %c0_i32_0 = arith.constant 0 : i32
    %c0_i32_1 = arith.constant 0 : i32
    return %c0_i32, %c0_i32_0 : i32, i32
  }
  func.func @transform_2(%arg0: i32) -> (i32, i32) {
    %c0_i32 = arith.constant 0 : i32
    %c0_i32_0 = arith.constant 0 : i32
    %c0_i32_1 = arith.constant 0 : i32
    return %c0_i32, %c0_i32_0 : i32, i32
  }
  func.func @transform_3(%arg0: i32) -> (i32, i32) {
    %c0_i32 = arith.constant 0 : i32
    %c0_i32_0 = arith.constant 0 : i32
    %c0_i32_1 = arith.constant 0 : i32
    return %c0_i32, %c0_i32_0 : i32, i32
  }
  func.func @transform_4(%arg0: i32) -> (i32, i32) {
    %c0_i32 = arith.constant 0 : i32
    %c0_i32_0 = arith.constant 0 : i32
    return %arg0, %c0_i32 : i32, i32
  }
}

module attributes {stable_mosaic.version = 11 : i64} {
  func.func @_bottleneck_kernel(%arg0: i32, %arg1: memref<56x32xbf16, #tpu.memory_space<vmem>>, %arg2: memref<1x32xf32, #tpu.memory_space<vmem>>, %arg3: memref<1x32xf32, #tpu.memory_space<vmem>>, %arg4: memref<32x128xbf16, #tpu.memory_space<vmem>>, %arg5: memref<1x128xf32, #tpu.memory_space<vmem>>, %arg6: memref<56x128xbf16, #tpu.memory_space<vmem>>) attributes {dimension_semantics = [#tpu.dimension_semantics<parallel>], iteration_bounds = array<i64: 7>, scalar_prefetch = 0 : i64, scratch_operands = 0 : i64, tpu.core_type = #tpu.core_type<tc>, window_params = [{transform_indices = @transform_0, window_bounds = array<i64: 56, 32>}, {pipeline_mode = #tpu.pipeline_mode<synchronous>, transform_indices = @transform_1, window_bounds = array<i64: 1, 32>}, {pipeline_mode = #tpu.pipeline_mode<synchronous>, transform_indices = @transform_2, window_bounds = array<i64: 1, 32>}, {pipeline_mode = #tpu.pipeline_mode<synchronous>, transform_indices = @transform_3, window_bounds = array<i64: 32, 128>}, {pipeline_mode = #tpu.pipeline_mode<synchronous>, transform_indices = @transform_4, window_bounds = array<i64: 1, 128>}, {transform_indices = @transform_5, window_bounds = array<i64: 56, 128>}]} {
    %c0 = arith.constant 0 : index
    %c0_0 = arith.constant 0 : index
    %0 = vector.load %arg1[%c0, %c0_0] : memref<56x32xbf16, #tpu.memory_space<vmem>>, vector<56x32xbf16>
    %1 = arith.extf %0 : vector<56x32xbf16> to vector<56x32xf32>
    %c0_1 = arith.constant 0 : index
    %c0_2 = arith.constant 0 : index
    %2 = vector.load %arg2[%c0_1, %c0_2] : memref<1x32xf32, #tpu.memory_space<vmem>>, vector<1x32xf32>
    %3 = vector.broadcast %2 : vector<1x32xf32> to vector<56x32xf32>
    %4 = arith.mulf %1, %3 : vector<56x32xf32>
    %c0_3 = arith.constant 0 : index
    %c0_4 = arith.constant 0 : index
    %5 = vector.load %arg3[%c0_3, %c0_4] : memref<1x32xf32, #tpu.memory_space<vmem>>, vector<1x32xf32>
    %6 = vector.broadcast %5 : vector<1x32xf32> to vector<56x32xf32>
    %7 = arith.addf %4, %6 : vector<56x32xf32>
    %cst = arith.constant 0.000000e+00 : f32
    %8 = vector.broadcast %cst : f32 to vector<56x32xf32>
    %9 = arith.maximumf %7, %8 : vector<56x32xf32>
    %10 = arith.truncf %9 : vector<56x32xf32> to vector<56x32xbf16>
    %c0_5 = arith.constant 0 : index
    %c0_6 = arith.constant 0 : index
    %11 = vector.load %arg4[%c0_5, %c0_6] : memref<32x128xbf16, #tpu.memory_space<vmem>>, vector<32x128xbf16>
    %cst_7 = arith.constant dense<0.000000e+00> : vector<56x128xf32>
    %12 = tpu.matmul %10, %11, %cst_7 {dimension_numbers = #tpu.dot_dimension_numbers<[1], [0], [0], [1], [0, 0, 1, 1], [], []>} : vector<56x32xbf16>, vector<32x128xbf16>, vector<56x128xf32> -> vector<56x128xf32>
    %c0_8 = arith.constant 0 : index
    %c0_9 = arith.constant 0 : index
    %13 = vector.load %arg5[%c0_8, %c0_9] : memref<1x128xf32, #tpu.memory_space<vmem>>, vector<1x128xf32>
    %14 = vector.broadcast %13 : vector<1x128xf32> to vector<56x128xf32>
    %15 = arith.addf %12, %14 : vector<56x128xf32>
    %cst_10 = arith.constant 0.000000e+00 : f32
    %16 = vector.broadcast %cst_10 : f32 to vector<56x128xf32>
    %17 = arith.maximumf %15, %16 : vector<56x128xf32>
    %18 = arith.truncf %17 : vector<56x128xf32> to vector<56x128xbf16>
    %c0_11 = arith.constant 0 : index
    %c0_12 = arith.constant 0 : index
    %19 = vector.load %arg6[%c0_11, %c0_12] : memref<56x128xbf16, #tpu.memory_space<vmem>>, vector<56x128xbf16>
    tpu.vector_store %arg6[%c0_11, %c0_12], %18 {strides = array<i32>} : memref<56x128xbf16, #tpu.memory_space<vmem>>, vector<56x128xbf16>,
    return
  }
  func.func @transform_0(%arg0: i32) -> (i32, i32) {
    %c0_i32 = arith.constant 0 : i32
    %c0_i32_0 = arith.constant 0 : i32
    return %arg0, %c0_i32 : i32, i32
  }
  func.func @transform_1(%arg0: i32) -> (i32, i32) {
    %c0_i32 = arith.constant 0 : i32
    %c0_i32_0 = arith.constant 0 : i32
    %c0_i32_1 = arith.constant 0 : i32
    return %c0_i32, %c0_i32_0 : i32, i32
  }
  func.func @transform_2(%arg0: i32) -> (i32, i32) {
    %c0_i32 = arith.constant 0 : i32
    %c0_i32_0 = arith.constant 0 : i32
    %c0_i32_1 = arith.constant 0 : i32
    return %c0_i32, %c0_i32_0 : i32, i32
  }
  func.func @transform_3(%arg0: i32) -> (i32, i32) {
    %c0_i32 = arith.constant 0 : i32
    %c0_i32_0 = arith.constant 0 : i32
    %c0_i32_1 = arith.constant 0 : i32
    return %c0_i32, %c0_i32_0 : i32, i32
  }
  func.func @transform_4(%arg0: i32) -> (i32, i32) {
    %c0_i32 = arith.constant 0 : i32
    %c0_i32_0 = arith.constant 0 : i32
    %c0_i32_1 = arith.constant 0 : i32
    return %c0_i32, %c0_i32_0 : i32, i32
  }
  func.func @transform_5(%arg0: i32) -> (i32, i32) {
    %c0_i32 = arith.constant 0 : i32
    %c0_i32_0 = arith.constant 0 : i32
    return %arg0, %c0_i32 : i32, i32
  }
}

module attributes {stable_mosaic.version = 11 : i64} {
  func.func @_bn_relu_matmul_kernel(%arg0: i32, %arg1: memref<56x32xbf16, #tpu.memory_space<vmem>>, %arg2: memref<1x32xf32, #tpu.memory_space<vmem>>, %arg3: memref<1x32xf32, #tpu.memory_space<vmem>>, %arg4: memref<32x32xbf16, #tpu.memory_space<vmem>>, %arg5: memref<56x32xbf16, #tpu.memory_space<vmem>>) attributes {dimension_semantics = [#tpu.dimension_semantics<parallel>], iteration_bounds = array<i64: 7>, scalar_prefetch = 0 : i64, scratch_operands = 0 : i64, tpu.core_type = #tpu.core_type<tc>, window_params = [{transform_indices = @transform_0, window_bounds = array<i64: 56, 32>}, {pipeline_mode = #tpu.pipeline_mode<synchronous>, transform_indices = @transform_1, window_bounds = array<i64: 1, 32>}, {pipeline_mode = #tpu.pipeline_mode<synchronous>, transform_indices = @transform_2, window_bounds = array<i64: 1, 32>}, {pipeline_mode = #tpu.pipeline_mode<synchronous>, transform_indices = @transform_3, window_bounds = array<i64: 32, 32>}, {transform_indices = @transform_4, window_bounds = array<i64: 56, 32>}]} {
    %c0 = arith.constant 0 : index
    %c0_0 = arith.constant 0 : index
    %0 = vector.load %arg1[%c0, %c0_0] : memref<56x32xbf16, #tpu.memory_space<vmem>>, vector<56x32xbf16>
    %1 = arith.extf %0 : vector<56x32xbf16> to vector<56x32xf32>
    %c0_1 = arith.constant 0 : index
    %c0_2 = arith.constant 0 : index
    %2 = vector.load %arg2[%c0_1, %c0_2] : memref<1x32xf32, #tpu.memory_space<vmem>>, vector<1x32xf32>
    %3 = vector.broadcast %2 : vector<1x32xf32> to vector<56x32xf32>
    %4 = arith.mulf %1, %3 : vector<56x32xf32>
    %c0_3 = arith.constant 0 : index
    %c0_4 = arith.constant 0 : index
    %5 = vector.load %arg3[%c0_3, %c0_4] : memref<1x32xf32, #tpu.memory_space<vmem>>, vector<1x32xf32>
    %6 = vector.broadcast %5 : vector<1x32xf32> to vector<56x32xf32>
    %7 = arith.addf %4, %6 : vector<56x32xf32>
    %cst = arith.constant 0.000000e+00 : f32
    %8 = vector.broadcast %cst : f32 to vector<56x32xf32>
    %9 = arith.maximumf %7, %8 : vector<56x32xf32>
    %10 = arith.truncf %9 : vector<56x32xf32> to vector<56x32xbf16>
    %c0_5 = arith.constant 0 : index
    %c0_6 = arith.constant 0 : index
    %11 = vector.load %arg4[%c0_5, %c0_6] : memref<32x32xbf16, #tpu.memory_space<vmem>>, vector<32x32xbf16>
    %cst_7 = arith.constant dense<0.000000e+00> : vector<56x32xf32>
    %12 = tpu.matmul %10, %11, %cst_7 {dimension_numbers = #tpu.dot_dimension_numbers<[1], [0], [0], [1], [0, 0, 1, 1], [], []>} : vector<56x32xbf16>, vector<32x32xbf16>, vector<56x32xf32> -> vector<56x32xf32>
    %13 = arith.truncf %12 : vector<56x32xf32> to vector<56x32xbf16>
    %c0_8 = arith.constant 0 : index
    %c0_9 = arith.constant 0 : index
    %14 = vector.load %arg5[%c0_8, %c0_9] : memref<56x32xbf16, #tpu.memory_space<vmem>>, vector<56x32xbf16>
    tpu.vector_store %arg5[%c0_8, %c0_9], %13 {strides = array<i32>} : memref<56x32xbf16, #tpu.memory_space<vmem>>, vector<56x32xbf16>,
    return
  }
  func.func @transform_0(%arg0: i32) -> (i32, i32) {
    %c0_i32 = arith.constant 0 : i32
    %c0_i32_0 = arith.constant 0 : i32
    return %arg0, %c0_i32 : i32, i32
  }
  func.func @transform_1(%arg0: i32) -> (i32, i32) {
    %c0_i32 = arith.constant 0 : i32
    %c0_i32_0 = arith.constant 0 : i32
    %c0_i32_1 = arith.constant 0 : i32
    return %c0_i32, %c0_i32_0 : i32, i32
  }
  func.func @transform_2(%arg0: i32) -> (i32, i32) {
    %c0_i32 = arith.constant 0 : i32
    %c0_i32_0 = arith.constant 0 : i32
    %c0_i32_1 = arith.constant 0 : i32
    return %c0_i32, %c0_i32_0 : i32, i32
  }
  func.func @transform_3(%arg0: i32) -> (i32, i32) {
    %c0_i32 = arith.constant 0 : i32
    %c0_i32_0 = arith.constant 0 : i32
    %c0_i32_1 = arith.constant 0 : i32
    return %c0_i32, %c0_i32_0 : i32, i32
  }
  func.func @transform_4(%arg0: i32) -> (i32, i32) {
    %c0_i32 = arith.constant 0 : i32
    %c0_i32_0 = arith.constant 0 : i32
    return %arg0, %c0_i32 : i32, i32
  }
}

module attributes {stable_mosaic.version = 11 : i64} {
  func.func @_bottleneck_kernel(%arg0: i32, %arg1: memref<98x32xbf16, #tpu.memory_space<vmem>>, %arg2: memref<1x32xf32, #tpu.memory_space<vmem>>, %arg3: memref<1x32xf32, #tpu.memory_space<vmem>>, %arg4: memref<32x128xbf16, #tpu.memory_space<vmem>>, %arg5: memref<1x128xf32, #tpu.memory_space<vmem>>, %arg6: memref<98x128xbf16, #tpu.memory_space<vmem>>) attributes {dimension_semantics = [#tpu.dimension_semantics<parallel>], iteration_bounds = array<i64: 1>, scalar_prefetch = 0 : i64, scratch_operands = 0 : i64, tpu.core_type = #tpu.core_type<tc>, window_params = [{transform_indices = @transform_0, window_bounds = array<i64: 98, 32>}, {pipeline_mode = #tpu.pipeline_mode<synchronous>, transform_indices = @transform_1, window_bounds = array<i64: 1, 32>}, {pipeline_mode = #tpu.pipeline_mode<synchronous>, transform_indices = @transform_2, window_bounds = array<i64: 1, 32>}, {pipeline_mode = #tpu.pipeline_mode<synchronous>, transform_indices = @transform_3, window_bounds = array<i64: 32, 128>}, {pipeline_mode = #tpu.pipeline_mode<synchronous>, transform_indices = @transform_4, window_bounds = array<i64: 1, 128>}, {transform_indices = @transform_5, window_bounds = array<i64: 98, 128>}]} {
    %c0 = arith.constant 0 : index
    %c0_0 = arith.constant 0 : index
    %0 = vector.load %arg1[%c0, %c0_0] : memref<98x32xbf16, #tpu.memory_space<vmem>>, vector<98x32xbf16>
    %1 = arith.extf %0 : vector<98x32xbf16> to vector<98x32xf32>
    %c0_1 = arith.constant 0 : index
    %c0_2 = arith.constant 0 : index
    %2 = vector.load %arg2[%c0_1, %c0_2] : memref<1x32xf32, #tpu.memory_space<vmem>>, vector<1x32xf32>
    %3 = vector.broadcast %2 : vector<1x32xf32> to vector<98x32xf32>
    %4 = arith.mulf %1, %3 : vector<98x32xf32>
    %c0_3 = arith.constant 0 : index
    %c0_4 = arith.constant 0 : index
    %5 = vector.load %arg3[%c0_3, %c0_4] : memref<1x32xf32, #tpu.memory_space<vmem>>, vector<1x32xf32>
    %6 = vector.broadcast %5 : vector<1x32xf32> to vector<98x32xf32>
    %7 = arith.addf %4, %6 : vector<98x32xf32>
    %cst = arith.constant 0.000000e+00 : f32
    %8 = vector.broadcast %cst : f32 to vector<98x32xf32>
    %9 = arith.maximumf %7, %8 : vector<98x32xf32>
    %10 = arith.truncf %9 : vector<98x32xf32> to vector<98x32xbf16>
    %c0_5 = arith.constant 0 : index
    %c0_6 = arith.constant 0 : index
    %11 = vector.load %arg4[%c0_5, %c0_6] : memref<32x128xbf16, #tpu.memory_space<vmem>>, vector<32x128xbf16>
    %cst_7 = arith.constant dense<0.000000e+00> : vector<98x128xf32>
    %12 = tpu.matmul %10, %11, %cst_7 {dimension_numbers = #tpu.dot_dimension_numbers<[1], [0], [0], [1], [0, 0, 1, 1], [], []>} : vector<98x32xbf16>, vector<32x128xbf16>, vector<98x128xf32> -> vector<98x128xf32>
    %c0_8 = arith.constant 0 : index
    %c0_9 = arith.constant 0 : index
    %13 = vector.load %arg5[%c0_8, %c0_9] : memref<1x128xf32, #tpu.memory_space<vmem>>, vector<1x128xf32>
    %14 = vector.broadcast %13 : vector<1x128xf32> to vector<98x128xf32>
    %15 = arith.addf %12, %14 : vector<98x128xf32>
    %cst_10 = arith.constant 0.000000e+00 : f32
    %16 = vector.broadcast %cst_10 : f32 to vector<98x128xf32>
    %17 = arith.maximumf %15, %16 : vector<98x128xf32>
    %18 = arith.truncf %17 : vector<98x128xf32> to vector<98x128xbf16>
    %c0_11 = arith.constant 0 : index
    %c0_12 = arith.constant 0 : index
    %19 = vector.load %arg6[%c0_11, %c0_12] : memref<98x128xbf16, #tpu.memory_space<vmem>>, vector<98x128xbf16>
    tpu.vector_store %arg6[%c0_11, %c0_12], %18 {strides = array<i32>} : memref<98x128xbf16, #tpu.memory_space<vmem>>, vector<98x128xbf16>,
    return
  }
  func.func @transform_0(%arg0: i32) -> (i32, i32) {
    %c0_i32 = arith.constant 0 : i32
    %c0_i32_0 = arith.constant 0 : i32
    return %arg0, %c0_i32 : i32, i32
  }
  func.func @transform_1(%arg0: i32) -> (i32, i32) {
    %c0_i32 = arith.constant 0 : i32
    %c0_i32_0 = arith.constant 0 : i32
    %c0_i32_1 = arith.constant 0 : i32
    return %c0_i32, %c0_i32_0 : i32, i32
  }
  func.func @transform_2(%arg0: i32) -> (i32, i32) {
    %c0_i32 = arith.constant 0 : i32
    %c0_i32_0 = arith.constant 0 : i32
    %c0_i32_1 = arith.constant 0 : i32
    return %c0_i32, %c0_i32_0 : i32, i32
  }
  func.func @transform_3(%arg0: i32) -> (i32, i32) {
    %c0_i32 = arith.constant 0 : i32
    %c0_i32_0 = arith.constant 0 : i32
    %c0_i32_1 = arith.constant 0 : i32
    return %c0_i32, %c0_i32_0 : i32, i32
  }
  func.func @transform_4(%arg0: i32) -> (i32, i32) {
    %c0_i32 = arith.constant 0 : i32
    %c0_i32_0 = arith.constant 0 : i32
    %c0_i32_1 = arith.constant 0 : i32
    return %c0_i32, %c0_i32_0 : i32, i32
  }
  func.func @transform_5(%arg0: i32) -> (i32, i32) {
    %c0_i32 = arith.constant 0 : i32
    %c0_i32_0 = arith.constant 0 : i32
    return %arg0, %c0_i32 : i32, i32
  }
}

module attributes {stable_mosaic.version = 11 : i64} {
  func.func @_head_kernel(%arg0: i32, %arg1: memref<1x49x32xbf16, #tpu.memory_space<vmem>>, %arg2: memref<1x32xf32, #tpu.memory_space<vmem>>, %arg3: memref<1x32xf32, #tpu.memory_space<vmem>>, %arg4: memref<32x128xbf16, #tpu.memory_space<vmem>>, %arg5: memref<1x128xf32, #tpu.memory_space<vmem>>, %arg6: memref<1x1x128xf32, #tpu.memory_space<vmem>>) attributes {dimension_semantics = [#tpu.dimension_semantics<parallel>], iteration_bounds = array<i64: 2>, scalar_prefetch = 0 : i64, scratch_operands = 0 : i64, tpu.core_type = #tpu.core_type<tc>, window_params = [{transform_indices = @transform_0, window_bounds = array<i64: 1, 49, 32>}, {pipeline_mode = #tpu.pipeline_mode<synchronous>, transform_indices = @transform_1, window_bounds = array<i64: 1, 32>}, {pipeline_mode = #tpu.pipeline_mode<synchronous>, transform_indices = @transform_2, window_bounds = array<i64: 1, 32>}, {pipeline_mode = #tpu.pipeline_mode<synchronous>, transform_indices = @transform_3, window_bounds = array<i64: 32, 128>}, {pipeline_mode = #tpu.pipeline_mode<synchronous>, transform_indices = @transform_4, window_bounds = array<i64: 1, 128>}, {transform_indices = @transform_5, window_bounds = array<i64: 1, 1, 128>}]} {
    %c0 = arith.constant 0 : index
    %c0_0 = arith.constant 0 : index
    %c0_1 = arith.constant 0 : index
    %0 = vector.load %arg1[%c0, %c0_0, %c0_1] : memref<1x49x32xbf16, #tpu.memory_space<vmem>>, vector<1x49x32xbf16>
    %1 = vector.shape_cast %0 : vector<1x49x32xbf16> to vector<49x32xbf16>
    %2 = arith.extf %1 : vector<49x32xbf16> to vector<49x32xf32>
    %c0_2 = arith.constant 0 : index
    %c0_3 = arith.constant 0 : index
    %3 = vector.load %arg2[%c0_2, %c0_3] : memref<1x32xf32, #tpu.memory_space<vmem>>, vector<1x32xf32>
    %4 = vector.broadcast %3 : vector<1x32xf32> to vector<49x32xf32>
    %5 = arith.mulf %2, %4 : vector<49x32xf32>
    %c0_4 = arith.constant 0 : index
    %c0_5 = arith.constant 0 : index
    %6 = vector.load %arg3[%c0_4, %c0_5] : memref<1x32xf32, #tpu.memory_space<vmem>>, vector<1x32xf32>
    %7 = vector.broadcast %6 : vector<1x32xf32> to vector<49x32xf32>
    %8 = arith.addf %5, %7 : vector<49x32xf32>
    %cst = arith.constant 0.000000e+00 : f32
    %9 = vector.broadcast %cst : f32 to vector<49x32xf32>
    %10 = arith.maximumf %8, %9 : vector<49x32xf32>
    %cst_6 = arith.constant dense<0.000000e+00> : vector<32xf32>
    %11 = vector.multi_reduction <add>, %10, %cst_6 [0] : vector<49x32xf32> to vector<32xf32>
    %12 = vector.shape_cast %11 : vector<32xf32> to vector<1x32xf32>
    %cst_7 = arith.constant 0.0204081628 : f32
    %13 = vector.broadcast %cst_7 : f32 to vector<1x32xf32>
    %14 = arith.mulf %12, %13 : vector<1x32xf32>
    %15 = arith.truncf %14 : vector<1x32xf32> to vector<1x32xbf16>
    %c0_8 = arith.constant 0 : index
    %c0_9 = arith.constant 0 : index
    %16 = vector.load %arg4[%c0_8, %c0_9] : memref<32x128xbf16, #tpu.memory_space<vmem>>, vector<32x128xbf16>
    %cst_10 = arith.constant dense<0.000000e+00> : vector<1x128xf32>
    %17 = tpu.matmul %15, %16, %cst_10 {dimension_numbers = #tpu.dot_dimension_numbers<[1], [0], [0], [1], [0, 0, 1, 1], [], []>} : vector<1x32xbf16>, vector<32x128xbf16>, vector<1x128xf32> -> vector<1x128xf32>
    %c0_11 = arith.constant 0 : index
    %c0_12 = arith.constant 0 : index
    %18 = vector.load %arg5[%c0_11, %c0_12] : memref<1x128xf32, #tpu.memory_space<vmem>>, vector<1x128xf32>
    %19 = arith.addf %17, %18 : vector<1x128xf32>
    %c0_13 = arith.constant 0 : index
    %c0_14 = arith.constant 0 : index
    %c0_15 = arith.constant 0 : index
    %20 = vector.load %arg6[%c0_13, %c0_14, %c0_15] : memref<1x1x128xf32, #tpu.memory_space<vmem>>, vector<1x1x128xf32>
    %21 = vector.shape_cast %20 : vector<1x1x128xf32> to vector<1x128xf32>
    %22 = vector.shape_cast %19 : vector<1x128xf32> to vector<1x1x128xf32>
    tpu.vector_store %arg6[%c0_13, %c0_14, %c0_15], %22 {strides = array<i32>} : memref<1x1x128xf32, #tpu.memory_space<vmem>>, vector<1x1x128xf32>,
    return
  }
  func.func @transform_0(%arg0: i32) -> (i32, i32, i32) {
    %c0_i32 = arith.constant 0 : i32
    %c0_i32_0 = arith.constant 0 : i32
    %c0_i32_1 = arith.constant 0 : i32
    return %arg0, %c0_i32, %c0_i32_0 : i32, i32, i32
  }
  func.func @transform_1(%arg0: i32) -> (i32, i32) {
    %c0_i32 = arith.constant 0 : i32
    %c0_i32_0 = arith.constant 0 : i32
    %c0_i32_1 = arith.constant 0 : i32
    return %c0_i32, %c0_i32_0 : i32, i32
  }
  func.func @transform_2(%arg0: i32) -> (i32, i32) {
    %c0_i32 = arith.constant 0 : i32
    %c0_i32_0 = arith.constant 0 : i32
    %c0_i32_1 = arith.constant 0 : i32
    return %c0_i32, %c0_i32_0 : i32, i32
  }
  func.func @transform_3(%arg0: i32) -> (i32, i32) {
    %c0_i32 = arith.constant 0 : i32
    %c0_i32_0 = arith.constant 0 : i32
    %c0_i32_1 = arith.constant 0 : i32
    return %c0_i32, %c0_i32_0 : i32, i32
  }
  func.func @transform_4(%arg0: i32) -> (i32, i32) {
    %c0_i32 = arith.constant 0 : i32
    %c0_i32_0 = arith.constant 0 : i32
    %c0_i32_1 = arith.constant 0 : i32
    return %c0_i32, %c0_i32_0 : i32, i32
  }
  func.func @transform_5(%arg0: i32) -> (i32, i32, i32) {
    %c0_i32 = arith.constant 0 : i32
    %c0_i32_0 = arith.constant 0 : i32
    %c0_i32_1 = arith.constant 0 : i32
    return %arg0, %c0_i32, %c0_i32_0 : i32, i32, i32
  }
}

</mosaic_0001>

<bundles_post_ra>
// kernel: tile.13
= control target key start
LH: loop header
LB: loop body
LE: loop exit
PB: predicated region body
PF: predicated region fallthrough
CT: control target
= control target key end

     0   :  { %s22_s0 = inlined_call_operand.vmem [shape: f32[16], index: 0, kind: input, shape index: {}]   ;;  %s23_s1 = inlined_call_operand.vmem [shape: f32[8,16], index: 1, kind: output, shape index: {}]  }
   0x1   :  { %v4_v0 = vld [vmem:[%s22_s0] ss:$0 sm:$0xff] }
   0x2   :  { %5 = vst [vmem:[%s23_s1] sm:$0xff] %v4_v0 }

// kernel: tile.14
= control target key start
LH: loop header
LB: loop body
LE: loop exit
PB: predicated region body
PF: predicated region fallthrough
CT: control target
= control target key end

     0   :  { %s67_s10 = smov 112   ;;  %s68_s11 = smov 80   ;;  %vm3_vm0 = vcmask 130048   ;;  %vm9_vm1 = vcmask 1048448   ;;  %vm15_vm2 = vcmask 917248   ;;  %vm21_vm3 = vcmask 786048   ;;  %s111_s0 = inlined_call_operand.vmem [shape: f32[8,16], index: 0, kind: input, shape index: {}]   ;;  %s112_s1 = inlined_call_operand.vmem [shape: f32[1,128], index: 1, kind: output, shape index: {}]  }
   0x1   :  { %v53_v0 = vld [vmem:[%s111_s0 + $0x7] sm:$0x1]   ;;  %v55_v1 = vld [vmem:[%s111_s0 + $0x5] sm:$0x1]   ;;  %v54_v2 = vld [vmem:[%s111_s0 + $0x6] sm:$0x1]  }
   0x2   :  { %7 = vrot.lane.b32.xlu0 %v53_v0, %s67_s10  ;;  %19 = vrot.lane.b32.xlu1 %v55_v1, %s68_s11  ;;  %v56_v3 = vld [vmem:[%s111_s0 + $0x4] sm:$0x1]   ;;  %v2_v4 = vld [vmem:[%s111_s0] sm:$0x1]   ;;  %s69_s18 = smov 96   ;;  %s70_s19 = smov 64  }
   0x3   :  { %4 = vst.msk [vmem:[#allocation0] sm:$0x1] %vm3_vm0, %v2_v4   ;;  %v57_v5 = vld [vmem:[%s111_s0 + $0x3] sm:$0x1]   ;;  %v58_v6 = vld [vmem:[%s111_s0 + $0x2] sm:$0x1]  }
   0x4   :  { %s71_s24 = smov 48   ;;  %s72_s25 = smov 32   ;;  %v59_v7 = vld [vmem:[%s111_s0 + $0x1] sm:$0x1]   ;;  %vm27_vm4 = vcmask 654848   ;;  %vm33_vm5 = vcmask 523648  }
   0x5   :  { %s73_s0 = smov 16   ;;  %vm39_vm6 = vcmask 392448   ;;  %vm45_vm7 = vcmask 261248  }
   0x6   :  { %13 = vrot.lane.b32.xlu0 %v54_v2, %s69_s18  ;;  %25 = vrot.lane.b32.xlu1 %v56_v3, %s70_s19 }
   0xa   :  { %31 = vrot.lane.b32.xlu0 %v57_v5, %s71_s24  ;;  %37 = vrot.lane.b32.xlu1 %v58_v6, %s72_s25 }
   0xe   :  { %43 = vrot.lane.b32.xlu0 %v59_v7, %s73_s0 }
  0x74   :  { %v8_v8 = vpop.permute.xlu0 %7   ;;  %v20_v9 = vpop.permute.xlu1 %19  }
  0x75   :  { %10 = vst.msk [vmem:[#allocation0] sm:$0x1] %vm9_vm1, %v8_v8  }
  0x78   :  { %v14_v10 = vpop.permute.xlu0 %13   ;;  %v26_v11 = vpop.permute.xlu1 %25  }
  0x79   :  { %16 = vst.msk [vmem:[#allocation0] sm:$0x1] %vm15_vm2, %v14_v10  }
  0x7a   :  { %22 = vst.msk [vmem:[#allocation0] sm:$0x1] %vm21_vm3, %v20_v9  }
  0x7b   :  { %28 = vst.msk [vmem:[#allocation0] sm:$0x1] %vm27_vm4, %v26_v11  }
  0x7c   :  { %v32_v12 = vpop.permute.xlu0 %31   ;;  %v38_v13 = vpop.permute.xlu1 %37  }
  0x7d   :  { %34 = vst.msk [vmem:[#allocation0] sm:$0x1] %vm33_vm5, %v32_v12  }
  0x7e   :  { %40 = vst.msk [vmem:[#allocation0] sm:$0x1] %vm39_vm6, %v38_v13  }
  0x80   :  { %v44_v14 = vpop.permute.xlu0 %43  }
  0x81   :  { %46 = vst.msk [vmem:[#allocation0] sm:$0x1] %vm45_vm7, %v44_v14  }
  0x88   :  { %v50_v15 = vld [vmem:[#allocation0] sm:$0x1] }
  0x89   :  { %52 = vst [vmem:[%s112_s1] sm:$0x1] %v50_v15 }

// kernel: forward.10
= control target key start
LH: loop header
LB: loop body
LE: loop exit
PB: predicated region body
PF: predicated region fallthrough
CT: control target
= control target key end

     0   :  { %s974_s12 = smov 0   ;;  %s1181_s0 = inlined_call_operand.vmem [shape: f32[784,128], index: 0, kind: input, shape index: {}]   ;;  %s1182_s1 = inlined_call_operand.vmem [shape: f32[1,128], index: 1, kind: input, shape index: {}]   ;;  %s1183_s2 = inlined_call_operand.vmem [shape: f32[1,128], index: 2, kind: input, shape index: {}]   ;;  %s1184_s3 = inlined_call_operand.vmem [shape: bf16[784,128], index: 3, kind: output, shape index: {}]  }
   0x1 LB: > { %s686_s13 = sadd.s32 4294967295, %s952_s12   ;;  %p690_p0 = scmp.ge.s32.totalorder %s952_s12, 1  ;;  %s952_s12 = sphi %s974_s12, %s13_s12  }
   0x2   : > { %p138_p1 = scmp.lt.s32.totalorder %s952_s12, 3 }
   0x4   : > { %p139_p2 = pnand %p690_p0, %p138_p1 }
   0x5   : > { %s162_s14 = smul.u32 (!%p139_p2), 49, %s686_s13  ;;  %v988_v0 = vld [vmem:[%s1182_s1] ss:$0 sm:$0xff] (!%p139_p2) }
   0x6   : > { %142 = sbr.rel (%p139_p2) target bundleno = 66 (0x42), region = 32  ;;  %v998_v1 = vld [vmem:[%s1183_s2] ss:$0 sm:$0xff] (!%p139_p2) }
   0x7   : > { %p163_p3 = scmp.lt.s32.totalorder (!%p139_p2), %s162_s14, 97 }
   0xd   : > { %s1186_s14 = smov (!%p163_p3, %s162_s14), 97 }
   0xe   : > { %s691_s15 = sshll.u32 %s1186_s14, 3  ;;  %s692_s23 = sshll.u32 %s1186_s14, 2 }
   0xf   : > { %s993_s20 = scalar_lea.vmem %s1181_s0, %s691_s15  ;;  %s1030_s26 = scalar_lea.vmem %s1184_s3, %s692_s23 }
  0x10   : > { %v174_v2 = vld [vmem:[%s993_s20] sm:$0xff]  ;;  %v175_v3 = vld [vmem:[%s993_s20 + $0x8] sm:$0xff]  ;;  %v176_v4 = vld [vmem:[%s993_s20 + $0x10] sm:$0xff] }
  0x11   : > { %v230_v5 = vmul.f32 %v988_v0, %v174_v2  ;;  %v231_v6 = vmul.f32 %v988_v0, %v175_v3  ;;  %v177_v7 = vld [vmem:[%s993_s20 + $0x18] sm:$0xff]  ;;  %v232_v8 = vmul.f32 %v988_v0, %v176_v4  ;;  %v178_v9 = vld [vmem:[%s993_s20 + $0x20] sm:$0xff]  ;;  %v179_v10 = vld [vmem:[%s993_s20 + $0x28] sm:$0xff] }
  0x12   : > { %v233_v11 = vmul.f32 %v988_v0, %v177_v7  ;;  %v234_v12 = vmul.f32 %v988_v0, %v178_v9  ;;  %v235_v13 = vmul.f32 %v988_v0, %v179_v10  ;;  %v180_v14 = vld [vmem:[%s993_s20 + $0x30] sm:$0xff]  ;;  %v181_v15 = vld [vmem:[%s993_s20 + $0x38] sm:$0xff]  ;;  %v182_v24 = vld [vmem:[%s993_s20 + $0x40] sm:$0xff] }
  0x13   : > { %v286_v16 = vadd.f32 %v998_v1, %v230_v5  ;;  %v287_v17 = vadd.f32 %v998_v1, %v231_v6  ;;  %v288_v18 = vadd.f32 %v998_v1, %v232_v8  ;;  %v236_v19 = vmul.f32 %v988_v0, %v180_v14  ;;  %v183_v25 = vld [vmem:[%s993_s20 + $0x48] sm:$0xff]  ;;  %v184_v30 = vld [vmem:[%s993_s20 + $0x50] sm:$0xff]  ;;  %v185_v35 = vld [vmem:[%s993_s20 + $0x58] sm:$0xff] }
  0x14   : > { %v289_v20 = vadd.f32 %v998_v1, %v233_v11  ;;  %v290_v21 = vadd.f32 %v998_v1, %v234_v12  ;;  %v291_v22 = vadd.f32 %v998_v1, %v235_v13  ;;  %v237_v23 = vmul.f32 %v988_v0, %v181_v15  ;;  %v186_v36 = vld [vmem:[%s993_s20 + $0x60] sm:$0xff]  ;;  %v187_v41 = vld [vmem:[%s993_s20 + $0x68] sm:$0xff]  ;;  %v188_v42 = vld [vmem:[%s993_s20 + $0x70] sm:$0xff] }
  0x15   : > { %v335_v26 = vmax.f32 %v286_v16, 0.0  ;;  %v336_v27 = vmax.f32 %v287_v17, 0.0  ;;  %v337_v28 = vmax.f32 %v288_v18, 0.0  ;;  %v292_v29 = vadd.f32 %v998_v1, %v236_v19  ;;  %v189_v51 = vld [vmem:[%s993_s20 + $0x78] sm:$0xff]  ;;  %v190_v56 = vld [vmem:[%s993_s20 + $0x80] sm:$0xff]  ;;  %v191_v61 = vld [vmem:[%s993_s20 + $0x88] sm:$0xff] }
  0x16   : > { %v338_v31 = vmax.f32 %v289_v20, 0.0  ;;  %v339_v32 = vmax.f32 %v290_v21, 0.0  ;;  %v340_v33 = vmax.f32 %v291_v22, 0.0  ;;  %v293_v34 = vadd.f32 %v998_v1, %v237_v23  ;;  %v192_v4 = vld [vmem:[%s993_s20 + $0x90] sm:$0xff]  ;;  %v193_v5 = vld [vmem:[%s993_s20 + $0x98] sm:$0xff]  ;;  %v194_v10 = vld [vmem:[%s993_s20 + $0xa0] sm:$0xff] }
  0x17   : > { %v798_v37 = vpack.c.bf16 %v336_v27, %v335_v26  ;;  %v341_v38 = vmax.f32 %v292_v29, 0.0  ;;  %v238_v39 = vmul.f32 %v988_v0, %v182_v24  ;;  %v239_v40 = vmul.f32 %v988_v0, %v183_v25  ;;  %v195_v15 = vld [vmem:[%s993_s20 + $0xa8] sm:$0xff]  ;;  %v196_v20 = vld [vmem:[%s993_s20 + $0xb0] sm:$0xff]  ;;  %v197_v25 = vld [vmem:[%s993_s20 + $0xb8] sm:$0xff] }
  0x18   : > { %v803_v43 = vpack.c.bf16 %v338_v31, %v337_v28  ;;  %v808_v44 = vpack.c.bf16 %v340_v33, %v339_v32  ;;  %v342_v45 = vmax.f32 %v293_v34, 0.0  ;;  %v240_v46 = vmul.f32 %v988_v0, %v184_v30  ;;  %v198_v30 = vld [vmem:[%s993_s20 + $0xc0] sm:$0xff] }
  0x19   : > { %799 = vst [vmem:[%s1030_s26] sm:$0xff] %v798_v37   ;;  %v294_v47 = vadd.f32 %v998_v1, %v238_v39  ;;  %v295_v48 = vadd.f32 %v998_v1, %v239_v40  ;;  %v241_v49 = vmul.f32 %v988_v0, %v185_v35  ;;  %v242_v50 = vmul.f32 %v988_v0, %v186_v36  ;;  %v199_v35 = vld [vmem:[%s993_s20 + $0xc8] sm:$0xff]  ;;  %v200_v40 = vld [vmem:[%s993_s20 + $0xd0] sm:$0xff] }
  0x1a   : > { %915 = vst [vmem:[%s1030_s26 + $0x8] sm:$0xff] %v803_v43   ;;  %916 = vst [vmem:[%s1030_s26 + $0x10] sm:$0xff] %v808_v44   ;;  %v813_v52 = vpack.c.bf16 %v342_v45, %v341_v38  ;;  %v296_v53 = vadd.f32 %v998_v1, %v240_v46  ;;  %v243_v54 = vmul.f32 %v988_v0, %v187_v41  ;;  %v201_v41 = vld [vmem:[%s993_s20 + $0xd8] sm:$0xff]  ;;  %v202_v46 = vld [vmem:[%s993_s20 + $0xe0] sm:$0xff] }
  0x1b   : > { %v244_v55 = vmul.f32 %v988_v0, %v188_v42  ;;  %v343_v57 = vmax.f32 %v294_v47, 0.0  ;;  %v344_v58 = vmax.f32 %v295_v48, 0.0  ;;  %v297_v59 = vadd.f32 %v998_v1, %v241_v49 }
  0x1c   : > { %v298_v60 = vadd.f32 %v998_v1, %v242_v50  ;;  %917 = vst [vmem:[%s1030_s26 + $0x18] sm:$0xff] %v813_v52   ;;  %v345_v62 = vmax.f32 %v296_v53, 0.0  ;;  %v299_v63 = vadd.f32 %v998_v1, %v243_v54  ;;  %v245_v2 = vmul.f32 %v988_v0, %v189_v51  ;;  %v203_v51 = vld [vmem:[%s993_s20 + $0xe8] sm:$0xff] }
  0x1d   : > { %v300_v3 = vadd.f32 %v998_v1, %v244_v55  ;;  %v818_v6 = vpack.c.bf16 %v344_v58, %v343_v57  ;;  %v346_v7 = vmax.f32 %v297_v59, 0.0  ;;  %v246_v9 = vmul.f32 %v988_v0, %v190_v56  ;;  %v204_v56 = vld [vmem:[%s993_s20 + $0xf0] sm:$0xff] }
  0x1e   : > { %v347_v8 = vmax.f32 %v298_v60, 0.0  ;;  %v348_v11 = vmax.f32 %v299_v63, 0.0  ;;  %v301_v12 = vadd.f32 %v998_v1, %v245_v2  ;;  %v247_v14 = vmul.f32 %v988_v0, %v191_v61  ;;  %v205_v61 = vld [vmem:[%s993_s20 + $0xf8] sm:$0xff] }
  0x1f   : > { %v349_v13 = vmax.f32 %v300_v3, 0.0  ;;  %918 = vst [vmem:[%s1030_s26 + $0x20] sm:$0xff] %v818_v6   ;;  %v823_v16 = vpack.c.bf16 %v346_v7, %v345_v62  ;;  %v302_v17 = vadd.f32 %v998_v1, %v246_v9  ;;  %v248_v18 = vmul.f32 %v988_v0, %v192_v4  ;;  %v206_v4 = vld [vmem:[%s993_s20 + $0x100] sm:$0xff]  ;;  %v207_v9 = vld [vmem:[%s993_s20 + $0x108] sm:$0xff] }
  0x20   : > { %v249_v19 = vmul.f32 %v988_v0, %v193_v5  ;;  %v828_v21 = vpack.c.bf16 %v348_v11, %v347_v8  ;;  %v350_v22 = vmax.f32 %v301_v12, 0.0  ;;  %v303_v23 = vadd.f32 %v998_v1, %v247_v14  ;;  %v208_v14 = vld [vmem:[%s993_s20 + $0x110] sm:$0xff] }
  0x21   : > { %v250_v24 = vmul.f32 %v988_v0, %v194_v10  ;;  %919 = vst [vmem:[%s1030_s26 + $0x28] sm:$0xff] %v823_v16   ;;  %v351_v26 = vmax.f32 %v302_v17, 0.0  ;;  %v304_v27 = vadd.f32 %v998_v1, %v248_v18  ;;  %v251_v29 = vmul.f32 %v988_v0, %v195_v15  ;;  %v209_v15 = vld [vmem:[%s993_s20 + $0x118] sm:$0xff] }
  0x22   : > { %v305_v28 = vadd.f32 %v998_v1, %v249_v19  ;;  %920 = vst [vmem:[%s1030_s26 + $0x30] sm:$0xff] %v828_v21   ;;  %v833_v31 = vpack.c.bf16 %v350_v22, %v349_v13  ;;  %v352_v32 = vmax.f32 %v303_v23, 0.0  ;;  %v252_v34 = vmul.f32 %v988_v0, %v196_v20  ;;  %v210_v20 = vld [vmem:[%s993_s20 + $0x120] sm:$0xff] }
  0x23   : > { %v306_v33 = vadd.f32 %v998_v1, %v250_v24  ;;  %v353_v36 = vmax.f32 %v304_v27, 0.0  ;;  %v307_v38 = vadd.f32 %v998_v1, %v251_v29  ;;  %v253_v39 = vmul.f32 %v988_v0, %v197_v25  ;;  %v211_v25 = vld [vmem:[%s993_s20 + $0x128] sm:$0xff] }
  0x24   : > { %v354_v37 = vmax.f32 %v305_v28, 0.0  ;;  %921 = vst [vmem:[%s1030_s26 + $0x38] sm:$0xff] %v833_v31   ;;  %v838_v42 = vpack.c.bf16 %v352_v32, %v351_v26  ;;  %v308_v44 = vadd.f32 %v998_v1, %v252_v34  ;;  %v254_v45 = vmul.f32 %v988_v0, %v198_v30  ;;  %v212_v30 = vld [vmem:[%s993_s20 + $0x130] sm:$0xff] }
  0x25   : > { %v355_v43 = vmax.f32 %v306_v33, 0.0  ;;  %v356_v48 = vmax.f32 %v307_v38, 0.0  ;;  %v309_v49 = vadd.f32 %v998_v1, %v253_v39  ;;  %v255_v50 = vmul.f32 %v988_v0, %v199_v35  ;;  %v213_v35 = vld [vmem:[%s993_s20 + $0x138] sm:$0xff] }
  0x26   : > { %v843_v47 = vpack.c.bf16 %v354_v37, %v353_v36  ;;  %922 = vst [vmem:[%s1030_s26 + $0x40] sm:$0xff] %v838_v42   ;;  %v357_v52 = vmax.f32 %v308_v44, 0.0  ;;  %v310_v53 = vadd.f32 %v998_v1, %v254_v45  ;;  %v256_v54 = vmul.f32 %v988_v0, %v200_v40  ;;  %v214_v40 = vld [vmem:[%s993_s20 + $0x140] sm:$0xff]  ;;  %v215_v45 = vld [vmem:[%s993_s20 + $0x148] sm:$0xff] }
  0x27   : > { %v257_v55 = vmul.f32 %v988_v0, %v201_v41  ;;  %v848_v57 = vpack.c.bf16 %v356_v48, %v355_v43  ;;  %v358_v58 = vmax.f32 %v309_v49, 0.0  ;;  %v311_v59 = vadd.f32 %v998_v1, %v255_v50  ;;  %v216_v50 = vld [vmem:[%s993_s20 + $0x150] sm:$0xff] }
  0x28   : > { %923 = vst [vmem:[%s1030_s26 + $0x48] sm:$0xff] %v843_v47   ;;  %v258_v60 = vmul.f32 %v988_v0, %v202_v46  ;;  %v359_v62 = vmax.f32 %v310_v53, 0.0  ;;  %v312_v63 = vadd.f32 %v998_v1, %v256_v54  ;;  %v259_v3 = vmul.f32 %v988_v0, %v203_v51  ;;  %v217_v51 = vld [vmem:[%s993_s20 + $0x158] sm:$0xff] }
  0x29   : > { %v313_v2 = vadd.f32 %v998_v1, %v257_v55  ;;  %924 = vst [vmem:[%s1030_s26 + $0x50] sm:$0xff] %v848_v57   ;;  %v853_v5 = vpack.c.bf16 %v358_v58, %v357_v52  ;;  %v360_v6 = vmax.f32 %v311_v59, 0.0  ;;  %v260_v8 = vmul.f32 %v988_v0, %v204_v56  ;;  %v218_v56 = vld [vmem:[%s993_s20 + $0x160] sm:$0xff] }
  0x2a   : > { %v314_v7 = vadd.f32 %v998_v1, %v258_v60  ;;  %v361_v10 = vmax.f32 %v312_v63, 0.0  ;;  %v315_v12 = vadd.f32 %v998_v1, %v259_v3  ;;  %v261_v13 = vmul.f32 %v988_v0, %v205_v61  ;;  %v219_v61 = vld [vmem:[%s993_s20 + $0x168] sm:$0xff] }
  0x2b   : > { %v362_v11 = vmax.f32 %v313_v2, 0.0  ;;  %925 = vst [vmem:[%s1030_s26 + $0x58] sm:$0xff] %v853_v5   ;;  %v858_v16 = vpack.c.bf16 %v360_v6, %v359_v62  ;;  %v316_v18 = vadd.f32 %v998_v1, %v260_v8  ;;  %v262_v19 = vmul.f32 %v988_v0, %v206_v4  ;;  %v220_v4 = vld [vmem:[%s993_s20 + $0x170] sm:$0xff] }
  0x2c   : > { %v363_v17 = vmax.f32 %v314_v7, 0.0  ;;  %v364_v22 = vmax.f32 %v315_v12, 0.0  ;;  %v317_v23 = vadd.f32 %v998_v1, %v261_v13  ;;  %v263_v24 = vmul.f32 %v988_v0, %v207_v9  ;;  %v221_v9 = vld [vmem:[%s993_s20 + $0x178] sm:$0xff] }
  0x2d   : > { %v863_v21 = vpack.c.bf16 %v362_v11, %v361_v10  ;;  %926 = vst [vmem:[%s1030_s26 + $0x60] sm:$0xff] %v858_v16   ;;  %v365_v26 = vmax.f32 %v316_v18, 0.0  ;;  %v318_v27 = vadd.f32 %v998_v1, %v262_v19  ;;  %v264_v28 = vmul.f32 %v988_v0, %v208_v14  ;;  %v222_v14 = vld [vmem:[%s993_s20 + $0x180] sm:$0xff] }
  0x2e   : > { %v265_v29 = vmul.f32 %v988_v0, %v209_v15  ;;  %v868_v31 = vpack.c.bf16 %v364_v22, %v363_v17  ;;  %v366_v32 = vmax.f32 %v317_v23, 0.0  ;;  %v319_v33 = vadd.f32 %v998_v1, %v263_v24 }
  0x2f   : > { %927 = vst [vmem:[%s1030_s26 + $0x68] sm:$0xff] %v863_v21   ;;  %v266_v34 = vmul.f32 %v988_v0, %v210_v20  ;;  %v367_v36 = vmax.f32 %v318_v27, 0.0  ;;  %v320_v37 = vadd.f32 %v998_v1, %v264_v28  ;;  %v267_v39 = vmul.f32 %v988_v0, %v211_v25 }
  0x30   : > { %v321_v38 = vadd.f32 %v998_v1, %v265_v29  ;;  %928 = vst [vmem:[%s1030_s26 + $0x70] sm:$0xff] %v868_v31   ;;  %v873_v41 = vpack.c.bf16 %v366_v32, %v365_v26  ;;  %v368_v42 = vmax.f32 %v319_v33, 0.0  ;;  %v268_v44 = vmul.f32 %v988_v0, %v212_v30 }
  0x31   : > { %v322_v43 = vadd.f32 %v998_v1, %v266_v34  ;;  %v369_v46 = vmax.f32 %v320_v37, 0.0  ;;  %v323_v48 = vadd.f32 %v998_v1, %v267_v39  ;;  %v269_v49 = vmul.f32 %v988_v0, %v213_v35 }
  0x32   : > { %v370_v47 = vmax.f32 %v321_v38, 0.0  ;;  %929 = vst [vmem:[%s1030_s26 + $0x78] sm:$0xff] %v873_v41   ;;  %v878_v52 = vpack.c.bf16 %v368_v42, %v367_v36  ;;  %v324_v54 = vadd.f32 %v998_v1, %v268_v44  ;;  %v270_v55 = vmul.f32 %v988_v0, %v214_v40 }
  0x33   : > { %v371_v53 = vmax.f32 %v322_v43, 0.0  ;;  %v372_v58 = vmax.f32 %v323_v48, 0.0  ;;  %v325_v59 = vadd.f32 %v998_v1, %v269_v49  ;;  %v271_v60 = vmul.f32 %v988_v0, %v215_v45 }
  0x34   : > { %v883_v57 = vpack.c.bf16 %v370_v47, %v369_v46  ;;  %930 = vst [vmem:[%s1030_s26 + $0x80] sm:$0xff] %v878_v52   ;;  %v373_v62 = vmax.f32 %v324_v54, 0.0  ;;  %v326_v63 = vadd.f32 %v998_v1, %v270_v55  ;;  %v272_v2 = vmul.f32 %v988_v0, %v216_v50 }
  0x35   : > { %v273_v3 = vmul.f32 %v988_v0, %v217_v51  ;;  %v888_v5 = vpack.c.bf16 %v372_v58, %v371_v53  ;;  %v374_v6 = vmax.f32 %v325_v59, 0.0  ;;  %v327_v7 = vadd.f32 %v998_v1, %v271_v60 }
  0x36   : > { %931 = vst [vmem:[%s1030_s26 + $0x88] sm:$0xff] %v883_v57   ;;  %v274_v8 = vmul.f32 %v988_v0, %v218_v56  ;;  %v375_v10 = vmax.f32 %v326_v63, 0.0  ;;  %v328_v11 = vadd.f32 %v998_v1, %v272_v2  ;;  %v275_v13 = vmul.f32 %v988_v0, %v219_v61 }
  0x37   : > { %v329_v12 = vadd.f32 %v998_v1, %v273_v3  ;;  %932 = vst [vmem:[%s1030_s26 + $0x90] sm:$0xff] %v888_v5   ;;  %v893_v15 = vpack.c.bf16 %v374_v6, %v373_v62  ;;  %v376_v16 = vmax.f32 %v327_v7, 0.0  ;;  %v276_v18 = vmul.f32 %v988_v0, %v220_v4 }
  0x38   : > { %v330_v17 = vadd.f32 %v998_v1, %v274_v8  ;;  %v377_v19 = vmax.f32 %v328_v11, 0.0  ;;  %v331_v21 = vadd.f32 %v998_v1, %v275_v13  ;;  %v277_v22 = vmul.f32 %v988_v0, %v221_v9 }
  0x39   : > { %v378_v20 = vmax.f32 %v329_v12, 0.0  ;;  %933 = vst [vmem:[%s1030_s26 + $0x98] sm:$0xff] %v893_v15   ;;  %v898_v23 = vpack.c.bf16 %v376_v16, %v375_v10  ;;  %v332_v25 = vadd.f32 %v998_v1, %v276_v18  ;;  %v278_v26 = vmul.f32 %v988_v0, %v222_v14 }
  0x3a   : > { %v379_v24 = vmax.f32 %v330_v17, 0.0  ;;  %v380_v28 = vmax.f32 %v331_v21, 0.0  ;;  %v333_v29 = vadd.f32 %v998_v1, %v277_v22 }
  0x3b   : > { %v903_v27 = vpack.c.bf16 %v378_v20, %v377_v19  ;;  %934 = vst [vmem:[%s1030_s26 + $0xa0] sm:$0xff] %v898_v23   ;;  %v381_v30 = vmax.f32 %v332_v25, 0.0  ;;  %v334_v31 = vadd.f32 %v998_v1, %v278_v26 }
  0x3c   : > { %v908_v32 = vpack.c.bf16 %v380_v28, %v379_v24  ;;  %v382_v33 = vmax.f32 %v333_v29, 0.0 }
  0x3d   : > { %935 = vst [vmem:[%s1030_s26 + $0xa8] sm:$0xff] %v903_v27   ;;  %v383_v34 = vmax.f32 %v334_v31, 0.0 }
  0x3e   : > { %936 = vst [vmem:[%s1030_s26 + $0xb0] sm:$0xff] %v908_v32   ;;  %v913_v35 = vpack.c.bf16 %v382_v33, %v381_v30 }
  0x3f   : > { %v794_v36 = vpack.c.bf16 %v383_v34, %v383_v34 }
  0x40   : > { %937 = vst [vmem:[%s1030_s26 + $0xb8] sm:$0xff] %v913_v35  }
  0x41   : > { %629 = vst [vmem:[%s1030_s26 + $0xc0] sm:$0xf] %v794_v36 }
  0x42 PF: > { %s13_s12 = sadd.s32 1, %s952_s12  }
  0x43   : > { %p10_p4 = scmp.ge.s32.totalorder %s13_s12, 4  }
  0x45   :  { %12 = sbr.rel (!%p10_p4) target bundleno = 1 (0x1), region = 62 }

// kernel: forward.11
= control target key start
LH: loop header
LB: loop body
LE: loop exit
PB: predicated region body
PF: predicated region fallthrough
CT: control target
= control target key end

     0   :  { %s3127_s18 = smov 0   ;;  %s3705_s0 = inlined_call_operand.vmem [shape: bf16[1568,32], index: 0, kind: input, shape index: {}]   ;;  %s3706_s1 = inlined_call_operand.vmem [shape: f32[1,32], index: 1, kind: input, shape index: {}]   ;;  %s3707_s2 = inlined_call_operand.vmem [shape: f32[1,32], index: 2, kind: input, shape index: {}]   ;;  %s3708_s3 = inlined_call_operand.vmem [shape: bf16[32,128], index: 3, kind: input, shape index: {}]   ;;  %s3709_s4 = inlined_call_operand.vmem [shape: f32[1,128], index: 4, kind: input, shape index: {}]   ;;  %s3710_s5 = inlined_call_operand.vmem [shape: bf16[1568,128], index: 5, kind: output, shape index: {}]  }
   0x1 LB: > { %s2022_s19 = sadd.s32 4294967295, %s3093_s18   ;;  %p2026_p0 = scmp.ge.s32.totalorder %s3093_s18, 1  ;;  %s3093_s18 = sphi %s3127_s18, %s15_s18  }
   0x2   : > { %p188_p1 = scmp.lt.s32.totalorder %s3093_s18, 3 }
   0x4   : > { %p189_p2 = pnand %p2026_p0, %p188_p1 }
   0x5   : > { %v3083_v0 = vld [vmem:[%s3708_s3] sm:$0xff] (!%p189_p2)   ;;  %v3095_v1 = vmov (!%p189_p2), 0.0   ;;  %v3084_v2 = vld [vmem:[%s3708_s3 + $0x8] sm:$0xff] (!%p189_p2)   ;;  %s216_s24 = smul.u32 (!%p189_p2), 98, %s2022_s19  ;;  %vm3096_vm0 = vmmov (!%p189_p2), 0   ;;  %vm805_vm1 = vcmask (!%p189_p2), 261120  }
   0x6   : > { %192 = sbr.rel (%p189_p2) target bundleno = 440 (0x1b8), region = 40  ;;  %2869 = vmatprep.subr.bf16.mxu0 (!%p189_p2), %v3095_v1  ;;  %3069 = vmatprep.subr.bf16.mxu1 (!%p189_p2), %v3095_v1  ;;  %v3162_v3 = vld [vmem:[%s3706_s1] ss:$0 sm:$0xff] (!%p189_p2) }
   0x7   : > { %2870 = vmatpush3.bf16.msra.mxu0 (!%p189_p2), %v3083_v0  ;;  %3071 = vmatpush3.bf16.msra.mxu1 (!%p189_p2), %v3083_v0  ;;  %p217_p3 = scmp.lt.s32.totalorder (!%p189_p2), %s216_s24, 195  ;;  %v3171_v12 = vld [vmem:[%s3707_s2] ss:$0 sm:$0xff] (!%p189_p2) }
   0x8   : > { %2871 = vmatprep.subr.bf16.mxu0 (!%p189_p2), %v3095_v1  ;;  %2873 = vmatprep.mubr.msk.bf16.mxu0 (!%p189_p2), %vm3096_vm0, %v3095_v1 }
   0x9   : > { %3070 = vmatprep.subr.bf16.mxu1 (!%p189_p2), %v3095_v1  ;;  %2973 = vmatprep.mubr.msk.bf16.mxu1 (!%p189_p2), %vm3096_vm0, %v3095_v1 }
   0xb   : > { %2872 = vmatpush3.bf16.msra.mxu0 (!%p189_p2), %v3084_v2  ;;  %3072 = vmatpush3.bf16.msra.mxu1 (!%p189_p2), %v3084_v2 }
   0xd   : > { %s3712_s24 = smov (!%p217_p3, %s216_s24), 195 }
   0xe   : > { %s2027_s25 = sshll.u32 %s3712_s24, 2 }
   0xf   : > { %s3157_s28 = scalar_lea.vmem %s3705_s0, %s2027_s25  ;;  %s3557_s16 = scalar_lea.vmem %s3710_s5, %s2027_s25 }
  0x10   : > { %v2282_v4 = vld [vmem:[%s3157_s28] sm:$0xff]   ;;  %v2746_v5 = vld [vmem:[%s3157_s28 + $0xc8] sm:$0xff]   ;;  %v2747_v11 = vld [vmem:[%s3157_s28 + $0xd0] sm:$0xff]  }
  0x11   : > { %v2722_v6 = vld [vmem:[%s3157_s28 + $0x8] sm:$0xff]   ;;  %v2283_v7 = vunpack.c.l.bf16 %v2282_v4  ;;  %v2284_v8 = vunpack.c.h.bf16 %v2282_v4  ;;  %v2383_v9 = vunpack.c.l.bf16 %v2746_v5  ;;  %v2384_v10 = vunpack.c.h.bf16 %v2746_v5  ;;  %v2723_v33 = vld [vmem:[%s3157_s28 + $0x10] sm:$0xff]   ;;  %v2748_v38 = vld [vmem:[%s3157_s28 + $0xd8] sm:$0xff]  }
  0x12   : > { %v2287_v13 = vunpack.c.l.bf16 %v2722_v6  ;;  %v2288_v14 = vunpack.c.h.bf16 %v2722_v6  ;;  %v2387_v15 = vunpack.c.l.bf16 %v2747_v11  ;;  %v2388_v16 = vunpack.c.h.bf16 %v2747_v11  ;;  %v2724_v49 = vld [vmem:[%s3157_s28 + $0x18] sm:$0xff]   ;;  %v2749_v52 = vld [vmem:[%s3157_s28 + $0xe0] sm:$0xff]  }
  0x13   : > { %v432_v17 = vmul.f32 %v2283_v7, %v3162_v3  ;;  %v433_v18 = vmul.f32 %v2284_v8, %v3162_v3  ;;  %v482_v19 = vmul.f32 %v2383_v9, %v3162_v3  ;;  %v483_v20 = vmul.f32 %v2384_v10, %v3162_v3  ;;  %v2725_v11 = vld [vmem:[%s3157_s28 + $0x20] sm:$0xff]  }
  0x14   : > { %v434_v21 = vmul.f32 %v2287_v13, %v3162_v3  ;;  %v435_v22 = vmul.f32 %v2288_v14, %v3162_v3  ;;  %v484_v23 = vmul.f32 %v2387_v15, %v3162_v3  ;;  %v485_v24 = vmul.f32 %v2388_v16, %v3162_v3  ;;  %v2750_v13 = vld [vmem:[%s3157_s28 + $0xe8] sm:$0xff]  }
  0x15   : > { %v537_v25 = vadd.f32 %v3171_v12, %v432_v17  ;;  %v538_v26 = vadd.f32 %v3171_v12, %v433_v18  ;;  %v587_v27 = vadd.f32 %v3171_v12, %v482_v19  ;;  %v588_v28 = vadd.f32 %v3171_v12, %v483_v20 }
  0x16   : > { %v539_v29 = vadd.f32 %v3171_v12, %v434_v21  ;;  %v540_v30 = vadd.f32 %v3171_v12, %v435_v22  ;;  %v589_v31 = vadd.f32 %v3171_v12, %v484_v23  ;;  %v590_v32 = vadd.f32 %v3171_v12, %v485_v24 }
  0x17   : > { %v635_v34 = vmax.f32 %v537_v25, 0.0  ;;  %v636_v35 = vmax.f32 %v538_v26, 0.0  ;;  %v685_v36 = vmax.f32 %v587_v27, 0.0  ;;  %v686_v37 = vmax.f32 %v588_v28, 0.0  ;;  %v2726_v28 = vld [vmem:[%s3157_s28 + $0x28] sm:$0xff]  }
  0x18   : > { %v637_v39 = vmax.f32 %v539_v29, 0.0  ;;  %v638_v40 = vmax.f32 %v540_v30, 0.0  ;;  %v2291_v43 = vunpack.c.l.bf16 %v2723_v33  ;;  %v2292_v44 = vunpack.c.h.bf16 %v2723_v33  ;;  %v2751_v33 = vld [vmem:[%s3157_s28 + $0xf0] sm:$0xff]  }
  0x19   : > { %v733_v41 = vpack.c.bf16 %v636_v35, %v635_v34  ;;  %v758_v42 = vpack.c.bf16 %v686_v37, %v685_v36  ;;  %v687_v45 = vmax.f32 %v589_v31, 0.0  ;;  %v688_v46 = vmax.f32 %v590_v32, 0.0 }
  0x1a   : > { %v2391_v47 = vunpack.c.l.bf16 %v2748_v38  ;;  %v2392_v48 = vunpack.c.h.bf16 %v2748_v38  ;;  %v436_v50 = vmul.f32 %v2291_v43, %v3162_v3  ;;  %v437_v51 = vmul.f32 %v2292_v44, %v3162_v3 }
  0x1b   : > { %2874 = vmatmul.mubr.msk.bf16.vlgmr.msra.gmra.mrb[0].mxu0 %vm805_vm1, %v733_v41  ;;  %2974 = vmatmul.mubr.msk.bf16.vlgmr.msra.gmra.mrb[0].mxu1 %vm805_vm1, %v758_v42  ;;  %v2295_v55 = vunpack.c.l.bf16 %v2724_v49  ;;  %v2296_v56 = vunpack.c.h.bf16 %v2724_v49  ;;  %v734_v57 = vpack.c.bf16 %v638_v40, %v637_v39  ;;  %v759_v58 = vpack.c.bf16 %v688_v46, %v687_v45 }
  0x1c   : > { %2877 = vmatprep.mubr.msk.bf16.mxu0 %vm3096_vm0, %v3095_v1  ;;  %2977 = vmatprep.mubr.msk.bf16.mxu1 %vm3096_vm0, %v3095_v1  ;;  %v486_v53 = vmul.f32 %v2391_v47, %v3162_v3  ;;  %v487_v54 = vmul.f32 %v2392_v48, %v3162_v3  ;;  %v2395_v59 = vunpack.c.l.bf16 %v2749_v52  ;;  %v2396_v60 = vunpack.c.h.bf16 %v2749_v52  ;;  %v2727_v52 = vld [vmem:[%s3157_s28 + $0x30] sm:$0xff]  }
  0x1d   : > { %v541_v61 = vadd.f32 %v3171_v12, %v436_v50  ;;  %v542_v62 = vadd.f32 %v3171_v12, %v437_v51  ;;  %v438_v2 = vmul.f32 %v2295_v55, %v3162_v3  ;;  %v439_v4 = vmul.f32 %v2296_v56, %v3162_v3 }
  0x1e   : > { %v591_v63 = vadd.f32 %v3171_v12, %v486_v53  ;;  %v592_v0 = vadd.f32 %v3171_v12, %v487_v54  ;;  %v488_v5 = vmul.f32 %v2395_v59, %v3162_v3  ;;  %v489_v6 = vmul.f32 %v2396_v60, %v3162_v3  ;;  %v2752_v53 = vld [vmem:[%s3157_s28 + $0xf8] sm:$0xff]  }
  0x1f   : > { %v639_v7 = vmax.f32 %v541_v61, 0.0  ;;  %v640_v8 = vmax.f32 %v542_v62, 0.0  ;;  %v543_v14 = vadd.f32 %v3171_v12, %v438_v2  ;;  %v544_v15 = vadd.f32 %v3171_v12, %v439_v4 }
  0x20   : > { %v689_v9 = vmax.f32 %v591_v63, 0.0  ;;  %v690_v10 = vmax.f32 %v592_v0, 0.0  ;;  %v593_v16 = vadd.f32 %v3171_v12, %v488_v5  ;;  %v594_v17 = vadd.f32 %v3171_v12, %v489_v6  ;;  %v2728_v6 = vld [vmem:[%s3157_s28 + $0x38] sm:$0xff]  }
  0x21   : > { %v2299_v18 = vunpack.c.l.bf16 %v2725_v11  ;;  %v2300_v19 = vunpack.c.h.bf16 %v2725_v11  ;;  %v735_v20 = vpack.c.bf16 %v640_v8, %v639_v7  ;;  %v2399_v22 = vunpack.c.l.bf16 %v2750_v13  ;;  %v2753_v11 = vld [vmem:[%s3157_s28 + $0x100] sm:$0xff]  }
  0x22   : > { %v760_v21 = vpack.c.bf16 %v690_v10, %v689_v9  ;;  %v2400_v23 = vunpack.c.h.bf16 %v2750_v13  ;;  %v641_v24 = vmax.f32 %v543_v14, 0.0  ;;  %v642_v25 = vmax.f32 %v544_v15, 0.0 }
  0x23   : > { %2878 = vmatmul.mubr.msk.bf16.gmra.mrb[4].mxu0 %vm805_vm1, %v734_v57  ;;  %2978 = vmatmul.mubr.msk.bf16.gmra.mrb[4].mxu1 %vm805_vm1, %v759_v58  ;;  %v440_v26 = vmul.f32 %v2299_v18, %v3162_v3  ;;  %v441_v27 = vmul.f32 %v2300_v19, %v3162_v3  ;;  %v691_v29 = vmax.f32 %v593_v16, 0.0  ;;  %v692_v30 = vmax.f32 %v594_v17, 0.0 }
  0x24   : > { %2881 = vmatprep.mubr.msk.bf16.mxu0 %vm3096_vm0, %v3095_v1  ;;  %2981 = vmatprep.mubr.msk.bf16.mxu1 %vm3096_vm0, %v3095_v1  ;;  %v490_v31 = vmul.f32 %v2399_v22, %v3162_v3  ;;  %v491_v32 = vmul.f32 %v2400_v23, %v3162_v3  ;;  %v2303_v34 = vunpack.c.l.bf16 %v2726_v28  ;;  %v2304_v35 = vunpack.c.h.bf16 %v2726_v28 }
  0x25   : > { %v736_v36 = vpack.c.bf16 %v642_v25, %v641_v24  ;;  %v545_v37 = vadd.f32 %v3171_v12, %v440_v26  ;;  %v546_v38 = vadd.f32 %v3171_v12, %v441_v27  ;;  %v2403_v39 = vunpack.c.l.bf16 %v2751_v33 }
  0x26   : > { %v761_v40 = vpack.c.bf16 %v692_v30, %v691_v29  ;;  %v595_v41 = vadd.f32 %v3171_v12, %v490_v31  ;;  %v596_v42 = vadd.f32 %v3171_v12, %v491_v32  ;;  %v2404_v43 = vunpack.c.h.bf16 %v2751_v33  ;;  %v2729_v31 = vld [vmem:[%s3157_s28 + $0x40] sm:$0xff]   ;;  %v2754_v32 = vld [vmem:[%s3157_s28 + $0x108] sm:$0xff]  }
  0x27   : > { %v442_v44 = vmul.f32 %v2303_v34, %v3162_v3  ;;  %v443_v45 = vmul.f32 %v2304_v35, %v3162_v3  ;;  %v643_v46 = vmax.f32 %v545_v37, 0.0  ;;  %v644_v47 = vmax.f32 %v546_v38, 0.0 }
  0x28   : > { %v492_v48 = vmul.f32 %v2403_v39, %v3162_v3  ;;  %v693_v49 = vmax.f32 %v595_v41, 0.0  ;;  %v694_v50 = vmax.f32 %v596_v42, 0.0  ;;  %v493_v51 = vmul.f32 %v2404_v43, %v3162_v3 }
  0x29   : > { %v547_v54 = vadd.f32 %v3171_v12, %v442_v44  ;;  %v548_v55 = vadd.f32 %v3171_v12, %v443_v45  ;;  %v737_v56 = vpack.c.bf16 %v644_v47, %v643_v46  ;;  %v2307_v58 = vunpack.c.l.bf16 %v2727_v52  ;;  %v2730_v47 = vld [vmem:[%s3157_s28 + $0x48] sm:$0xff]  }
  0x2a   : > { %v597_v57 = vadd.f32 %v3171_v12, %v492_v48  ;;  %v2308_v59 = vunpack.c.h.bf16 %v2727_v52  ;;  %v762_v60 = vpack.c.bf16 %v694_v50, %v693_v49  ;;  %v598_v61 = vadd.f32 %v3171_v12, %v493_v51  ;;  %v2755_v52 = vld [vmem:[%s3157_s28 + $0x110] sm:$0xff]  }
  0x2b   : > { %2882 = vmatmul.mubr.msk.bf16.gmra.mrb[8].mxu0 %vm805_vm1, %v735_v20  ;;  %2982 = vmatmul.mubr.msk.bf16.gmra.mrb[8].mxu1 %vm805_vm1, %v760_v21  ;;  %v2407_v62 = vunpack.c.l.bf16 %v2752_v53  ;;  %v2408_v63 = vunpack.c.h.bf16 %v2752_v53  ;;  %v645_v0 = vmax.f32 %v547_v54, 0.0  ;;  %v646_v2 = vmax.f32 %v548_v55, 0.0 }
  0x2c   : > { %2885 = vmatprep.mubr.msk.bf16.mxu0 %vm3096_vm0, %v3095_v1  ;;  %2985 = vmatprep.mubr.msk.bf16.mxu1 %vm3096_vm0, %v3095_v1  ;;  %v444_v4 = vmul.f32 %v2307_v58, %v3162_v3  ;;  %v445_v5 = vmul.f32 %v2308_v59, %v3162_v3  ;;  %v695_v7 = vmax.f32 %v597_v57, 0.0  ;;  %v696_v8 = vmax.f32 %v598_v61, 0.0 }
  0x2d   : > { %v494_v9 = vmul.f32 %v2407_v62, %v3162_v3  ;;  %v495_v10 = vmul.f32 %v2408_v63, %v3162_v3  ;;  %v2311_v13 = vunpack.c.l.bf16 %v2728_v6  ;;  %v2312_v14 = vunpack.c.h.bf16 %v2728_v6 }
  0x2e   : > { %v738_v15 = vpack.c.bf16 %v646_v2, %v645_v0  ;;  %v549_v16 = vadd.f32 %v3171_v12, %v444_v4  ;;  %v550_v17 = vadd.f32 %v3171_v12, %v445_v5  ;;  %v2411_v18 = vunpack.c.l.bf16 %v2753_v11 }
  0x2f   : > { %v763_v19 = vpack.c.bf16 %v696_v8, %v695_v7  ;;  %v599_v20 = vadd.f32 %v3171_v12, %v494_v9  ;;  %v600_v21 = vadd.f32 %v3171_v12, %v495_v10  ;;  %v2412_v22 = vunpack.c.h.bf16 %v2753_v11  ;;  %v2731_v9 = vld [vmem:[%s3157_s28 + $0x50] sm:$0xff]   ;;  %v2756_v10 = vld [vmem:[%s3157_s28 + $0x118] sm:$0xff]  }
  0x30   : > { %v446_v23 = vmul.f32 %v2311_v13, %v3162_v3  ;;  %v447_v24 = vmul.f32 %v2312_v14, %v3162_v3  ;;  %v647_v25 = vmax.f32 %v549_v16, 0.0  ;;  %v648_v26 = vmax.f32 %v550_v17, 0.0 }
  0x31   : > { %v496_v27 = vmul.f32 %v2411_v18, %v3162_v3  ;;  %v697_v28 = vmax.f32 %v599_v20, 0.0  ;;  %v698_v29 = vmax.f32 %v600_v21, 0.0  ;;  %v497_v30 = vmul.f32 %v2412_v22, %v3162_v3 }
  0x32   : > { %v551_v33 = vadd.f32 %v3171_v12, %v446_v23  ;;  %v552_v34 = vadd.f32 %v3171_v12, %v447_v24  ;;  %v739_v35 = vpack.c.bf16 %v648_v26, %v647_v25  ;;  %v2315_v37 = vunpack.c.l.bf16 %v2729_v31  ;;  %v2732_v26 = vld [vmem:[%s3157_s28 + $0x58] sm:$0xff]  }
  0x33   : > { %2886 = vmatmul.mubr.msk.bf16.gmra.mrb[12].mxu0 %vm805_vm1, %v736_v36  ;;  %2986 = vmatmul.mubr.msk.bf16.gmra.mrb[12].mxu1 %vm805_vm1, %v761_v40  ;;  %v601_v36 = vadd.f32 %v3171_v12, %v496_v27  ;;  %v2316_v38 = vunpack.c.h.bf16 %v2729_v31  ;;  %v764_v39 = vpack.c.bf16 %v698_v29, %v697_v28  ;;  %v602_v40 = vadd.f32 %v3171_v12, %v497_v30  ;;  %v2757_v31 = vld [vmem:[%s3157_s28 + $0x120] sm:$0xff]  }
  0x34   : > { %2889 = vmatprep.mubr.msk.bf16.mxu0 %vm3096_vm0, %v3095_v1  ;;  %2989 = vmatprep.mubr.msk.bf16.mxu1 %vm3096_vm0, %v3095_v1  ;;  %v2415_v41 = vunpack.c.l.bf16 %v2754_v32  ;;  %v2416_v42 = vunpack.c.h.bf16 %v2754_v32  ;;  %v649_v43 = vmax.f32 %v551_v33, 0.0  ;;  %v650_v44 = vmax.f32 %v552_v34, 0.0 }
  0x35   : > { %v448_v45 = vmul.f32 %v2315_v37, %v3162_v3  ;;  %v449_v46 = vmul.f32 %v2316_v38, %v3162_v3  ;;  %v699_v48 = vmax.f32 %v601_v36, 0.0  ;;  %v700_v49 = vmax.f32 %v602_v40, 0.0 }
  0x36   : > { %v498_v50 = vmul.f32 %v2415_v41, %v3162_v3  ;;  %v499_v51 = vmul.f32 %v2416_v42, %v3162_v3  ;;  %v2319_v53 = vunpack.c.l.bf16 %v2730_v47  ;;  %v2320_v54 = vunpack.c.h.bf16 %v2730_v47  ;;  %v2733_v47 = vld [vmem:[%s3157_s28 + $0x60] sm:$0xff]  }
  0x37   : > { %v740_v55 = vpack.c.bf16 %v650_v44, %v649_v43  ;;  %v554_v57 = vadd.f32 %v3171_v12, %v449_v46  ;;  %v2419_v58 = vunpack.c.l.bf16 %v2755_v52  ;;  %v765_v59 = vpack.c.bf16 %v700_v49, %v699_v48 }
  0x38   : > { %v604_v61 = vadd.f32 %v3171_v12, %v499_v51  ;;  %v2420_v62 = vunpack.c.h.bf16 %v2755_v52  ;;  %v450_v63 = vmul.f32 %v2319_v53, %v3162_v3  ;;  %v451_v0 = vmul.f32 %v2320_v54, %v3162_v3  ;;  %v2758_v51 = vld [vmem:[%s3157_s28 + $0x128] sm:$0xff]  }
  0x39   : > { %v652_v4 = vmax.f32 %v554_v57, 0.0  ;;  %v500_v5 = vmul.f32 %v2419_v58, %v3162_v3  ;;  %v2323_v16 = vunpack.c.l.bf16 %v2731_v9  ;;  %v2324_v17 = vunpack.c.h.bf16 %v2731_v9  ;;  %v2759_v9 = vld [vmem:[%s3157_s28 + $0x130] sm:$0xff]  }
  0x3a   : > { %v702_v7 = vmax.f32 %v604_v61, 0.0  ;;  %v501_v8 = vmul.f32 %v2420_v62, %v3162_v3  ;;  %v555_v11 = vadd.f32 %v3171_v12, %v450_v63  ;;  %v556_v13 = vadd.f32 %v3171_v12, %v451_v0 }
  0x3b   : > { %2890 = vmatmul.mubr.msk.bf16.gmra.mrb[16].mxu0 %vm805_vm1, %v737_v56  ;;  %2990 = vmatmul.mubr.msk.bf16.gmra.mrb[16].mxu1 %vm805_vm1, %v762_v60  ;;  %v553_v56 = vadd.f32 %v3171_v12, %v448_v45  ;;  %v603_v60 = vadd.f32 %v3171_v12, %v498_v50  ;;  %v2423_v20 = vunpack.c.l.bf16 %v2756_v10  ;;  %v2424_v21 = vunpack.c.h.bf16 %v2756_v10 }
  0x3c   : > { %2893 = vmatprep.mubr.msk.bf16.mxu0 %vm3096_vm0, %v3095_v1  ;;  %2993 = vmatprep.mubr.msk.bf16.mxu1 %vm3096_vm0, %v3095_v1  ;;  %v653_v22 = vmax.f32 %v555_v11, 0.0  ;;  %v654_v23 = vmax.f32 %v556_v13, 0.0  ;;  %v452_v24 = vmul.f32 %v2323_v16, %v3162_v3  ;;  %v453_v25 = vmul.f32 %v2324_v17, %v3162_v3 }
  0x3d   : > { %v651_v2 = vmax.f32 %v553_v56, 0.0  ;;  %v701_v6 = vmax.f32 %v603_v60, 0.0  ;;  %v502_v29 = vmul.f32 %v2423_v20, %v3162_v3  ;;  %v503_v30 = vmul.f32 %v2424_v21, %v3162_v3 }
  0x3e   : > { %v742_v32 = vpack.c.bf16 %v654_v23, %v653_v22  ;;  %v2327_v33 = vunpack.c.l.bf16 %v2732_v26  ;;  %v557_v34 = vadd.f32 %v3171_v12, %v452_v24  ;;  %v2328_v36 = vunpack.c.h.bf16 %v2732_v26  ;;  %v2735_v26 = vld [vmem:[%s3157_s28 + $0x70] sm:$0xff]  }
  0x3f   : > { %v741_v14 = vpack.c.bf16 %v652_v4, %v651_v2  ;;  %v766_v18 = vpack.c.bf16 %v702_v7, %v701_v6  ;;  %v2427_v37 = vunpack.c.l.bf16 %v2757_v31  ;;  %v608_v40 = vadd.f32 %v3171_v12, %v503_v30  ;;  %v2734_v4 = vld [vmem:[%s3157_s28 + $0x68] sm:$0xff]   ;;  %v2760_v30 = vld [vmem:[%s3157_s28 + $0x138] sm:$0xff]  }
  0x40   : > { %v2428_v41 = vunpack.c.h.bf16 %v2757_v31  ;;  %v454_v42 = vmul.f32 %v2327_v33, %v3162_v3  ;;  %v655_v43 = vmax.f32 %v557_v34, 0.0  ;;  %v455_v45 = vmul.f32 %v2328_v36, %v3162_v3 }
  0x41   : > { %v504_v46 = vmul.f32 %v2427_v37, %v3162_v3  ;;  %v706_v49 = vmax.f32 %v608_v40, 0.0  ;;  %v2331_v53 = vunpack.c.l.bf16 %v2733_v47  ;;  %v2332_v57 = vunpack.c.h.bf16 %v2733_v47 }
  0x42   : > { %v505_v50 = vmul.f32 %v2428_v41, %v3162_v3  ;;  %v559_v52 = vadd.f32 %v3171_v12, %v454_v42  ;;  %v2431_v60 = vunpack.c.l.bf16 %v2758_v51  ;;  %v2432_v61 = vunpack.c.h.bf16 %v2758_v51 }
  0x43   : > { %2894 = vmatmul.mubr.msk.bf16.gmra.mrb[20].mxu0 %vm805_vm1, %v738_v15  ;;  %2994 = vmatmul.mubr.msk.bf16.gmra.mrb[20].mxu1 %vm805_vm1, %v763_v19  ;;  %v605_v15 = vadd.f32 %v3171_v12, %v500_v5  ;;  %v606_v19 = vadd.f32 %v3171_v12, %v501_v8  ;;  %v609_v56 = vadd.f32 %v3171_v12, %v504_v46  ;;  %v2335_v11 = vunpack.c.l.bf16 %v2734_v4 }
  0x44   : > { %2897 = vmatprep.mubr.msk.bf16.mxu0 %vm3096_vm0, %v3095_v1  ;;  %2997 = vmatprep.mubr.msk.bf16.mxu1 %vm3096_vm0, %v3095_v1  ;;  %v456_v62 = vmul.f32 %v2331_v53, %v3162_v3  ;;  %v657_v63 = vmax.f32 %v559_v52, 0.0  ;;  %v457_v2 = vmul.f32 %v2332_v57, %v3162_v3  ;;  %v506_v7 = vmul.f32 %v2431_v60, %v3162_v3 }
  0x45   : > { %v703_v27 = vmax.f32 %v605_v15, 0.0  ;;  %v704_v28 = vmax.f32 %v606_v19, 0.0  ;;  %v707_v5 = vmax.f32 %v609_v56, 0.0  ;;  %v507_v8 = vmul.f32 %v2432_v61, %v3162_v3 }
  0x46   : > { %v561_v10 = vadd.f32 %v3171_v12, %v456_v62  ;;  %v2336_v15 = vunpack.c.h.bf16 %v2734_v4  ;;  %v2435_v16 = vunpack.c.l.bf16 %v2759_v9  ;;  %v2436_v20 = vunpack.c.h.bf16 %v2759_v9  ;;  %v2737_v4 = vld [vmem:[%s3157_s28 + $0x80] sm:$0xff]  }
  0x47   : > { %v767_v38 = vpack.c.bf16 %v704_v28, %v703_v27  ;;  %v612_v19 = vadd.f32 %v3171_v12, %v507_v8  ;;  %v458_v21 = vmul.f32 %v2335_v11, %v3162_v3  ;;  %v2340_v36 = vunpack.c.h.bf16 %v2735_v26  ;;  %v2762_v8 = vld [vmem:[%s3157_s28 + $0x148] sm:$0xff]  }
  0x48   : > { %v659_v22 = vmax.f32 %v561_v10, 0.0  ;;  %v459_v24 = vmul.f32 %v2336_v15, %v3162_v3  ;;  %v2440_v40 = vunpack.c.h.bf16 %v2760_v30  ;;  %v2347_v10 = vunpack.c.l.bf16 %v2737_v4 }
  0x49   : > { %v710_v28 = vmax.f32 %v612_v19, 0.0  ;;  %v563_v31 = vadd.f32 %v3171_v12, %v458_v21  ;;  %v2348_v15 = vunpack.c.h.bf16 %v2737_v4  ;;  %v2448_v19 = vunpack.c.h.bf16 %v2762_v8 }
  0x4a   : > { %v564_v34 = vadd.f32 %v3171_v12, %v459_v24  ;;  %v2738_v24 = vld [vmem:[%s3157_s28 + $0x88] sm:$0xff]  }
  0x4b   : > { %2898 = vmatmul.mubr.msk.bf16.gmra.mrb[24].mxu0 %vm805_vm1, %v739_v35  ;;  %2998 = vmatmul.mubr.msk.bf16.gmra.mrb[24].mxu1 %vm805_vm1, %v764_v39  ;;  %v558_v35 = vadd.f32 %v3171_v12, %v453_v25  ;;  %v607_v39 = vadd.f32 %v3171_v12, %v502_v29  ;;  %v508_v25 = vmul.f32 %v2435_v16, %v3162_v3  ;;  %v661_v42 = vmax.f32 %v563_v31, 0.0 }
  0x4c   : > { %2901 = vmatprep.mubr.msk.bf16.mxu0 %vm3096_vm0, %v3095_v1  ;;  %3001 = vmatprep.mubr.msk.bf16.mxu1 %vm3096_vm0, %v3095_v1  ;;  %v509_v29 = vmul.f32 %v2436_v20, %v3162_v3  ;;  %v464_v20 = vmul.f32 %v2347_v10, %v3162_v3  ;;  %v2351_v31 = vunpack.c.l.bf16 %v2738_v24 }
  0x4d   : > { %v656_v44 = vmax.f32 %v558_v35, 0.0  ;;  %v705_v48 = vmax.f32 %v607_v39, 0.0  ;;  %v613_v35 = vadd.f32 %v3171_v12, %v508_v25  ;;  %v2439_v39 = vunpack.c.l.bf16 %v2760_v30 }
  0x4e   : > { %v569_v30 = vadd.f32 %v3171_v12, %v464_v20 }
  0x4f   : > { %v743_v54 = vpack.c.bf16 %v656_v44, %v655_v43  ;;  %v768_v58 = vpack.c.bf16 %v706_v49, %v705_v48  ;;  %v662_v43 = vmax.f32 %v564_v34, 0.0  ;;  %v461_v44 = vmul.f32 %v2340_v36, %v3162_v3 }
  0x50   : > { %v711_v46 = vmax.f32 %v613_v35, 0.0  ;;  %v510_v48 = vmul.f32 %v2439_v39, %v3162_v3  ;;  %v511_v49 = vmul.f32 %v2440_v40, %v3162_v3  ;;  %v2352_v34 = vunpack.c.h.bf16 %v2738_v24  ;;  %v2741_v24 = vld [vmem:[%s3157_s28 + $0xa0] sm:$0xff]  }
  0x51   : > { %v746_v53 = vpack.c.bf16 %v662_v43, %v661_v42  ;;  %v466_v40 = vmul.f32 %v2351_v31, %v3162_v3 }
  0x52   : > { %v467_v43 = vmul.f32 %v2352_v34, %v3162_v3  ;;  %v2364_v34 = vunpack.c.h.bf16 %v2741_v24 }
  0x53   : > { %2902 = vmatmul.mubr.msk.bf16.gmra.mrb[28].mxu0 %vm805_vm1, %v740_v55  ;;  %3002 = vmatmul.mubr.msk.bf16.gmra.mrb[28].mxu1 %vm805_vm1, %v765_v59  ;;  %v560_v55 = vadd.f32 %v3171_v12, %v455_v45  ;;  %v610_v59 = vadd.f32 %v3171_v12, %v505_v50  ;;  %v2736_v45 = vld [vmem:[%s3157_s28 + $0x78] sm:$0xff]   ;;  %v2761_v50 = vld [vmem:[%s3157_s28 + $0x140] sm:$0xff]  }
  0x54   : > { %2905 = vmatprep.mubr.msk.bf16.mxu0 %vm3096_vm0, %v3095_v1  ;;  %3005 = vmatprep.mubr.msk.bf16.mxu1 %vm3096_vm0, %v3095_v1  ;;  %v2343_v52 = vunpack.c.l.bf16 %v2736_v45  ;;  %v2443_v56 = vunpack.c.l.bf16 %v2761_v50  ;;  %v2444_v60 = vunpack.c.h.bf16 %v2761_v50  ;;  %v571_v50 = vadd.f32 %v3171_v12, %v466_v40 }
  0x55   : > { %v658_v0 = vmax.f32 %v560_v55, 0.0  ;;  %v708_v6 = vmax.f32 %v610_v59, 0.0  ;;  %v2344_v55 = vunpack.c.h.bf16 %v2736_v45  ;;  %v616_v59 = vadd.f32 %v3171_v12, %v511_v49  ;;  %v2739_v45 = vld [vmem:[%s3157_s28 + $0x90] sm:$0xff]   ;;  %v2764_v49 = vld [vmem:[%s3157_s28 + $0x158] sm:$0xff]  }
  0x56   : > { %v462_v61 = vmul.f32 %v2343_v52, %v3162_v3 }
  0x57   : > { %v744_v13 = vpack.c.bf16 %v658_v0, %v657_v63  ;;  %v769_v17 = vpack.c.bf16 %v708_v6, %v707_v5  ;;  %v463_v0 = vmul.f32 %v2344_v55, %v3162_v3  ;;  %v714_v6 = vmax.f32 %v616_v59, 0.0 }
  0x58   : > { %v567_v9 = vadd.f32 %v3171_v12, %v462_v61  ;;  %v2356_v55 = vunpack.c.h.bf16 %v2739_v45  ;;  %v2456_v59 = vunpack.c.h.bf16 %v2764_v49  ;;  %v669_v61 = vmax.f32 %v571_v50, 0.0 }
  0x5a   : > { %v665_v21 = vmax.f32 %v567_v9, 0.0 }
  0x5b   : > { %2906 = vmatmul.mubr.msk.bf16.gmra.mrb[32].mxu0 %vm805_vm1, %v741_v14  ;;  %3006 = vmatmul.mubr.msk.bf16.gmra.mrb[32].mxu1 %vm805_vm1, %v766_v18  ;;  %v562_v14 = vadd.f32 %v3171_v12, %v457_v2  ;;  %v611_v18 = vadd.f32 %v3171_v12, %v506_v7  ;;  %v512_v2 = vmul.f32 %v2443_v56, %v3162_v3 }
  0x5c   : > { %2909 = vmatprep.mubr.msk.bf16.mxu0 %vm3096_vm0, %v3095_v1  ;;  %3009 = vmatprep.mubr.msk.bf16.mxu1 %vm3096_vm0, %v3095_v1  ;;  %v513_v7 = vmul.f32 %v2444_v60, %v3162_v3 }
  0x5d   : > { %v660_v23 = vmax.f32 %v562_v14, 0.0  ;;  %v709_v27 = vmax.f32 %v611_v18, 0.0  ;;  %v617_v14 = vadd.f32 %v3171_v12, %v512_v2  ;;  %v2447_v18 = vunpack.c.l.bf16 %v2762_v8 }
  0x5f   : > { %v745_v33 = vpack.c.bf16 %v660_v23, %v659_v22  ;;  %v770_v37 = vpack.c.bf16 %v710_v28, %v709_v27  ;;  %v465_v23 = vmul.f32 %v2348_v15, %v3162_v3  ;;  %v715_v25 = vmax.f32 %v617_v14, 0.0 }
  0x60   : > { %v514_v27 = vmul.f32 %v2447_v18, %v3162_v3  ;;  %v515_v28 = vmul.f32 %v2448_v19, %v3162_v3 }
  0x63   : > { %2910 = vmatmul.mubr.msk.bf16.gmra.mrb[36].mxu0 %vm805_vm1, %v742_v32  ;;  %3010 = vmatmul.mubr.msk.bf16.gmra.mrb[36].mxu1 %vm805_vm1, %v767_v38  ;;  %v2339_v32 = vunpack.c.l.bf16 %v2735_v26  ;;  %v614_v38 = vadd.f32 %v3171_v12, %v509_v29  ;;  %v2763_v29 = vld [vmem:[%s3157_s28 + $0x150] sm:$0xff]  }
  0x64   : > { %2913 = vmatprep.mubr.msk.bf16.mxu0 %vm3096_vm0, %v3095_v1  ;;  %3013 = vmatprep.mubr.msk.bf16.mxu1 %vm3096_vm0, %v3095_v1  ;;  %v2451_v35 = vunpack.c.l.bf16 %v2763_v29  ;;  %v2452_v39 = vunpack.c.h.bf16 %v2763_v29 }
  0x65   : > { %v460_v41 = vmul.f32 %v2339_v32, %v3162_v3  ;;  %v712_v47 = vmax.f32 %v614_v38, 0.0  ;;  %v620_v38 = vadd.f32 %v3171_v12, %v515_v28  ;;  %v2766_v28 = vld [vmem:[%s3157_s28 + $0x168] sm:$0xff]  }
  0x67   : > { %v565_v51 = vadd.f32 %v3171_v12, %v460_v41  ;;  %v771_v57 = vpack.c.bf16 %v712_v47, %v711_v46  ;;  %v667_v41 = vmax.f32 %v569_v30, 0.0  ;;  %v718_v47 = vmax.f32 %v620_v38, 0.0 }
  0x68   : > { %v2363_v30 = vunpack.c.l.bf16 %v2741_v24  ;;  %v2464_v38 = vunpack.c.h.bf16 %v2766_v28 }
  0x69   : > { %v663_v62 = vmax.f32 %v565_v51, 0.0  ;;  %v2355_v51 = vunpack.c.l.bf16 %v2739_v45  ;;  %v473_v45 = vmul.f32 %v2364_v34, %v3162_v3 }
  0x6b   : > { %2914 = vmatmul.mubr.msk.bf16.gmra.mrb[40].mxu0 %vm805_vm1, %v743_v54  ;;  %3014 = vmatmul.mubr.msk.bf16.gmra.mrb[40].mxu1 %vm805_vm1, %v768_v58  ;;  %v566_v54 = vadd.f32 %v3171_v12, %v461_v44  ;;  %v615_v58 = vadd.f32 %v3171_v12, %v510_v48  ;;  %v516_v44 = vmul.f32 %v2451_v35, %v3162_v3 }
  0x6c   : > { %2917 = vmatprep.mubr.msk.bf16.mxu0 %vm3096_vm0, %v3095_v1  ;;  %3017 = vmatprep.mubr.msk.bf16.mxu1 %vm3096_vm0, %v3095_v1  ;;  %v517_v48 = vmul.f32 %v2452_v39, %v3162_v3  ;;  %v468_v60 = vmul.f32 %v2355_v51, %v3162_v3 }
  0x6d   : > { %v664_v63 = vmax.f32 %v566_v54, 0.0  ;;  %v713_v5 = vmax.f32 %v615_v58, 0.0  ;;  %v621_v54 = vadd.f32 %v3171_v12, %v516_v44  ;;  %v2455_v58 = vunpack.c.l.bf16 %v2764_v49 }
  0x6e   : > { %v573_v8 = vadd.f32 %v3171_v12, %v468_v60 }
  0x6f   : > { %v747_v11 = vpack.c.bf16 %v664_v63, %v663_v62  ;;  %v772_v16 = vpack.c.bf16 %v714_v6, %v713_v5  ;;  %v469_v63 = vmul.f32 %v2356_v55, %v3162_v3  ;;  %v719_v2 = vmax.f32 %v621_v54, 0.0 }
  0x70   : > { %v518_v5 = vmul.f32 %v2455_v58, %v3162_v3  ;;  %v519_v6 = vmul.f32 %v2456_v59, %v3162_v3  ;;  %v671_v20 = vmax.f32 %v573_v8, 0.0 }
  0x73   : > { %2918 = vmatmul.mubr.msk.bf16.gmra.mrb[44].mxu0 %vm805_vm1, %v744_v13  ;;  %3018 = vmatmul.mubr.msk.bf16.gmra.mrb[44].mxu1 %vm805_vm1, %v769_v17  ;;  %v568_v13 = vadd.f32 %v3171_v12, %v463_v0  ;;  %v618_v17 = vadd.f32 %v3171_v12, %v513_v7  ;;  %v2740_v0 = vld [vmem:[%s3157_s28 + $0x98] sm:$0xff]   ;;  %v2765_v7 = vld [vmem:[%s3157_s28 + $0x160] sm:$0xff]  }
  0x74   : > { %2921 = vmatprep.mubr.msk.bf16.mxu0 %vm3096_vm0, %v3095_v1  ;;  %3021 = vmatprep.mubr.msk.bf16.mxu1 %vm3096_vm0, %v3095_v1  ;;  %v2359_v9 = vunpack.c.l.bf16 %v2740_v0  ;;  %v2459_v14 = vunpack.c.l.bf16 %v2765_v7  ;;  %v2460_v18 = vunpack.c.h.bf16 %v2765_v7 }
  0x75   : > { %v666_v22 = vmax.f32 %v568_v13, 0.0  ;;  %v716_v26 = vmax.f32 %v618_v17, 0.0  ;;  %v2360_v13 = vunpack.c.h.bf16 %v2740_v0  ;;  %v624_v17 = vadd.f32 %v3171_v12, %v519_v6  ;;  %v2768_v6 = vld [vmem:[%s3157_s28 + $0x178] sm:$0xff]  }
  0x76   : > { %v470_v19 = vmul.f32 %v2359_v9, %v3162_v3 }
  0x77   : > { %v748_v32 = vpack.c.bf16 %v666_v22, %v665_v21  ;;  %v773_v36 = vpack.c.bf16 %v716_v26, %v715_v25  ;;  %v471_v22 = vmul.f32 %v2360_v13, %v3162_v3  ;;  %v722_v26 = vmax.f32 %v624_v17, 0.0 }
  0x78   : > { %v575_v29 = vadd.f32 %v3171_v12, %v470_v19  ;;  %v3085_v19 = vld [vmem:[%s3706_s1] ss:$0 sm:$0xff] }
  0x7a   : > { %v673_v39 = vmax.f32 %v575_v29, 0.0 }
  0x7b   : > { %2922 = vmatmul.mubr.msk.bf16.gmra.mrb[48].mxu0 %vm805_vm1, %v745_v33  ;;  %3022 = vmatmul.mubr.msk.bf16.gmra.mrb[48].mxu1 %vm805_vm1, %v770_v37  ;;  %v570_v33 = vadd.f32 %v3171_v12, %v465_v23  ;;  %v619_v37 = vadd.f32 %v3171_v12, %v514_v27  ;;  %v520_v23 = vmul.f32 %v2459_v14, %v3162_v3 }
  0x7c   : > { %2925 = vmatprep.mubr.msk.bf16.mxu0 %vm3096_vm0, %v3095_v1  ;;  %3025 = vmatprep.mubr.msk.bf16.mxu1 %vm3096_vm0, %v3095_v1  ;;  %v521_v27 = vmul.f32 %v2460_v18, %v3162_v3 }
  0x7d   : > { %v668_v42 = vmax.f32 %v570_v33, 0.0  ;;  %v717_v46 = vmax.f32 %v619_v37, 0.0  ;;  %v625_v33 = vadd.f32 %v3171_v12, %v520_v23  ;;  %v2463_v37 = vunpack.c.l.bf16 %v2766_v28  ;;  %v3086_v28 = vld [vmem:[%s3707_s2] ss:$0 sm:$0xff] }
  0x7f   : > { %v749_v52 = vpack.c.bf16 %v668_v42, %v667_v41  ;;  %v774_v56 = vpack.c.bf16 %v718_v47, %v717_v46  ;;  %v723_v41 = vmax.f32 %v625_v33, 0.0  ;;  %v472_v42 = vmul.f32 %v2363_v30, %v3162_v3 }
  0x80   : > { %v522_v46 = vmul.f32 %v2463_v37, %v3162_v3  ;;  %v523_v47 = vmul.f32 %v2464_v38, %v3162_v3 }
  0x82   : > { %v628_v58 = vadd.f32 %v3171_v12, %v523_v47 }
  0x83   : > { %2926 = vmatmul.mubr.msk.bf16.gmra.mrb[52].mxu0 %vm805_vm1, %v746_v53  ;;  %3026 = vmatmul.mubr.msk.bf16.gmra.mrb[52].mxu1 %vm805_vm1, %v771_v57  ;;  %v572_v53 = vadd.f32 %v3171_v12, %v467_v43  ;;  %v622_v57 = vadd.f32 %v3171_v12, %v517_v48  ;;  %v2742_v43 = vld [vmem:[%s3157_s28 + $0xa8] sm:$0xff]   ;;  %v2767_v48 = vld [vmem:[%s3157_s28 + $0x170] sm:$0xff]  }
  0x84   : > { %2929 = vmatprep.mubr.msk.bf16.mxu0 %vm3096_vm0, %v3095_v1  ;;  %3029 = vmatprep.mubr.msk.bf16.mxu1 %vm3096_vm0, %v3095_v1  ;;  %v2367_v49 = vunpack.c.l.bf16 %v2742_v43  ;;  %v2368_v50 = vunpack.c.h.bf16 %v2742_v43  ;;  %v2468_v54 = vunpack.c.h.bf16 %v2767_v48 }
  0x85   : > { %v670_v62 = vmax.f32 %v572_v53, 0.0  ;;  %v720_v4 = vmax.f32 %v622_v57, 0.0  ;;  %v2467_v53 = vunpack.c.l.bf16 %v2767_v48  ;;  %v627_v57 = vadd.f32 %v3171_v12, %v522_v46  ;;  %v2745_v46 = vld [vmem:[%s3157_s28 + $0xc0] sm:$0xff]  }
  0x86   : > { %v474_v59 = vmul.f32 %v2367_v49, %v3162_v3  ;;  %v475_v60 = vmul.f32 %v2368_v50, %v3162_v3  ;;  %v2379_v50 = vunpack.c.l.bf16 %v2745_v46 }
  0x87   : > { %v750_v10 = vpack.c.bf16 %v670_v62, %v669_v61  ;;  %v775_v15 = vpack.c.bf16 %v720_v4, %v719_v2  ;;  %v524_v61 = vmul.f32 %v2467_v53, %v3162_v3  ;;  %v525_v62 = vmul.f32 %v2468_v54, %v3162_v3 }
  0x88   : > { %v725_v4 = vmax.f32 %v627_v57, 0.0  ;;  %v579_v7 = vadd.f32 %v3171_v12, %v474_v59  ;;  %v580_v3 = vadd.f32 %v3171_v12, %v475_v60  ;;  %v2380_v54 = vunpack.c.h.bf16 %v2745_v46 }
  0x89   : > { %v629_v9 = vadd.f32 %v3171_v12, %v524_v61 }
  0x8a   : > { %v677_v17 = vmax.f32 %v579_v7, 0.0  ;;  %v678_v18 = vmax.f32 %v580_v3, 0.0  ;;  %v481_v60 = vmul.f32 %v3085_v19, %v2380_v54 }
  0x8b   : > { %2930 = vmatmul.mubr.msk.bf16.gmra.mrb[56].mxu0 %vm805_vm1, %v747_v11  ;;  %3030 = vmatmul.mubr.msk.bf16.gmra.mrb[56].mxu1 %vm805_vm1, %v772_v16  ;;  %v574_v11 = vadd.f32 %v3171_v12, %v469_v63  ;;  %v623_v16 = vadd.f32 %v3171_v12, %v518_v5  ;;  %v2743_v63 = vld [vmem:[%s3157_s28 + $0xb0] sm:$0xff]   ;;  %v726_v5 = vmax.f32 %v628_v58, 0.0 }
  0x8c   : > { %2933 = vmatprep.mubr.msk.bf16.mxu0 %vm3096_vm0, %v3095_v1  ;;  %3033 = vmatprep.mubr.msk.bf16.mxu1 %vm3096_vm0, %v3095_v1  ;;  %v2371_v8 = vunpack.c.l.bf16 %v2743_v63 }
  0x8d   : > { %v672_v21 = vmax.f32 %v574_v11, 0.0  ;;  %v721_v25 = vmax.f32 %v623_v16, 0.0  ;;  %v2372_v11 = vunpack.c.h.bf16 %v2743_v63  ;;  %v778_v14 = vpack.c.bf16 %v726_v5, %v725_v4 }
  0x8e   : > { %v2472_v16 = vunpack.c.h.bf16 %v2768_v6 }
  0x8f   : > { %v751_v31 = vpack.c.bf16 %v672_v21, %v671_v20  ;;  %v776_v35 = vpack.c.bf16 %v722_v26, %v721_v25  ;;  %v476_v20 = vmul.f32 %v3085_v19, %v2371_v8  ;;  %v727_v21 = vmax.f32 %v629_v9, 0.0  ;;  %v2744_v25 = vld [vmem:[%s3157_s28 + $0xb8] sm:$0xff]   ;;  %v2769_v26 = vld [vmem:[%s3157_s28 + $0x180] sm:$0xff]  }
  0x90   : > { %v477_v23 = vmul.f32 %v3085_v19, %v2372_v11  ;;  %v527_v24 = vmul.f32 %v3085_v19, %v2472_v16  ;;  %v2376_v33 = vunpack.c.h.bf16 %v2744_v25  ;;  %v2476_v37 = vunpack.c.h.bf16 %v2769_v26 }
  0x91   : > { %v581_v29 = vadd.f32 %v3086_v28, %v476_v20 }
  0x93   : > { %2934 = vmatmul.mubr.msk.bf16.gmra.mrb[60].mxu0 %vm805_vm1, %v748_v32  ;;  %3034 = vmatmul.mubr.msk.bf16.gmra.mrb[60].mxu1 %vm805_vm1, %v773_v36  ;;  %v576_v32 = vadd.f32 %v3171_v12, %v471_v22  ;;  %v626_v36 = vadd.f32 %v3171_v12, %v521_v27  ;;  %v754_v27 = vpack.c.bf16 %v678_v18, %v677_v17  ;;  %v679_v38 = vmax.f32 %v581_v29, 0.0 }
  0x94   : > { %2937 = vmatprep.mubr.msk.bf16.mxu0 %vm3096_vm0, %v3095_v1  ;;  %3037 = vmatprep.mubr.msk.bf16.mxu1 %vm3096_vm0, %v3095_v1 }
  0x95   : > { %v674_v40 = vmax.f32 %v576_v32, 0.0  ;;  %v724_v44 = vmax.f32 %v626_v36, 0.0  ;;  %v2375_v32 = vunpack.c.l.bf16 %v2744_v25  ;;  %v2475_v36 = vunpack.c.l.bf16 %v2769_v26 }
  0x97   : > { %v752_v51 = vpack.c.bf16 %v674_v40, %v673_v39  ;;  %v777_v55 = vpack.c.bf16 %v724_v44, %v723_v41  ;;  %v478_v40 = vmul.f32 %v3085_v19, %v2375_v32  ;;  %v479_v41 = vmul.f32 %v3085_v19, %v2376_v33 }
  0x98   : > { %v528_v44 = vmul.f32 %v3085_v19, %v2475_v36 }
  0x99   : > { %v583_v48 = vadd.f32 %v3086_v28, %v478_v40  ;;  %v584_v49 = vadd.f32 %v3086_v28, %v479_v41 }
  0x9b   : > { %2938 = vmatmul.mubr.msk.bf16.gmra.mrb[64].mxu0 %vm805_vm1, %v749_v52  ;;  %3038 = vmatmul.mubr.msk.bf16.gmra.mrb[64].mxu1 %vm805_vm1, %v774_v56  ;;  %v577_v52 = vadd.f32 %v3171_v12, %v472_v42  ;;  %v578_v56 = vadd.f32 %v3171_v12, %v473_v45  ;;  %v529_v45 = vmul.f32 %v3085_v19, %v2476_v37  ;;  %v682_v57 = vmax.f32 %v584_v49, 0.0 }
  0x9c   : > { %2941 = vmatprep.mubr.msk.bf16.mxu0 %vm3096_vm0, %v3095_v1  ;;  %3041 = vmatprep.mubr.msk.bf16.mxu1 %vm3096_vm0, %v3095_v1 }
  0x9d   : > { %v675_v0 = vmax.f32 %v577_v52, 0.0  ;;  %v676_v2 = vmax.f32 %v578_v56, 0.0  ;;  %v633_v52 = vadd.f32 %v3086_v28, %v528_v44  ;;  %v634_v53 = vadd.f32 %v3086_v28, %v529_v45 }
  0x9e   : > { %v480_v56 = vmul.f32 %v3085_v19, %v2379_v50 }
  0x9f   : > { %v753_v13 = vpack.c.bf16 %v676_v2, %v675_v0  ;;  %v731_v58 = vmax.f32 %v633_v52, 0.0  ;;  %v732_v59 = vmax.f32 %v634_v53, 0.0  ;;  %v586_v0 = vadd.f32 %v3086_v28, %v481_v60 }
  0xa0   : > { %v585_v63 = vadd.f32 %v3086_v28, %v480_v56 }
  0xa1   : > { %v684_v4 = vmax.f32 %v586_v0, 0.0 }
  0xa2   : > { %v683_v2 = vmax.f32 %v585_v63, 0.0 }
  0xa3   : > { %2942 = vmatmul.mubr.msk.bf16.gmra.mrb[68].mxu0 %vm805_vm1, %v750_v10  ;;  %3042 = vmatmul.mubr.msk.bf16.gmra.mrb[68].mxu1 %vm805_vm1, %v775_v15  ;;  %v630_v10 = vadd.f32 %v3171_v12, %v525_v62  ;;  %v2471_v15 = vunpack.c.l.bf16 %v2768_v6  ;;  %v781_v62 = vpack.c.bf16 %v732_v59, %v731_v58  ;;  %v3546_v6 = vld [vmem:[%s3709_s4] ss:$0 sm:$0xff] }
  0xa4   : > { %2945 = vmatprep.mubr.msk.bf16.mxu0 %vm3096_vm0, %v3095_v1  ;;  %3045 = vmatprep.mubr.msk.bf16.mxu1 %vm3096_vm0, %v3095_v1  ;;  %v757_v5 = vpack.c.bf16 %v684_v4, %v683_v2 }
  0xa5   : > { %v728_v22 = vmax.f32 %v630_v10, 0.0  ;;  %v526_v12 = vmul.f32 %v3085_v19, %v2471_v15 }
  0xa7   : > { %v779_v30 = vpack.c.bf16 %v728_v22, %v727_v21  ;;  %v631_v34 = vadd.f32 %v3086_v28, %v526_v12 }
  0xa9   : > { %v729_v42 = vmax.f32 %v631_v34, 0.0 }
  0xab   : > { %2946 = vmatmul.mubr.msk.bf16.gmra.mrb[72].mxu0 %vm805_vm1, %v751_v31  ;;  %3046 = vmatmul.mubr.msk.bf16.gmra.mrb[72].mxu1 %vm805_vm1, %v776_v35  ;;  %v582_v31 = vadd.f32 %v3086_v28, %v477_v23  ;;  %v632_v35 = vadd.f32 %v3086_v28, %v527_v24 }
  0xac   : > { %2949 = vmatprep.mubr.msk.bf16.mxu0 %vm3096_vm0, %v3095_v1  ;;  %3049 = vmatprep.mubr.msk.bf16.mxu1 %vm3096_vm0, %v3095_v1 }
  0xad   : > { %v680_v39 = vmax.f32 %v582_v31, 0.0  ;;  %v730_v43 = vmax.f32 %v632_v35, 0.0 }
  0xaf   : > { %v755_v47 = vpack.c.bf16 %v680_v39, %v679_v38 }
  0xb3   : > { %2950 = vmatmul.mubr.msk.bf16.gmra.mrb[76].mxu0 %vm805_vm1, %v752_v51  ;;  %3050 = vmatmul.mubr.msk.bf16.gmra.mrb[76].mxu1 %vm805_vm1, %v777_v55  ;;  %v780_v51 = vpack.c.bf16 %v730_v43, %v729_v42  ;;  %v681_v55 = vmax.f32 %v583_v48, 0.0 }
  0xb4   : > { %2953 = vmatprep.mubr.msk.bf16.mxu0 %vm3096_vm0, %v3095_v1  ;;  %3053 = vmatprep.mubr.msk.bf16.mxu1 %vm3096_vm0, %v3095_v1 }
  0xb5   : > { %v756_v61 = vpack.c.bf16 %v682_v57, %v681_v55 }
  0xbb   : > { %2954 = vmatmul.mubr.msk.bf16.gmra.mrb[80].mxu0 %vm805_vm1, %v753_v13  ;;  %3054 = vmatmul.mubr.msk.bf16.gmra.mrb[80].mxu1 %vm805_vm1, %v778_v14 }
  0xbc   : > { %2957 = vmatprep.mubr.msk.bf16.mxu0 %vm3096_vm0, %v3095_v1  ;;  %3057 = vmatprep.mubr.msk.bf16.mxu1 %vm3096_vm0, %v3095_v1 }
  0xc3   : > { %2958 = vmatmul.mubr.msk.bf16.gmra.mrb[84].mxu0 %vm805_vm1, %v754_v27  ;;  %3058 = vmatmul.mubr.msk.bf16.gmra.mrb[84].mxu1 %vm805_vm1, %v779_v30 }
  0xc4   : > { %2961 = vmatprep.mubr.msk.bf16.mxu0 %vm3096_vm0, %v3095_v1  ;;  %3061 = vmatprep.mubr.msk.bf16.mxu1 %vm3096_vm0, %v3095_v1 }
  0xcb   : > { %2962 = vmatmul.mubr.msk.bf16.gmra.mrb[88].mxu0 %vm805_vm1, %v755_v47  ;;  %3062 = vmatmul.mubr.msk.bf16.gmra.mrb[88].mxu1 %vm805_vm1, %v780_v51 }
  0xcc   : > { %2965 = vmatprep.mubr.msk.bf16.mxu0 %vm3096_vm0, %v3095_v1  ;;  %3065 = vmatprep.mubr.msk.bf16.mxu1 %vm3096_vm0, %v3095_v1 }
  0xd3   : > { %2966 = vmatmul.mubr.msk.bf16.gmra.mrb[92].mxu0 %vm805_vm1, %v756_v61  ;;  %3066 = vmatmul.mubr.msk.bf16.gmra.mrb[92].mxu1 %vm805_vm1, %v781_v62 }
  0xd4   : > { %2969 = vmatprep.mubr.msk.bf16.mxu0 %vm3096_vm0, %v3095_v1 }
  0xdb   : > { %2970 = vmatmul.mubr.msk.bf16.gmra.mrb[96].mxu0 %vm805_vm1, %v757_v5 }
  0xee   : > { %v987_v7 = vpop.f32.mrb[0].mxu0  ;;  %v1187_v3 = vpop.f32.mrb[0].mxu1 }
  0xef   : > { %v988_v8 = vadd.f32 %v3546_v6, %v987_v7  ;;  %v2875_v9 = vpop.f32.mrb[1].mxu0  ;;  %v1188_v10 = vadd.f32 %v3546_v6, %v1187_v3  ;;  %v2975_v11 = vpop.f32.mrb[1].mxu1 }
  0xf0   : > { %v990_v13 = vpop.f32.mrb[2].mxu0  ;;  %v1190_v14 = vpop.f32.mrb[2].mxu1 }
  0xf1   : > { %v991_v1 = vadd.f32 %v3546_v6, %v990_v13  ;;  %v2876_v15 = vpop.f32.mrb[3].mxu0  ;;  %v1428_v16 = vmax.f32 %v1188_v10, 0.0  ;;  %v1191_v17 = vadd.f32 %v3546_v6, %v1190_v14  ;;  %v2976_v18 = vpop.f32.mrb[3].mxu1  ;;  %v1378_v19 = vmax.f32 %v988_v8, 0.0 }
  0xf3   : > { %v1379_v20 = vmax.f32 %v991_v1, 0.0  ;;  %v1429_v21 = vmax.f32 %v1191_v17, 0.0 }
  0xf5   : > { %v2480_v22 = vpack.c.bf16 %v1379_v20, %v1378_v19  ;;  %v2605_v23 = vpack.c.bf16 %v1429_v21, %v1428_v16 }
  0xf6   : > { %v995_v12 = vpop.f32.mrb[4].mxu0  ;;  %v1195_v24 = vpop.f32.mrb[4].mxu1 }
  0xf7   : > { %2481 = vst [vmem:[%s3557_s16] sm:$0xff] %v2480_v22   ;;  %2794 = vst [vmem:[%s3557_s16 + $0xc8] sm:$0xff] %v2605_v23   ;;  %v996_v25 = vadd.f32 %v3546_v6, %v995_v12  ;;  %v2879_v26 = vpop.f32.mrb[5].mxu0  ;;  %v1196_v27 = vadd.f32 %v3546_v6, %v1195_v24  ;;  %v2979_v28 = vpop.f32.mrb[5].mxu1 }
  0xf8   : > { %v998_v29 = vpop.f32.mrb[6].mxu0  ;;  %v1198_v30 = vpop.f32.mrb[6].mxu1 }
  0xf9   : > { %v999_v31 = vadd.f32 %v3546_v6, %v998_v29  ;;  %v2880_v32 = vpop.f32.mrb[7].mxu0  ;;  %v1430_v33 = vmax.f32 %v1196_v27, 0.0  ;;  %v1199_v34 = vadd.f32 %v3546_v6, %v1198_v30  ;;  %v2980_v35 = vpop.f32.mrb[7].mxu1  ;;  %v1380_v36 = vmax.f32 %v996_v25, 0.0 }
  0xfb   : > { %v1381_v37 = vmax.f32 %v999_v31, 0.0  ;;  %v1431_v38 = vmax.f32 %v1199_v34, 0.0 }
  0xfd   : > { %v2485_v39 = vpack.c.bf16 %v1381_v37, %v1380_v36  ;;  %v2610_v40 = vpack.c.bf16 %v1431_v38, %v1430_v33 }
  0xfe   : > { %v1003_v41 = vpop.f32.mrb[8].mxu0  ;;  %v1203_v42 = vpop.f32.mrb[8].mxu1 }
  0xff   : > { %2770 = vst [vmem:[%s3557_s16 + $0x8] sm:$0xff] %v2485_v39   ;;  %2795 = vst [vmem:[%s3557_s16 + $0xd0] sm:$0xff] %v2610_v40   ;;  %v1004_v43 = vadd.f32 %v3546_v6, %v1003_v41  ;;  %v2883_v44 = vpop.f32.mrb[9].mxu0  ;;  %v1204_v45 = vadd.f32 %v3546_v6, %v1203_v42  ;;  %v2983_v46 = vpop.f32.mrb[9].mxu1 }
 0x100   : > { %v1006_v47 = vpop.f32.mrb[10].mxu0  ;;  %v1206_v48 = vpop.f32.mrb[10].mxu1 }
 0x101   : > { %v1007_v49 = vadd.f32 %v3546_v6, %v1006_v47  ;;  %v2884_v50 = vpop.f32.mrb[11].mxu0  ;;  %v1432_v51 = vmax.f32 %v1204_v45, 0.0  ;;  %v1207_v52 = vadd.f32 %v3546_v6, %v1206_v48  ;;  %v2984_v53 = vpop.f32.mrb[11].mxu1  ;;  %v1382_v54 = vmax.f32 %v1004_v43, 0.0 }
 0x103   : > { %v1383_v55 = vmax.f32 %v1007_v49, 0.0  ;;  %v1433_v56 = vmax.f32 %v1207_v52, 0.0 }
 0x105   : > { %v2490_v57 = vpack.c.bf16 %v1383_v55, %v1382_v54  ;;  %v2615_v58 = vpack.c.bf16 %v1433_v56, %v1432_v51 }
 0x106   : > { %v1011_v59 = vpop.f32.mrb[12].mxu0  ;;  %v1211_v60 = vpop.f32.mrb[12].mxu1 }
 0x107   : > { %2771 = vst [vmem:[%s3557_s16 + $0x10] sm:$0xff] %v2490_v57   ;;  %2796 = vst [vmem:[%s3557_s16 + $0xd8] sm:$0xff] %v2615_v58   ;;  %v1012_v61 = vadd.f32 %v3546_v6, %v1011_v59  ;;  %v2887_v62 = vpop.f32.mrb[13].mxu0  ;;  %v1212_v63 = vadd.f32 %v3546_v6, %v1211_v60  ;;  %v2987_v0 = vpop.f32.mrb[13].mxu1 }
 0x108   : > { %v1014_v2 = vpop.f32.mrb[14].mxu0  ;;  %v1214_v4 = vpop.f32.mrb[14].mxu1 }
 0x109   : > { %v1015_v5 = vadd.f32 %v3546_v6, %v1014_v2  ;;  %v2888_v7 = vpop.f32.mrb[15].mxu0  ;;  %v1434_v3 = vmax.f32 %v1212_v63, 0.0  ;;  %v1215_v8 = vadd.f32 %v3546_v6, %v1214_v4  ;;  %v2988_v9 = vpop.f32.mrb[15].mxu1  ;;  %v1384_v10 = vmax.f32 %v1012_v61, 0.0 }
 0x10b   : > { %v1385_v11 = vmax.f32 %v1015_v5, 0.0  ;;  %v1435_v13 = vmax.f32 %v1215_v8, 0.0 }
 0x10d   : > { %v2495_v14 = vpack.c.bf16 %v1385_v11, %v1384_v10  ;;  %v2620_v1 = vpack.c.bf16 %v1435_v13, %v1434_v3 }
 0x10e   : > { %v1019_v15 = vpop.f32.mrb[16].mxu0  ;;  %v1219_v16 = vpop.f32.mrb[16].mxu1 }
 0x10f   : > { %2772 = vst [vmem:[%s3557_s16 + $0x18] sm:$0xff] %v2495_v14   ;;  %2797 = vst [vmem:[%s3557_s16 + $0xe0] sm:$0xff] %v2620_v1   ;;  %v1020_v17 = vadd.f32 %v3546_v6, %v1019_v15  ;;  %v2891_v18 = vpop.f32.mrb[17].mxu0  ;;  %v1220_v19 = vadd.f32 %v3546_v6, %v1219_v16  ;;  %v2991_v20 = vpop.f32.mrb[17].mxu1 }
 0x110   : > { %v1022_v21 = vpop.f32.mrb[18].mxu0  ;;  %v1222_v22 = vpop.f32.mrb[18].mxu1 }
 0x111   : > { %v1023_v23 = vadd.f32 %v3546_v6, %v1022_v21  ;;  %v2892_v12 = vpop.f32.mrb[19].mxu0  ;;  %v1436_v24 = vmax.f32 %v1220_v19, 0.0  ;;  %v1223_v25 = vadd.f32 %v3546_v6, %v1222_v22  ;;  %v2992_v26 = vpop.f32.mrb[19].mxu1  ;;  %v1386_v27 = vmax.f32 %v1020_v17, 0.0 }
 0x113   : > { %v1387_v28 = vmax.f32 %v1023_v23, 0.0  ;;  %v1437_v29 = vmax.f32 %v1223_v25, 0.0 }
 0x115   : > { %v2500_v30 = vpack.c.bf16 %v1387_v28, %v1386_v27  ;;  %v2625_v31 = vpack.c.bf16 %v1437_v29, %v1436_v24 }
 0x116   : > { %v1027_v32 = vpop.f32.mrb[20].mxu0  ;;  %v1227_v33 = vpop.f32.mrb[20].mxu1 }
 0x117   : > { %2773 = vst [vmem:[%s3557_s16 + $0x20] sm:$0xff] %v2500_v30   ;;  %2798 = vst [vmem:[%s3557_s16 + $0xe8] sm:$0xff] %v2625_v31   ;;  %v1028_v34 = vadd.f32 %v3546_v6, %v1027_v32  ;;  %v2895_v35 = vpop.f32.mrb[21].mxu0  ;;  %v1228_v36 = vadd.f32 %v3546_v6, %v1227_v33  ;;  %v2995_v37 = vpop.f32.mrb[21].mxu1 }
 0x118   : > { %v1030_v38 = vpop.f32.mrb[22].mxu0  ;;  %v1230_v39 = vpop.f32.mrb[22].mxu1 }
 0x119   : > { %v1031_v40 = vadd.f32 %v3546_v6, %v1030_v38  ;;  %v2896_v41 = vpop.f32.mrb[23].mxu0  ;;  %v1438_v42 = vmax.f32 %v1228_v36, 0.0  ;;  %v1231_v43 = vadd.f32 %v3546_v6, %v1230_v39  ;;  %v2996_v44 = vpop.f32.mrb[23].mxu1  ;;  %v1388_v45 = vmax.f32 %v1028_v34, 0.0 }
 0x11b   : > { %v1389_v46 = vmax.f32 %v1031_v40, 0.0  ;;  %v1439_v47 = vmax.f32 %v1231_v43, 0.0 }
 0x11d   : > { %v2505_v48 = vpack.c.bf16 %v1389_v46, %v1388_v45  ;;  %v2630_v49 = vpack.c.bf16 %v1439_v47, %v1438_v42 }
 0x11e   : > { %v1035_v50 = vpop.f32.mrb[24].mxu0  ;;  %v1235_v51 = vpop.f32.mrb[24].mxu1 }
 0x11f   : > { %2774 = vst [vmem:[%s3557_s16 + $0x28] sm:$0xff] %v2505_v48   ;;  %2799 = vst [vmem:[%s3557_s16 + $0xf0] sm:$0xff] %v2630_v49   ;;  %v1036_v52 = vadd.f32 %v3546_v6, %v1035_v50  ;;  %v2899_v53 = vpop.f32.mrb[25].mxu0  ;;  %v1236_v54 = vadd.f32 %v3546_v6, %v1235_v51  ;;  %v2999_v55 = vpop.f32.mrb[25].mxu1 }
 0x120   : > { %v1038_v56 = vpop.f32.mrb[26].mxu0  ;;  %v1238_v57 = vpop.f32.mrb[26].mxu1 }
 0x121   : > { %v1039_v58 = vadd.f32 %v3546_v6, %v1038_v56  ;;  %v2900_v59 = vpop.f32.mrb[27].mxu0  ;;  %v1440_v60 = vmax.f32 %v1236_v54, 0.0  ;;  %v1239_v61 = vadd.f32 %v3546_v6, %v1238_v57  ;;  %v3000_v62 = vpop.f32.mrb[27].mxu1  ;;  %v1390_v63 = vmax.f32 %v1036_v52, 0.0 }
 0x123   : > { %v1391_v0 = vmax.f32 %v1039_v58, 0.0  ;;  %v1441_v2 = vmax.f32 %v1239_v61, 0.0 }
 0x125   : > { %v2510_v4 = vpack.c.bf16 %v1391_v0, %v1390_v63  ;;  %v2635_v5 = vpack.c.bf16 %v1441_v2, %v1440_v60 }
 0x126   : > { %v1043_v7 = vpop.f32.mrb[28].mxu0  ;;  %v1243_v3 = vpop.f32.mrb[28].mxu1 }
 0x127   : > { %2775 = vst [vmem:[%s3557_s16 + $0x30] sm:$0xff] %v2510_v4   ;;  %2800 = vst [vmem:[%s3557_s16 + $0xf8] sm:$0xff] %v2635_v5   ;;  %v1044_v8 = vadd.f32 %v3546_v6, %v1043_v7  ;;  %v2903_v9 = vpop.f32.mrb[29].mxu0  ;;  %v1244_v10 = vadd.f32 %v3546_v6, %v1243_v3  ;;  %v3003_v11 = vpop.f32.mrb[29].mxu1 }
 0x128   : > { %v1046_v13 = vpop.f32.mrb[30].mxu0  ;;  %v1246_v14 = vpop.f32.mrb[30].mxu1 }
 0x129   : > { %v1047_v1 = vadd.f32 %v3546_v6, %v1046_v13  ;;  %v2904_v15 = vpop.f32.mrb[31].mxu0  ;;  %v1442_v16 = vmax.f32 %v1244_v10, 0.0  ;;  %v1247_v17 = vadd.f32 %v3546_v6, %v1246_v14  ;;  %v3004_v18 = vpop.f32.mrb[31].mxu1  ;;  %v1392_v19 = vmax.f32 %v1044_v8, 0.0 }
 0x12b   : > { %v1393_v20 = vmax.f32 %v1047_v1, 0.0  ;;  %v1443_v21 = vmax.f32 %v1247_v17, 0.0 }
 0x12d   : > { %v2515_v22 = vpack.c.bf16 %v1393_v20, %v1392_v19  ;;  %v2640_v23 = vpack.c.bf16 %v1443_v21, %v1442_v16 }
 0x12e   : > { %v1051_v12 = vpop.f32.mrb[32].mxu0  ;;  %v1251_v24 = vpop.f32.mrb[32].mxu1 }
 0x12f   : > { %2776 = vst [vmem:[%s3557_s16 + $0x38] sm:$0xff] %v2515_v22   ;;  %2801 = vst [vmem:[%s3557_s16 + $0x100] sm:$0xff] %v2640_v23   ;;  %v1052_v25 = vadd.f32 %v3546_v6, %v1051_v12  ;;  %v2907_v26 = vpop.f32.mrb[33].mxu0  ;;  %v1252_v27 = vadd.f32 %v3546_v6, %v1251_v24  ;;  %v3007_v28 = vpop.f32.mrb[33].mxu1 }
 0x130   : > { %v1054_v29 = vpop.f32.mrb[34].mxu0  ;;  %v1254_v30 = vpop.f32.mrb[34].mxu1 }
 0x131   : > { %v1055_v31 = vadd.f32 %v3546_v6, %v1054_v29  ;;  %v2908_v32 = vpop.f32.mrb[35].mxu0  ;;  %v1444_v33 = vmax.f32 %v1252_v27, 0.0  ;;  %v1255_v34 = vadd.f32 %v3546_v6, %v1254_v30  ;;  %v3008_v35 = vpop.f32.mrb[35].mxu1  ;;  %v1394_v36 = vmax.f32 %v1052_v25, 0.0 }
 0x133   : > { %v1395_v37 = vmax.f32 %v1055_v31, 0.0  ;;  %v1445_v38 = vmax.f32 %v1255_v34, 0.0 }
 0x135   : > { %v2520_v39 = vpack.c.bf16 %v1395_v37, %v1394_v36  ;;  %v2645_v40 = vpack.c.bf16 %v1445_v38, %v1444_v33 }
 0x136   : > { %v1059_v41 = vpop.f32.mrb[36].mxu0  ;;  %v1259_v42 = vpop.f32.mrb[36].mxu1 }
 0x137   : > { %2777 = vst [vmem:[%s3557_s16 + $0x40] sm:$0xff] %v2520_v39   ;;  %2802 = vst [vmem:[%s3557_s16 + $0x108] sm:$0xff] %v2645_v40   ;;  %v1060_v43 = vadd.f32 %v3546_v6, %v1059_v41  ;;  %v2911_v44 = vpop.f32.mrb[37].mxu0  ;;  %v1260_v45 = vadd.f32 %v3546_v6, %v1259_v42  ;;  %v3011_v46 = vpop.f32.mrb[37].mxu1 }
 0x138   : > { %v1062_v47 = vpop.f32.mrb[38].mxu0  ;;  %v1262_v48 = vpop.f32.mrb[38].mxu1 }
 0x139   : > { %v1063_v49 = vadd.f32 %v3546_v6, %v1062_v47  ;;  %v2912_v50 = vpop.f32.mrb[39].mxu0  ;;  %v1446_v51 = vmax.f32 %v1260_v45, 0.0  ;;  %v1263_v52 = vadd.f32 %v3546_v6, %v1262_v48  ;;  %v3012_v53 = vpop.f32.mrb[39].mxu1  ;;  %v1396_v54 = vmax.f32 %v1060_v43, 0.0 }
 0x13b   : > { %v1397_v55 = vmax.f32 %v1063_v49, 0.0  ;;  %v1447_v56 = vmax.f32 %v1263_v52, 0.0 }
 0x13d   : > { %v2525_v57 = vpack.c.bf16 %v1397_v55, %v1396_v54  ;;  %v2650_v58 = vpack.c.bf16 %v1447_v56, %v1446_v51 }
 0x13e   : > { %v1067_v59 = vpop.f32.mrb[40].mxu0  ;;  %v1267_v60 = vpop.f32.mrb[40].mxu1 }
 0x13f   : > { %2778 = vst [vmem:[%s3557_s16 + $0x48] sm:$0xff] %v2525_v57   ;;  %2803 = vst [vmem:[%s3557_s16 + $0x110] sm:$0xff] %v2650_v58   ;;  %v1068_v61 = vadd.f32 %v3546_v6, %v1067_v59  ;;  %v2915_v62 = vpop.f32.mrb[41].mxu0  ;;  %v1268_v63 = vadd.f32 %v3546_v6, %v1267_v60  ;;  %v3015_v0 = vpop.f32.mrb[41].mxu1 }
 0x140   : > { %v1070_v2 = vpop.f32.mrb[42].mxu0  ;;  %v1270_v4 = vpop.f32.mrb[42].mxu1 }
 0x141   : > { %v1071_v5 = vadd.f32 %v3546_v6, %v1070_v2  ;;  %v2916_v7 = vpop.f32.mrb[43].mxu0  ;;  %v1448_v3 = vmax.f32 %v1268_v63, 0.0  ;;  %v1271_v8 = vadd.f32 %v3546_v6, %v1270_v4  ;;  %v3016_v9 = vpop.f32.mrb[43].mxu1  ;;  %v1398_v10 = vmax.f32 %v1068_v61, 0.0 }
 0x143   : > { %v1399_v11 = vmax.f32 %v1071_v5, 0.0  ;;  %v1449_v13 = vmax.f32 %v1271_v8, 0.0 }
 0x145   : > { %v2530_v14 = vpack.c.bf16 %v1399_v11, %v1398_v10  ;;  %v2655_v1 = vpack.c.bf16 %v1449_v13, %v1448_v3 }
 0x146   : > { %v1075_v15 = vpop.f32.mrb[44].mxu0  ;;  %v1275_v16 = vpop.f32.mrb[44].mxu1 }
 0x147   : > { %2779 = vst [vmem:[%s3557_s16 + $0x50] sm:$0xff] %v2530_v14   ;;  %2804 = vst [vmem:[%s3557_s16 + $0x118] sm:$0xff] %v2655_v1   ;;  %v1076_v17 = vadd.f32 %v3546_v6, %v1075_v15  ;;  %v2919_v18 = vpop.f32.mrb[45].mxu0  ;;  %v1276_v19 = vadd.f32 %v3546_v6, %v1275_v16  ;;  %v3019_v20 = vpop.f32.mrb[45].mxu1 }
 0x148   : > { %v1078_v21 = vpop.f32.mrb[46].mxu0  ;;  %v1278_v22 = vpop.f32.mrb[46].mxu1 }
 0x149   : > { %v1079_v23 = vadd.f32 %v3546_v6, %v1078_v21  ;;  %v2920_v12 = vpop.f32.mrb[47].mxu0  ;;  %v1450_v24 = vmax.f32 %v1276_v19, 0.0  ;;  %v1279_v25 = vadd.f32 %v3546_v6, %v1278_v22  ;;  %v3020_v26 = vpop.f32.mrb[47].mxu1  ;;  %v1400_v27 = vmax.f32 %v1076_v17, 0.0 }
 0x14b   : > { %v1401_v28 = vmax.f32 %v1079_v23, 0.0  ;;  %v1451_v29 = vmax.f32 %v1279_v25, 0.0 }
 0x14d   : > { %v2535_v30 = vpack.c.bf16 %v1401_v28, %v1400_v27  ;;  %v2660_v31 = vpack.c.bf16 %v1451_v29, %v1450_v24 }
 0x14e   : > { %v1083_v32 = vpop.f32.mrb[48].mxu0  ;;  %v1283_v33 = vpop.f32.mrb[48].mxu1 }
 0x14f   : > { %2780 = vst [vmem:[%s3557_s16 + $0x58] sm:$0xff] %v2535_v30   ;;  %2805 = vst [vmem:[%s3557_s16 + $0x120] sm:$0xff] %v2660_v31   ;;  %v1084_v34 = vadd.f32 %v3546_v6, %v1083_v32  ;;  %v2923_v35 = vpop.f32.mrb[49].mxu0  ;;  %v1284_v36 = vadd.f32 %v3546_v6, %v1283_v33  ;;  %v3023_v37 = vpop.f32.mrb[49].mxu1 }
 0x150   : > { %v1086_v38 = vpop.f32.mrb[50].mxu0  ;;  %v1286_v39 = vpop.f32.mrb[50].mxu1 }
 0x151   : > { %v1087_v40 = vadd.f32 %v3546_v6, %v1086_v38  ;;  %v2924_v41 = vpop.f32.mrb[51].mxu0  ;;  %v1452_v42 = vmax.f32 %v1284_v36, 0.0  ;;  %v1287_v43 = vadd.f32 %v3546_v6, %v1286_v39  ;;  %v3024_v44 = vpop.f32.mrb[51].mxu1  ;;  %v1402_v45 = vmax.f32 %v1084_v34, 0.0 }
 0x153   : > { %v1403_v46 = vmax.f32 %v1087_v40, 0.0  ;;  %v1453_v47 = vmax.f32 %v1287_v43, 0.0 }
 0x155   : > { %v2540_v48 = vpack.c.bf16 %v1403_v46, %v1402_v45  ;;  %v2665_v49 = vpack.c.bf16 %v1453_v47, %v1452_v42 }
 0x156   : > { %v1091_v50 = vpop.f32.mrb[52].mxu0  ;;  %v1291_v51 = vpop.f32.mrb[52].mxu1 }
 0x157   : > { %2781 = vst [vmem:[%s3557_s16 + $0x60] sm:$0xff] %v2540_v48   ;;  %2806 = vst [vmem:[%s3557_s16 + $0x128] sm:$0xff] %v2665_v49   ;;  %v1092_v52 = vadd.f32 %v3546_v6, %v1091_v50  ;;  %v2927_v53 = vpop.f32.mrb[53].mxu0  ;;  %v1292_v54 = vadd.f32 %v3546_v6, %v1291_v51  ;;  %v3027_v55 = vpop.f32.mrb[53].mxu1 }
 0x158   : > { %v1094_v56 = vpop.f32.mrb[54].mxu0  ;;  %v1294_v57 = vpop.f32.mrb[54].mxu1 }
 0x159   : > { %v1095_v58 = vadd.f32 %v3546_v6, %v1094_v56  ;;  %v2928_v59 = vpop.f32.mrb[55].mxu0  ;;  %v1454_v60 = vmax.f32 %v1292_v54, 0.0  ;;  %v1295_v61 = vadd.f32 %v3546_v6, %v1294_v57  ;;  %v3028_v62 = vpop.f32.mrb[55].mxu1  ;;  %v1404_v63 = vmax.f32 %v1092_v52, 0.0 }
 0x15b   : > { %v1405_v0 = vmax.f32 %v1095_v58, 0.0  ;;  %v1455_v2 = vmax.f32 %v1295_v61, 0.0 }
 0x15d   : > { %v2545_v4 = vpack.c.bf16 %v1405_v0, %v1404_v63  ;;  %v2670_v5 = vpack.c.bf16 %v1455_v2, %v1454_v60 }
 0x15e   : > { %v1099_v7 = vpop.f32.mrb[56].mxu0  ;;  %v1299_v3 = vpop.f32.mrb[56].mxu1 }
 0x15f   : > { %2782 = vst [vmem:[%s3557_s16 + $0x68] sm:$0xff] %v2545_v4   ;;  %2807 = vst [vmem:[%s3557_s16 + $0x130] sm:$0xff] %v2670_v5   ;;  %v1100_v8 = vadd.f32 %v3546_v6, %v1099_v7  ;;  %v2931_v9 = vpop.f32.mrb[57].mxu0  ;;  %v1300_v10 = vadd.f32 %v3546_v6, %v1299_v3  ;;  %v3031_v11 = vpop.f32.mrb[57].mxu1 }
 0x160   : > { %v1102_v13 = vpop.f32.mrb[58].mxu0  ;;  %v1302_v14 = vpop.f32.mrb[58].mxu1 }
 0x161   : > { %v1103_v1 = vadd.f32 %v3546_v6, %v1102_v13  ;;  %v2932_v15 = vpop.f32.mrb[59].mxu0  ;;  %v1456_v16 = vmax.f32 %v1300_v10, 0.0  ;;  %v1303_v17 = vadd.f32 %v3546_v6, %v1302_v14  ;;  %v3032_v18 = vpop.f32.mrb[59].mxu1  ;;  %v1406_v19 = vmax.f32 %v1100_v8, 0.0 }
 0x163   : > { %v1407_v20 = vmax.f32 %v1103_v1, 0.0  ;;  %v1457_v21 = vmax.f32 %v1303_v17, 0.0 }
 0x165   : > { %v2550_v22 = vpack.c.bf16 %v1407_v20, %v1406_v19  ;;  %v2675_v23 = vpack.c.bf16 %v1457_v21, %v1456_v16 }
 0x166   : > { %v1107_v12 = vpop.f32.mrb[60].mxu0  ;;  %v1307_v24 = vpop.f32.mrb[60].mxu1 }
 0x167   : > { %2783 = vst [vmem:[%s3557_s16 + $0x70] sm:$0xff] %v2550_v22   ;;  %2808 = vst [vmem:[%s3557_s16 + $0x138] sm:$0xff] %v2675_v23   ;;  %v1108_v25 = vadd.f32 %v3546_v6, %v1107_v12  ;;  %v2935_v26 = vpop.f32.mrb[61].mxu0  ;;  %v1308_v27 = vadd.f32 %v3546_v6, %v1307_v24  ;;  %v3035_v28 = vpop.f32.mrb[61].mxu1 }
 0x168   : > { %v1110_v29 = vpop.f32.mrb[62].mxu0  ;;  %v1310_v30 = vpop.f32.mrb[62].mxu1 }
 0x169   : > { %v1111_v31 = vadd.f32 %v3546_v6, %v1110_v29  ;;  %v2936_v32 = vpop.f32.mrb[63].mxu0  ;;  %v1458_v33 = vmax.f32 %v1308_v27, 0.0  ;;  %v1311_v34 = vadd.f32 %v3546_v6, %v1310_v30  ;;  %v3036_v35 = vpop.f32.mrb[63].mxu1  ;;  %v1408_v36 = vmax.f32 %v1108_v25, 0.0 }
 0x16b   : > { %v1409_v37 = vmax.f32 %v1111_v31, 0.0  ;;  %v1459_v38 = vmax.f32 %v1311_v34, 0.0 }
 0x16d   : > { %v2555_v39 = vpack.c.bf16 %v1409_v37, %v1408_v36  ;;  %v2680_v40 = vpack.c.bf16 %v1459_v38, %v1458_v33 }
 0x16e   : > { %v1115_v41 = vpop.f32.mrb[64].mxu0  ;;  %v1315_v42 = vpop.f32.mrb[64].mxu1 }
 0x16f   : > { %2784 = vst [vmem:[%s3557_s16 + $0x78] sm:$0xff] %v2555_v39   ;;  %2809 = vst [vmem:[%s3557_s16 + $0x140] sm:$0xff] %v2680_v40   ;;  %v1116_v43 = vadd.f32 %v3546_v6, %v1115_v41  ;;  %v2939_v44 = vpop.f32.mrb[65].mxu0  ;;  %v1316_v45 = vadd.f32 %v3546_v6, %v1315_v42  ;;  %v3039_v46 = vpop.f32.mrb[65].mxu1 }
 0x170   : > { %v1118_v47 = vpop.f32.mrb[66].mxu0  ;;  %v1318_v48 = vpop.f32.mrb[66].mxu1 }
 0x171   : > { %v1119_v49 = vadd.f32 %v3546_v6, %v1118_v47  ;;  %v2940_v50 = vpop.f32.mrb[67].mxu0  ;;  %v1460_v51 = vmax.f32 %v1316_v45, 0.0  ;;  %v1319_v52 = vadd.f32 %v3546_v6, %v1318_v48  ;;  %v3040_v53 = vpop.f32.mrb[67].mxu1  ;;  %v1410_v54 = vmax.f32 %v1116_v43, 0.0 }
 0x173   : > { %v1411_v55 = vmax.f32 %v1119_v49, 0.0  ;;  %v1461_v56 = vmax.f32 %v1319_v52, 0.0 }
 0x175   : > { %v2560_v57 = vpack.c.bf16 %v1411_v55, %v1410_v54  ;;  %v2685_v58 = vpack.c.bf16 %v1461_v56, %v1460_v51 }
 0x176   : > { %v1123_v59 = vpop.f32.mrb[68].mxu0  ;;  %v1323_v60 = vpop.f32.mrb[68].mxu1 }
 0x177   : > { %2785 = vst [vmem:[%s3557_s16 + $0x80] sm:$0xff] %v2560_v57   ;;  %2810 = vst [vmem:[%s3557_s16 + $0x148] sm:$0xff] %v2685_v58   ;;  %v1124_v61 = vadd.f32 %v3546_v6, %v1123_v59  ;;  %v2943_v62 = vpop.f32.mrb[69].mxu0  ;;  %v1324_v63 = vadd.f32 %v3546_v6, %v1323_v60  ;;  %v3043_v0 = vpop.f32.mrb[69].mxu1 }
 0x178   : > { %v1126_v2 = vpop.f32.mrb[70].mxu0  ;;  %v1326_v4 = vpop.f32.mrb[70].mxu1 }
 0x179   : > { %v1127_v5 = vadd.f32 %v3546_v6, %v1126_v2  ;;  %v2944_v7 = vpop.f32.mrb[71].mxu0  ;;  %v1462_v3 = vmax.f32 %v1324_v63, 0.0  ;;  %v1327_v8 = vadd.f32 %v3546_v6, %v1326_v4  ;;  %v3044_v9 = vpop.f32.mrb[71].mxu1  ;;  %v1412_v10 = vmax.f32 %v1124_v61, 0.0 }
 0x17b   : > { %v1413_v11 = vmax.f32 %v1127_v5, 0.0  ;;  %v1463_v13 = vmax.f32 %v1327_v8, 0.0 }
 0x17d   : > { %v2565_v14 = vpack.c.bf16 %v1413_v11, %v1412_v10  ;;  %v2690_v1 = vpack.c.bf16 %v1463_v13, %v1462_v3 }
 0x17e   : > { %v1131_v15 = vpop.f32.mrb[72].mxu0  ;;  %v1331_v16 = vpop.f32.mrb[72].mxu1 }
 0x17f   : > { %2786 = vst [vmem:[%s3557_s16 + $0x88] sm:$0xff] %v2565_v14   ;;  %2811 = vst [vmem:[%s3557_s16 + $0x150] sm:$0xff] %v2690_v1   ;;  %v1132_v17 = vadd.f32 %v3546_v6, %v1131_v15  ;;  %v2947_v18 = vpop.f32.mrb[73].mxu0  ;;  %v1332_v19 = vadd.f32 %v3546_v6, %v1331_v16  ;;  %v3047_v20 = vpop.f32.mrb[73].mxu1 }
 0x180   : > { %v1134_v21 = vpop.f32.mrb[74].mxu0  ;;  %v1334_v22 = vpop.f32.mrb[74].mxu1 }
 0x181   : > { %v1135_v23 = vadd.f32 %v3546_v6, %v1134_v21  ;;  %v2948_v12 = vpop.f32.mrb[75].mxu0  ;;  %v1464_v24 = vmax.f32 %v1332_v19, 0.0  ;;  %v1335_v25 = vadd.f32 %v3546_v6, %v1334_v22  ;;  %v3048_v26 = vpop.f32.mrb[75].mxu1  ;;  %v1414_v27 = vmax.f32 %v1132_v17, 0.0 }
 0x183   : > { %v1415_v28 = vmax.f32 %v1135_v23, 0.0  ;;  %v1465_v29 = vmax.f32 %v1335_v25, 0.0 }
 0x185   : > { %v2570_v30 = vpack.c.bf16 %v1415_v28, %v1414_v27  ;;  %v2695_v31 = vpack.c.bf16 %v1465_v29, %v1464_v24 }
 0x186   : > { %v1139_v32 = vpop.f32.mrb[76].mxu0  ;;  %v1339_v33 = vpop.f32.mrb[76].mxu1 }
 0x187   : > { %2787 = vst [vmem:[%s3557_s16 + $0x90] sm:$0xff] %v2570_v30   ;;  %2812 = vst [vmem:[%s3557_s16 + $0x158] sm:$0xff] %v2695_v31   ;;  %v1140_v34 = vadd.f32 %v3546_v6, %v1139_v32  ;;  %v2951_v35 = vpop.f32.mrb[77].mxu0  ;;  %v1340_v36 = vadd.f32 %v3546_v6, %v1339_v33  ;;  %v3051_v37 = vpop.f32.mrb[77].mxu1 }
 0x188   : > { %v1142_v38 = vpop.f32.mrb[78].mxu0  ;;  %v1342_v39 = vpop.f32.mrb[78].mxu1 }
 0x189   : > { %v1143_v40 = vadd.f32 %v3546_v6, %v1142_v38  ;;  %v2952_v41 = vpop.f32.mrb[79].mxu0  ;;  %v1466_v42 = vmax.f32 %v1340_v36, 0.0  ;;  %v1343_v43 = vadd.f32 %v3546_v6, %v1342_v39  ;;  %v3052_v44 = vpop.f32.mrb[79].mxu1  ;;  %v1416_v45 = vmax.f32 %v1140_v34, 0.0 }
 0x18b   : > { %v1417_v46 = vmax.f32 %v1143_v40, 0.0  ;;  %v1467_v47 = vmax.f32 %v1343_v43, 0.0 }
 0x18d   : > { %v2575_v48 = vpack.c.bf16 %v1417_v46, %v1416_v45  ;;  %v2700_v49 = vpack.c.bf16 %v1467_v47, %v1466_v42 }
 0x18e   : > { %v1147_v50 = vpop.f32.mrb[80].mxu0  ;;  %v1347_v51 = vpop.f32.mrb[80].mxu1 }
 0x18f   : > { %2788 = vst [vmem:[%s3557_s16 + $0x98] sm:$0xff] %v2575_v48   ;;  %2813 = vst [vmem:[%s3557_s16 + $0x160] sm:$0xff] %v2700_v49   ;;  %v1148_v52 = vadd.f32 %v3546_v6, %v1147_v50  ;;  %v2955_v53 = vpop.f32.mrb[81].mxu0  ;;  %v1348_v54 = vadd.f32 %v3546_v6, %v1347_v51  ;;  %v3055_v55 = vpop.f32.mrb[81].mxu1 }
 0x190   : > { %v1150_v56 = vpop.f32.mrb[82].mxu0  ;;  %v1350_v57 = vpop.f32.mrb[82].mxu1 }
 0x191   : > { %v1151_v58 = vadd.f32 %v3546_v6, %v1150_v56  ;;  %v2956_v59 = vpop.f32.mrb[83].mxu0  ;;  %v1468_v60 = vmax.f32 %v1348_v54, 0.0  ;;  %v1351_v61 = vadd.f32 %v3546_v6, %v1350_v57  ;;  %v3056_v62 = vpop.f32.mrb[83].mxu1  ;;  %v1418_v63 = vmax.f32 %v1148_v52, 0.0 }
 0x193   : > { %v1419_v0 = vmax.f32 %v1151_v58, 0.0  ;;  %v1469_v2 = vmax.f32 %v1351_v61, 0.0 }
 0x195   : > { %v2580_v4 = vpack.c.bf16 %v1419_v0, %v1418_v63  ;;  %v2705_v5 = vpack.c.bf16 %v1469_v2, %v1468_v60 }
 0x196   : > { %v1155_v7 = vpop.f32.mrb[84].mxu0  ;;  %v1355_v3 = vpop.f32.mrb[84].mxu1 }
 0x197   : > { %2789 = vst [vmem:[%s3557_s16 + $0xa0] sm:$0xff] %v2580_v4   ;;  %2814 = vst [vmem:[%s3557_s16 + $0x168] sm:$0xff] %v2705_v5   ;;  %v1156_v8 = vadd.f32 %v3546_v6, %v1155_v7  ;;  %v2959_v9 = vpop.f32.mrb[85].mxu0  ;;  %v1356_v10 = vadd.f32 %v3546_v6, %v1355_v3  ;;  %v3059_v11 = vpop.f32.mrb[85].mxu1 }
 0x198   : > { %v1158_v13 = vpop.f32.mrb[86].mxu0  ;;  %v1358_v14 = vpop.f32.mrb[86].mxu1 }
 0x199   : > { %v1159_v1 = vadd.f32 %v3546_v6, %v1158_v13  ;;  %v2960_v15 = vpop.f32.mrb[87].mxu0  ;;  %v1470_v16 = vmax.f32 %v1356_v10, 0.0  ;;  %v1359_v17 = vadd.f32 %v3546_v6, %v1358_v14  ;;  %v3060_v18 = vpop.f32.mrb[87].mxu1  ;;  %v1420_v19 = vmax.f32 %v1156_v8, 0.0 }
 0x19b   : > { %v1421_v20 = vmax.f32 %v1159_v1, 0.0  ;;  %v1471_v21 = vmax.f32 %v1359_v17, 0.0 }
 0x19d   : > { %v2585_v22 = vpack.c.bf16 %v1421_v20, %v1420_v19  ;;  %v2710_v23 = vpack.c.bf16 %v1471_v21, %v1470_v16 }
 0x19e   : > { %v1163_v12 = vpop.f32.mrb[88].mxu0  ;;  %v1363_v24 = vpop.f32.mrb[88].mxu1 }
 0x19f   : > { %2790 = vst [vmem:[%s3557_s16 + $0xa8] sm:$0xff] %v2585_v22   ;;  %2815 = vst [vmem:[%s3557_s16 + $0x170] sm:$0xff] %v2710_v23   ;;  %v1164_v25 = vadd.f32 %v3546_v6, %v1163_v12  ;;  %v2963_v26 = vpop.f32.mrb[89].mxu0  ;;  %v1364_v27 = vadd.f32 %v3546_v6, %v1363_v24  ;;  %v3063_v28 = vpop.f32.mrb[89].mxu1 }
 0x1a0   : > { %v1166_v29 = vpop.f32.mrb[90].mxu0  ;;  %v1366_v30 = vpop.f32.mrb[90].mxu1 }
 0x1a1   : > { %v1167_v31 = vadd.f32 %v3546_v6, %v1166_v29  ;;  %v2964_v32 = vpop.f32.mrb[91].mxu0  ;;  %v1472_v33 = vmax.f32 %v1364_v27, 0.0  ;;  %v1367_v34 = vadd.f32 %v3546_v6, %v1366_v30  ;;  %v3064_v35 = vpop.f32.mrb[91].mxu1  ;;  %v1422_v36 = vmax.f32 %v1164_v25, 0.0 }
 0x1a3   : > { %v1423_v37 = vmax.f32 %v1167_v31, 0.0  ;;  %v1473_v38 = vmax.f32 %v1367_v34, 0.0 }
 0x1a5   : > { %v2590_v39 = vpack.c.bf16 %v1423_v37, %v1422_v36  ;;  %v2715_v40 = vpack.c.bf16 %v1473_v38, %v1472_v33 }
 0x1a6   : > { %v1171_v41 = vpop.f32.mrb[92].mxu0  ;;  %v1371_v42 = vpop.f32.mrb[92].mxu1 }
 0x1a7   : > { %2791 = vst [vmem:[%s3557_s16 + $0xb0] sm:$0xff] %v2590_v39   ;;  %2816 = vst [vmem:[%s3557_s16 + $0x178] sm:$0xff] %v2715_v40   ;;  %v1172_v43 = vadd.f32 %v3546_v6, %v1171_v41  ;;  %v2967_v44 = vpop.f32.mrb[93].mxu0  ;;  %v1372_v45 = vadd.f32 %v3546_v6, %v1371_v42  ;;  %v3067_v46 = vpop.f32.mrb[93].mxu1 }
 0x1a8   : > { %v1174_v47 = vpop.f32.mrb[94].mxu0  ;;  %v1374_v48 = vpop.f32.mrb[94].mxu1 }
 0x1a9   : > { %v1175_v49 = vadd.f32 %v3546_v6, %v1174_v47  ;;  %v2968_v50 = vpop.f32.mrb[95].mxu0  ;;  %v1474_v51 = vmax.f32 %v1372_v45, 0.0  ;;  %v1375_v52 = vadd.f32 %v3546_v6, %v1374_v48  ;;  %v3068_v53 = vpop.f32.mrb[95].mxu1  ;;  %v1424_v54 = vmax.f32 %v1172_v43, 0.0 }
 0x1ab   : > { %v1425_v55 = vmax.f32 %v1175_v49, 0.0  ;;  %v1475_v56 = vmax.f32 %v1375_v52, 0.0 }
 0x1ad   : > { %v2595_v57 = vpack.c.bf16 %v1425_v55, %v1424_v54  ;;  %v2720_v58 = vpack.c.bf16 %v1475_v56, %v1474_v51 }
 0x1ae   : > { %v1179_v59 = vpop.f32.mrb[96].mxu0 }
 0x1af   : > { %2792 = vst [vmem:[%s3557_s16 + $0xb8] sm:$0xff] %v2595_v57   ;;  %2817 = vst [vmem:[%s3557_s16 + $0x180] sm:$0xff] %v2720_v58   ;;  %v1180_v60 = vadd.f32 %v3546_v6, %v1179_v59  ;;  %v2971_v61 = vpop.f32.mrb[97].mxu0 }
 0x1b0   : > { %v1182_v62 = vpop.f32.mrb[98].mxu0 }
 0x1b1   : > { %v1183_v63 = vadd.f32 %v3546_v6, %v1182_v62  ;;  %v2972_v0 = vpop.f32.mrb[99].mxu0  ;;  %v1426_v2 = vmax.f32 %v1180_v60, 0.0 }
 0x1b3   : > { %v1427_v4 = vmax.f32 %v1183_v63, 0.0 }
 0x1b5   : > { %v2600_v5 = vpack.c.bf16 %v1427_v4, %v1426_v2 }
 0x1b7   : > { %2793 = vst [vmem:[%s3557_s16 + $0xc0] sm:$0xff] %v2600_v5  }
 0x1b8 PF: > { %s15_s18 = sadd.s32 1, %s3093_s18  }
 0x1b9   : > { %p12_p4 = scmp.ge.s32.totalorder %s15_s18, 4  }
 0x1bb   :  { %14 = sbr.rel (!%p12_p4) target bundleno = 1 (0x1), region = 70 }

// kernel: forward.13
= control target key start
LH: loop header
LB: loop body
LE: loop exit
PB: predicated region body
PF: predicated region fallthrough
CT: control target
= control target key end

     0   :  { %s2697_s15 = smov 0   ;;  %s3319_s0 = inlined_call_operand.vmem [shape: bf16[1568,32], index: 0, kind: input, shape index: {}]   ;;  %s3320_s1 = inlined_call_operand.vmem [shape: f32[1,32], index: 1, kind: input, shape index: {}]   ;;  %s3321_s2 = inlined_call_operand.vmem [shape: f32[1,32], index: 2, kind: input, shape index: {}]   ;;  %s3322_s3 = inlined_call_operand.vmem [shape: bf16[32,32], index: 3, kind: input, shape index: {}]   ;;  %s3323_s4 = inlined_call_operand.vmem [shape: bf16[1568,32], index: 4, kind: output, shape index: {}]  }
   0x1 LB: > { %s1891_s16 = sadd.s32 4294967295, %s2668_s15   ;;  %p1895_p0 = scmp.ge.s32.totalorder %s2668_s15, 1  ;;  %s2668_s15 = sphi %s2697_s15, %s14_s15  }
   0x2   : > { %p163_p1 = scmp.lt.s32.totalorder %s2668_s15, 3 }
   0x4   : > { %p164_p2 = pnand %p1895_p0, %p163_p1 }
   0x5   : > { %v2658_v0 = vld [vmem:[%s3322_s3] sm:$0xff] (!%p164_p2)   ;;  %v2670_v1 = vmov (!%p164_p2), 0.0   ;;  %v2659_v2 = vld [vmem:[%s3322_s3 + $0x8] sm:$0xff] (!%p164_p2)   ;;  %s189_s21 = smul.u32 (!%p164_p2), 98, %s1891_s16  ;;  %vm2671_vm0 = vmmov (!%p164_p2), 0   ;;  %vm771_vm1 = vcmask (!%p164_p2), 261120  }
   0x6   : > { %167 = sbr.rel (%p164_p2) target bundleno = 436 (0x1b4), region = 36  ;;  %2444 = vmatprep.subr.bf16.mxu0 (!%p164_p2), %v2670_v1  ;;  %2644 = vmatprep.subr.bf16.mxu1 (!%p164_p2), %v2670_v1  ;;  %v2732_v3 = vld [vmem:[%s3320_s1] ss:$0 sm:$0xff] (!%p164_p2)  ;;  %vm1736_vm2 = vcmask (!%p164_p2), 257024  }
   0x7   : > { %2445 = vmatpush3.bf16.msra.mxu0 (!%p164_p2), %v2658_v0  ;;  %2646 = vmatpush3.bf16.msra.mxu1 (!%p164_p2), %v2658_v0  ;;  %p190_p3 = scmp.lt.s32.totalorder (!%p164_p2), %s189_s21, 195  ;;  %v2741_v12 = vld [vmem:[%s3321_s2] ss:$0 sm:$0xff] (!%p164_p2) }
   0x8   : > { %2446 = vmatprep.subr.bf16.mxu0 (!%p164_p2), %v2670_v1  ;;  %2448 = vmatprep.mubr.msk.bf16.mxu0 (!%p164_p2), %vm2671_vm0, %v2670_v1 }
   0x9   : > { %2645 = vmatprep.subr.bf16.mxu1 (!%p164_p2), %v2670_v1  ;;  %2548 = vmatprep.mubr.msk.bf16.mxu1 (!%p164_p2), %vm2671_vm0, %v2670_v1 }
   0xb   : > { %2447 = vmatpush3.bf16.msra.mxu0 (!%p164_p2), %v2659_v2  ;;  %2647 = vmatpush3.bf16.msra.mxu1 (!%p164_p2), %v2659_v2 }
   0xd   : > { %s3325_s21 = smov (!%p190_p3, %s189_s21), 195 }
   0xe   : > { %s1896_s22 = sshll.u32 %s3325_s21, 2 }
   0xf   : > { %s2727_s25 = scalar_lea.vmem %s3319_s0, %s1896_s22  ;;  %s3118_s10 = scalar_lea.vmem %s3323_s4, %s1896_s22 }
  0x10   : > { %v2150_v4 = vld [vmem:[%s2727_s25] sm:$0xff]   ;;  %v2369_v5 = vld [vmem:[%s2727_s25 + $0xc8] sm:$0xff]   ;;  %v2370_v11 = vld [vmem:[%s2727_s25 + $0xd0] sm:$0xff]  }
  0x11   : > { %v2345_v6 = vld [vmem:[%s2727_s25 + $0x8] sm:$0xff]   ;;  %v2151_v7 = vunpack.c.l.bf16 %v2150_v4  ;;  %v2152_v8 = vunpack.c.h.bf16 %v2150_v4  ;;  %v2251_v9 = vunpack.c.l.bf16 %v2369_v5  ;;  %v2252_v10 = vunpack.c.h.bf16 %v2369_v5  ;;  %v2346_v33 = vld [vmem:[%s2727_s25 + $0x10] sm:$0xff]   ;;  %v2371_v38 = vld [vmem:[%s2727_s25 + $0xd8] sm:$0xff]  }
  0x12   : > { %v2155_v13 = vunpack.c.l.bf16 %v2345_v6  ;;  %v2156_v14 = vunpack.c.h.bf16 %v2345_v6  ;;  %v2255_v15 = vunpack.c.l.bf16 %v2370_v11  ;;  %v2256_v16 = vunpack.c.h.bf16 %v2370_v11  ;;  %v2347_v49 = vld [vmem:[%s2727_s25 + $0x18] sm:$0xff]   ;;  %v2372_v52 = vld [vmem:[%s2727_s25 + $0xe0] sm:$0xff]  }
  0x13   : > { %v405_v17 = vmul.f32 %v2151_v7, %v2732_v3  ;;  %v406_v18 = vmul.f32 %v2152_v8, %v2732_v3  ;;  %v455_v19 = vmul.f32 %v2251_v9, %v2732_v3  ;;  %v456_v20 = vmul.f32 %v2252_v10, %v2732_v3  ;;  %v2348_v11 = vld [vmem:[%s2727_s25 + $0x20] sm:$0xff]  }
  0x14   : > { %v407_v21 = vmul.f32 %v2155_v13, %v2732_v3  ;;  %v408_v22 = vmul.f32 %v2156_v14, %v2732_v3  ;;  %v457_v23 = vmul.f32 %v2255_v15, %v2732_v3  ;;  %v458_v24 = vmul.f32 %v2256_v16, %v2732_v3  ;;  %v2373_v13 = vld [vmem:[%s2727_s25 + $0xe8] sm:$0xff]  }
  0x15   : > { %v510_v25 = vadd.f32 %v2741_v12, %v405_v17  ;;  %v511_v26 = vadd.f32 %v2741_v12, %v406_v18  ;;  %v560_v27 = vadd.f32 %v2741_v12, %v455_v19  ;;  %v561_v28 = vadd.f32 %v2741_v12, %v456_v20 }
  0x16   : > { %v512_v29 = vadd.f32 %v2741_v12, %v407_v21  ;;  %v513_v30 = vadd.f32 %v2741_v12, %v408_v22  ;;  %v562_v31 = vadd.f32 %v2741_v12, %v457_v23  ;;  %v563_v32 = vadd.f32 %v2741_v12, %v458_v24 }
  0x17   : > { %v608_v34 = vmax.f32 %v510_v25, 0.0  ;;  %v609_v35 = vmax.f32 %v511_v26, 0.0  ;;  %v658_v36 = vmax.f32 %v560_v27, 0.0  ;;  %v659_v37 = vmax.f32 %v561_v28, 0.0  ;;  %v2349_v28 = vld [vmem:[%s2727_s25 + $0x28] sm:$0xff]  }
  0x18   : > { %v610_v39 = vmax.f32 %v512_v29, 0.0  ;;  %v611_v40 = vmax.f32 %v513_v30, 0.0  ;;  %v2159_v43 = vunpack.c.l.bf16 %v2346_v33  ;;  %v2160_v44 = vunpack.c.h.bf16 %v2346_v33  ;;  %v2374_v33 = vld [vmem:[%s2727_s25 + $0xf0] sm:$0xff]  }
  0x19   : > { %v706_v41 = vpack.c.bf16 %v609_v35, %v608_v34  ;;  %v731_v42 = vpack.c.bf16 %v659_v37, %v658_v36  ;;  %v660_v45 = vmax.f32 %v562_v31, 0.0  ;;  %v661_v46 = vmax.f32 %v563_v32, 0.0 }
  0x1a   : > { %v2259_v47 = vunpack.c.l.bf16 %v2371_v38  ;;  %v2260_v48 = vunpack.c.h.bf16 %v2371_v38  ;;  %v409_v50 = vmul.f32 %v2159_v43, %v2732_v3  ;;  %v410_v51 = vmul.f32 %v2160_v44, %v2732_v3 }
  0x1b   : > { %2449 = vmatmul.mubr.msk.bf16.vlgmr.msra.gmra.mrb[0].mxu0 %vm771_vm1, %v706_v41  ;;  %2549 = vmatmul.mubr.msk.bf16.vlgmr.msra.gmra.mrb[0].mxu1 %vm771_vm1, %v731_v42  ;;  %v2163_v55 = vunpack.c.l.bf16 %v2347_v49  ;;  %v2164_v56 = vunpack.c.h.bf16 %v2347_v49  ;;  %v707_v57 = vpack.c.bf16 %v611_v40, %v610_v39  ;;  %v732_v58 = vpack.c.bf16 %v661_v46, %v660_v45 }
  0x1c   : > { %2452 = vmatprep.mubr.msk.bf16.mxu0 %vm2671_vm0, %v2670_v1  ;;  %2552 = vmatprep.mubr.msk.bf16.mxu1 %vm2671_vm0, %v2670_v1  ;;  %v459_v53 = vmul.f32 %v2259_v47, %v2732_v3  ;;  %v460_v54 = vmul.f32 %v2260_v48, %v2732_v3  ;;  %v2263_v59 = vunpack.c.l.bf16 %v2372_v52  ;;  %v2264_v60 = vunpack.c.h.bf16 %v2372_v52  ;;  %v2350_v52 = vld [vmem:[%s2727_s25 + $0x30] sm:$0xff]  }
  0x1d   : > { %v514_v61 = vadd.f32 %v2741_v12, %v409_v50  ;;  %v515_v62 = vadd.f32 %v2741_v12, %v410_v51  ;;  %v411_v2 = vmul.f32 %v2163_v55, %v2732_v3  ;;  %v412_v4 = vmul.f32 %v2164_v56, %v2732_v3 }
  0x1e   : > { %v564_v63 = vadd.f32 %v2741_v12, %v459_v53  ;;  %v565_v0 = vadd.f32 %v2741_v12, %v460_v54  ;;  %v461_v5 = vmul.f32 %v2263_v59, %v2732_v3  ;;  %v462_v6 = vmul.f32 %v2264_v60, %v2732_v3  ;;  %v2375_v53 = vld [vmem:[%s2727_s25 + $0xf8] sm:$0xff]  }
  0x1f   : > { %v612_v7 = vmax.f32 %v514_v61, 0.0  ;;  %v613_v8 = vmax.f32 %v515_v62, 0.0  ;;  %v516_v14 = vadd.f32 %v2741_v12, %v411_v2  ;;  %v517_v15 = vadd.f32 %v2741_v12, %v412_v4 }
  0x20   : > { %v662_v9 = vmax.f32 %v564_v63, 0.0  ;;  %v663_v10 = vmax.f32 %v565_v0, 0.0  ;;  %v566_v16 = vadd.f32 %v2741_v12, %v461_v5  ;;  %v567_v17 = vadd.f32 %v2741_v12, %v462_v6  ;;  %v2351_v6 = vld [vmem:[%s2727_s25 + $0x38] sm:$0xff]  }
  0x21   : > { %v2167_v18 = vunpack.c.l.bf16 %v2348_v11  ;;  %v2168_v19 = vunpack.c.h.bf16 %v2348_v11  ;;  %v708_v20 = vpack.c.bf16 %v613_v8, %v612_v7  ;;  %v2267_v22 = vunpack.c.l.bf16 %v2373_v13  ;;  %v2376_v11 = vld [vmem:[%s2727_s25 + $0x100] sm:$0xff]  }
  0x22   : > { %v733_v21 = vpack.c.bf16 %v663_v10, %v662_v9  ;;  %v2268_v23 = vunpack.c.h.bf16 %v2373_v13  ;;  %v614_v24 = vmax.f32 %v516_v14, 0.0  ;;  %v615_v25 = vmax.f32 %v517_v15, 0.0 }
  0x23   : > { %2453 = vmatmul.mubr.msk.bf16.gmra.mrb[4].mxu0 %vm771_vm1, %v707_v57  ;;  %2553 = vmatmul.mubr.msk.bf16.gmra.mrb[4].mxu1 %vm771_vm1, %v732_v58  ;;  %v413_v26 = vmul.f32 %v2167_v18, %v2732_v3  ;;  %v414_v27 = vmul.f32 %v2168_v19, %v2732_v3  ;;  %v664_v29 = vmax.f32 %v566_v16, 0.0  ;;  %v665_v30 = vmax.f32 %v567_v17, 0.0 }
  0x24   : > { %2456 = vmatprep.mubr.msk.bf16.mxu0 %vm2671_vm0, %v2670_v1  ;;  %2556 = vmatprep.mubr.msk.bf16.mxu1 %vm2671_vm0, %v2670_v1  ;;  %v463_v31 = vmul.f32 %v2267_v22, %v2732_v3  ;;  %v464_v32 = vmul.f32 %v2268_v23, %v2732_v3  ;;  %v2171_v34 = vunpack.c.l.bf16 %v2349_v28  ;;  %v2172_v35 = vunpack.c.h.bf16 %v2349_v28 }
  0x25   : > { %v709_v36 = vpack.c.bf16 %v615_v25, %v614_v24  ;;  %v518_v37 = vadd.f32 %v2741_v12, %v413_v26  ;;  %v519_v38 = vadd.f32 %v2741_v12, %v414_v27  ;;  %v2271_v39 = vunpack.c.l.bf16 %v2374_v33 }
  0x26   : > { %v734_v40 = vpack.c.bf16 %v665_v30, %v664_v29  ;;  %v568_v41 = vadd.f32 %v2741_v12, %v463_v31  ;;  %v569_v42 = vadd.f32 %v2741_v12, %v464_v32  ;;  %v2272_v43 = vunpack.c.h.bf16 %v2374_v33  ;;  %v2352_v31 = vld [vmem:[%s2727_s25 + $0x40] sm:$0xff]   ;;  %v2377_v32 = vld [vmem:[%s2727_s25 + $0x108] sm:$0xff]  }
  0x27   : > { %v415_v44 = vmul.f32 %v2171_v34, %v2732_v3  ;;  %v416_v45 = vmul.f32 %v2172_v35, %v2732_v3  ;;  %v616_v46 = vmax.f32 %v518_v37, 0.0  ;;  %v617_v47 = vmax.f32 %v519_v38, 0.0 }
  0x28   : > { %v465_v48 = vmul.f32 %v2271_v39, %v2732_v3  ;;  %v666_v49 = vmax.f32 %v568_v41, 0.0  ;;  %v667_v50 = vmax.f32 %v569_v42, 0.0  ;;  %v466_v51 = vmul.f32 %v2272_v43, %v2732_v3 }
  0x29   : > { %v520_v54 = vadd.f32 %v2741_v12, %v415_v44  ;;  %v521_v55 = vadd.f32 %v2741_v12, %v416_v45  ;;  %v710_v56 = vpack.c.bf16 %v617_v47, %v616_v46  ;;  %v2175_v58 = vunpack.c.l.bf16 %v2350_v52  ;;  %v2353_v47 = vld [vmem:[%s2727_s25 + $0x48] sm:$0xff]  }
  0x2a   : > { %v570_v57 = vadd.f32 %v2741_v12, %v465_v48  ;;  %v2176_v59 = vunpack.c.h.bf16 %v2350_v52  ;;  %v735_v60 = vpack.c.bf16 %v667_v50, %v666_v49  ;;  %v571_v61 = vadd.f32 %v2741_v12, %v466_v51  ;;  %v2378_v52 = vld [vmem:[%s2727_s25 + $0x110] sm:$0xff]  }
  0x2b   : > { %2457 = vmatmul.mubr.msk.bf16.gmra.mrb[8].mxu0 %vm771_vm1, %v708_v20  ;;  %2557 = vmatmul.mubr.msk.bf16.gmra.mrb[8].mxu1 %vm771_vm1, %v733_v21  ;;  %v2275_v62 = vunpack.c.l.bf16 %v2375_v53  ;;  %v2276_v63 = vunpack.c.h.bf16 %v2375_v53  ;;  %v618_v0 = vmax.f32 %v520_v54, 0.0  ;;  %v619_v2 = vmax.f32 %v521_v55, 0.0 }
  0x2c   : > { %2460 = vmatprep.mubr.msk.bf16.mxu0 %vm2671_vm0, %v2670_v1  ;;  %2560 = vmatprep.mubr.msk.bf16.mxu1 %vm2671_vm0, %v2670_v1  ;;  %v417_v4 = vmul.f32 %v2175_v58, %v2732_v3  ;;  %v418_v5 = vmul.f32 %v2176_v59, %v2732_v3  ;;  %v668_v7 = vmax.f32 %v570_v57, 0.0  ;;  %v669_v8 = vmax.f32 %v571_v61, 0.0 }
  0x2d   : > { %v467_v9 = vmul.f32 %v2275_v62, %v2732_v3  ;;  %v468_v10 = vmul.f32 %v2276_v63, %v2732_v3  ;;  %v2179_v13 = vunpack.c.l.bf16 %v2351_v6  ;;  %v2180_v14 = vunpack.c.h.bf16 %v2351_v6 }
  0x2e   : > { %v711_v15 = vpack.c.bf16 %v619_v2, %v618_v0  ;;  %v522_v16 = vadd.f32 %v2741_v12, %v417_v4  ;;  %v523_v17 = vadd.f32 %v2741_v12, %v418_v5  ;;  %v2279_v18 = vunpack.c.l.bf16 %v2376_v11 }
  0x2f   : > { %v736_v19 = vpack.c.bf16 %v669_v8, %v668_v7  ;;  %v572_v20 = vadd.f32 %v2741_v12, %v467_v9  ;;  %v573_v21 = vadd.f32 %v2741_v12, %v468_v10  ;;  %v2280_v22 = vunpack.c.h.bf16 %v2376_v11  ;;  %v2354_v9 = vld [vmem:[%s2727_s25 + $0x50] sm:$0xff]   ;;  %v2379_v10 = vld [vmem:[%s2727_s25 + $0x118] sm:$0xff]  }
  0x30   : > { %v419_v23 = vmul.f32 %v2179_v13, %v2732_v3  ;;  %v420_v24 = vmul.f32 %v2180_v14, %v2732_v3  ;;  %v620_v25 = vmax.f32 %v522_v16, 0.0  ;;  %v621_v26 = vmax.f32 %v523_v17, 0.0 }
  0x31   : > { %v469_v27 = vmul.f32 %v2279_v18, %v2732_v3  ;;  %v670_v28 = vmax.f32 %v572_v20, 0.0  ;;  %v671_v29 = vmax.f32 %v573_v21, 0.0  ;;  %v470_v30 = vmul.f32 %v2280_v22, %v2732_v3 }
  0x32   : > { %v524_v33 = vadd.f32 %v2741_v12, %v419_v23  ;;  %v525_v34 = vadd.f32 %v2741_v12, %v420_v24  ;;  %v712_v35 = vpack.c.bf16 %v621_v26, %v620_v25  ;;  %v2183_v37 = vunpack.c.l.bf16 %v2352_v31  ;;  %v2355_v26 = vld [vmem:[%s2727_s25 + $0x58] sm:$0xff]  }
  0x33   : > { %2461 = vmatmul.mubr.msk.bf16.gmra.mrb[12].mxu0 %vm771_vm1, %v709_v36  ;;  %2561 = vmatmul.mubr.msk.bf16.gmra.mrb[12].mxu1 %vm771_vm1, %v734_v40  ;;  %v574_v36 = vadd.f32 %v2741_v12, %v469_v27  ;;  %v2184_v38 = vunpack.c.h.bf16 %v2352_v31  ;;  %v737_v39 = vpack.c.bf16 %v671_v29, %v670_v28  ;;  %v575_v40 = vadd.f32 %v2741_v12, %v470_v30  ;;  %v2380_v31 = vld [vmem:[%s2727_s25 + $0x120] sm:$0xff]  }
  0x34   : > { %2464 = vmatprep.mubr.msk.bf16.mxu0 %vm2671_vm0, %v2670_v1  ;;  %2564 = vmatprep.mubr.msk.bf16.mxu1 %vm2671_vm0, %v2670_v1  ;;  %v2283_v41 = vunpack.c.l.bf16 %v2377_v32  ;;  %v2284_v42 = vunpack.c.h.bf16 %v2377_v32  ;;  %v622_v43 = vmax.f32 %v524_v33, 0.0  ;;  %v623_v44 = vmax.f32 %v525_v34, 0.0 }
  0x35   : > { %v421_v45 = vmul.f32 %v2183_v37, %v2732_v3  ;;  %v422_v46 = vmul.f32 %v2184_v38, %v2732_v3  ;;  %v672_v48 = vmax.f32 %v574_v36, 0.0  ;;  %v673_v49 = vmax.f32 %v575_v40, 0.0 }
  0x36   : > { %v471_v50 = vmul.f32 %v2283_v41, %v2732_v3  ;;  %v472_v51 = vmul.f32 %v2284_v42, %v2732_v3  ;;  %v2187_v53 = vunpack.c.l.bf16 %v2353_v47  ;;  %v2188_v54 = vunpack.c.h.bf16 %v2353_v47  ;;  %v2356_v47 = vld [vmem:[%s2727_s25 + $0x60] sm:$0xff]  }
  0x37   : > { %v713_v55 = vpack.c.bf16 %v623_v44, %v622_v43  ;;  %v527_v57 = vadd.f32 %v2741_v12, %v422_v46  ;;  %v2287_v58 = vunpack.c.l.bf16 %v2378_v52  ;;  %v738_v59 = vpack.c.bf16 %v673_v49, %v672_v48 }
  0x38   : > { %v577_v61 = vadd.f32 %v2741_v12, %v472_v51  ;;  %v2288_v62 = vunpack.c.h.bf16 %v2378_v52  ;;  %v423_v63 = vmul.f32 %v2187_v53, %v2732_v3  ;;  %v424_v0 = vmul.f32 %v2188_v54, %v2732_v3  ;;  %v2381_v51 = vld [vmem:[%s2727_s25 + $0x128] sm:$0xff]  }
  0x39   : > { %v625_v4 = vmax.f32 %v527_v57, 0.0  ;;  %v473_v5 = vmul.f32 %v2287_v58, %v2732_v3  ;;  %v2191_v16 = vunpack.c.l.bf16 %v2354_v9  ;;  %v2192_v17 = vunpack.c.h.bf16 %v2354_v9  ;;  %v2382_v9 = vld [vmem:[%s2727_s25 + $0x130] sm:$0xff]  }
  0x3a   : > { %v675_v7 = vmax.f32 %v577_v61, 0.0  ;;  %v474_v8 = vmul.f32 %v2288_v62, %v2732_v3  ;;  %v528_v11 = vadd.f32 %v2741_v12, %v423_v63  ;;  %v529_v13 = vadd.f32 %v2741_v12, %v424_v0 }
  0x3b   : > { %2465 = vmatmul.mubr.msk.bf16.gmra.mrb[16].mxu0 %vm771_vm1, %v710_v56  ;;  %2565 = vmatmul.mubr.msk.bf16.gmra.mrb[16].mxu1 %vm771_vm1, %v735_v60  ;;  %v526_v56 = vadd.f32 %v2741_v12, %v421_v45  ;;  %v576_v60 = vadd.f32 %v2741_v12, %v471_v50  ;;  %v2291_v20 = vunpack.c.l.bf16 %v2379_v10  ;;  %v2292_v21 = vunpack.c.h.bf16 %v2379_v10 }
  0x3c   : > { %2468 = vmatprep.mubr.msk.bf16.mxu0 %vm2671_vm0, %v2670_v1  ;;  %2568 = vmatprep.mubr.msk.bf16.mxu1 %vm2671_vm0, %v2670_v1  ;;  %v626_v22 = vmax.f32 %v528_v11, 0.0  ;;  %v627_v23 = vmax.f32 %v529_v13, 0.0  ;;  %v425_v24 = vmul.f32 %v2191_v16, %v2732_v3  ;;  %v426_v25 = vmul.f32 %v2192_v17, %v2732_v3 }
  0x3d   : > { %v624_v2 = vmax.f32 %v526_v56, 0.0  ;;  %v674_v6 = vmax.f32 %v576_v60, 0.0  ;;  %v475_v29 = vmul.f32 %v2291_v20, %v2732_v3  ;;  %v476_v30 = vmul.f32 %v2292_v21, %v2732_v3 }
  0x3e   : > { %v715_v32 = vpack.c.bf16 %v627_v23, %v626_v22  ;;  %v2195_v33 = vunpack.c.l.bf16 %v2355_v26  ;;  %v530_v34 = vadd.f32 %v2741_v12, %v425_v24  ;;  %v2196_v36 = vunpack.c.h.bf16 %v2355_v26  ;;  %v2358_v26 = vld [vmem:[%s2727_s25 + $0x70] sm:$0xff]  }
  0x3f   : > { %v714_v14 = vpack.c.bf16 %v625_v4, %v624_v2  ;;  %v739_v18 = vpack.c.bf16 %v675_v7, %v674_v6  ;;  %v2295_v37 = vunpack.c.l.bf16 %v2380_v31  ;;  %v581_v40 = vadd.f32 %v2741_v12, %v476_v30  ;;  %v2357_v4 = vld [vmem:[%s2727_s25 + $0x68] sm:$0xff]   ;;  %v2383_v30 = vld [vmem:[%s2727_s25 + $0x138] sm:$0xff]  }
  0x40   : > { %v2296_v41 = vunpack.c.h.bf16 %v2380_v31  ;;  %v427_v42 = vmul.f32 %v2195_v33, %v2732_v3  ;;  %v628_v43 = vmax.f32 %v530_v34, 0.0  ;;  %v428_v45 = vmul.f32 %v2196_v36, %v2732_v3 }
  0x41   : > { %v477_v46 = vmul.f32 %v2295_v37, %v2732_v3  ;;  %v679_v49 = vmax.f32 %v581_v40, 0.0  ;;  %v2199_v53 = vunpack.c.l.bf16 %v2356_v47  ;;  %v2200_v57 = vunpack.c.h.bf16 %v2356_v47 }
  0x42   : > { %v478_v50 = vmul.f32 %v2296_v41, %v2732_v3  ;;  %v532_v52 = vadd.f32 %v2741_v12, %v427_v42  ;;  %v2299_v60 = vunpack.c.l.bf16 %v2381_v51  ;;  %v2300_v61 = vunpack.c.h.bf16 %v2381_v51 }
  0x43   : > { %2469 = vmatmul.mubr.msk.bf16.gmra.mrb[20].mxu0 %vm771_vm1, %v711_v15  ;;  %2569 = vmatmul.mubr.msk.bf16.gmra.mrb[20].mxu1 %vm771_vm1, %v736_v19  ;;  %v578_v15 = vadd.f32 %v2741_v12, %v473_v5  ;;  %v579_v19 = vadd.f32 %v2741_v12, %v474_v8  ;;  %v582_v56 = vadd.f32 %v2741_v12, %v477_v46  ;;  %v2203_v11 = vunpack.c.l.bf16 %v2357_v4 }
  0x44   : > { %2472 = vmatprep.mubr.msk.bf16.mxu0 %vm2671_vm0, %v2670_v1  ;;  %2572 = vmatprep.mubr.msk.bf16.mxu1 %vm2671_vm0, %v2670_v1  ;;  %v429_v62 = vmul.f32 %v2199_v53, %v2732_v3  ;;  %v630_v63 = vmax.f32 %v532_v52, 0.0  ;;  %v430_v2 = vmul.f32 %v2200_v57, %v2732_v3  ;;  %v479_v7 = vmul.f32 %v2299_v60, %v2732_v3 }
  0x45   : > { %v676_v27 = vmax.f32 %v578_v15, 0.0  ;;  %v677_v28 = vmax.f32 %v579_v19, 0.0  ;;  %v680_v5 = vmax.f32 %v582_v56, 0.0  ;;  %v480_v8 = vmul.f32 %v2300_v61, %v2732_v3 }
  0x46   : > { %v534_v10 = vadd.f32 %v2741_v12, %v429_v62  ;;  %v2204_v15 = vunpack.c.h.bf16 %v2357_v4  ;;  %v2303_v16 = vunpack.c.l.bf16 %v2382_v9  ;;  %v2304_v20 = vunpack.c.h.bf16 %v2382_v9  ;;  %v2360_v4 = vld [vmem:[%s2727_s25 + $0x80] sm:$0xff]  }
  0x47   : > { %v740_v38 = vpack.c.bf16 %v677_v28, %v676_v27  ;;  %v585_v19 = vadd.f32 %v2741_v12, %v480_v8  ;;  %v431_v21 = vmul.f32 %v2203_v11, %v2732_v3  ;;  %v2208_v36 = vunpack.c.h.bf16 %v2358_v26  ;;  %v2385_v8 = vld [vmem:[%s2727_s25 + $0x148] sm:$0xff]  }
  0x48   : > { %v632_v22 = vmax.f32 %v534_v10, 0.0  ;;  %v432_v24 = vmul.f32 %v2204_v15, %v2732_v3  ;;  %v2308_v40 = vunpack.c.h.bf16 %v2383_v30  ;;  %v2215_v10 = vunpack.c.l.bf16 %v2360_v4 }
  0x49   : > { %v683_v28 = vmax.f32 %v585_v19, 0.0  ;;  %v536_v31 = vadd.f32 %v2741_v12, %v431_v21  ;;  %v2216_v15 = vunpack.c.h.bf16 %v2360_v4  ;;  %v2316_v19 = vunpack.c.h.bf16 %v2385_v8 }
  0x4a   : > { %v537_v34 = vadd.f32 %v2741_v12, %v432_v24  ;;  %v2361_v24 = vld [vmem:[%s2727_s25 + $0x88] sm:$0xff]  }
  0x4b   : > { %2473 = vmatmul.mubr.msk.bf16.gmra.mrb[24].mxu0 %vm771_vm1, %v712_v35  ;;  %2573 = vmatmul.mubr.msk.bf16.gmra.mrb[24].mxu1 %vm771_vm1, %v737_v39  ;;  %v531_v35 = vadd.f32 %v2741_v12, %v426_v25  ;;  %v580_v39 = vadd.f32 %v2741_v12, %v475_v29  ;;  %v481_v25 = vmul.f32 %v2303_v16, %v2732_v3  ;;  %v634_v42 = vmax.f32 %v536_v31, 0.0 }
  0x4c   : > { %2476 = vmatprep.mubr.msk.bf16.mxu0 %vm2671_vm0, %v2670_v1  ;;  %2576 = vmatprep.mubr.msk.bf16.mxu1 %vm2671_vm0, %v2670_v1  ;;  %v482_v29 = vmul.f32 %v2304_v20, %v2732_v3  ;;  %v437_v20 = vmul.f32 %v2215_v10, %v2732_v3  ;;  %v2219_v31 = vunpack.c.l.bf16 %v2361_v24 }
  0x4d   : > { %v629_v44 = vmax.f32 %v531_v35, 0.0  ;;  %v678_v48 = vmax.f32 %v580_v39, 0.0  ;;  %v586_v35 = vadd.f32 %v2741_v12, %v481_v25  ;;  %v2307_v39 = vunpack.c.l.bf16 %v2383_v30 }
  0x4e   : > { %v542_v30 = vadd.f32 %v2741_v12, %v437_v20 }
  0x4f   : > { %v716_v54 = vpack.c.bf16 %v629_v44, %v628_v43  ;;  %v741_v58 = vpack.c.bf16 %v679_v49, %v678_v48  ;;  %v635_v43 = vmax.f32 %v537_v34, 0.0  ;;  %v434_v44 = vmul.f32 %v2208_v36, %v2732_v3 }
  0x50   : > { %v684_v46 = vmax.f32 %v586_v35, 0.0  ;;  %v483_v48 = vmul.f32 %v2307_v39, %v2732_v3  ;;  %v484_v49 = vmul.f32 %v2308_v40, %v2732_v3  ;;  %v2220_v34 = vunpack.c.h.bf16 %v2361_v24  ;;  %v2364_v24 = vld [vmem:[%s2727_s25 + $0xa0] sm:$0xff]  }
  0x51   : > { %v719_v53 = vpack.c.bf16 %v635_v43, %v634_v42  ;;  %v439_v40 = vmul.f32 %v2219_v31, %v2732_v3 }
  0x52   : > { %v440_v43 = vmul.f32 %v2220_v34, %v2732_v3  ;;  %v2232_v34 = vunpack.c.h.bf16 %v2364_v24 }
  0x53   : > { %2477 = vmatmul.mubr.msk.bf16.gmra.mrb[28].mxu0 %vm771_vm1, %v713_v55  ;;  %2577 = vmatmul.mubr.msk.bf16.gmra.mrb[28].mxu1 %vm771_vm1, %v738_v59  ;;  %v533_v55 = vadd.f32 %v2741_v12, %v428_v45  ;;  %v583_v59 = vadd.f32 %v2741_v12, %v478_v50  ;;  %v2359_v45 = vld [vmem:[%s2727_s25 + $0x78] sm:$0xff]   ;;  %v2384_v50 = vld [vmem:[%s2727_s25 + $0x140] sm:$0xff]  }
  0x54   : > { %2480 = vmatprep.mubr.msk.bf16.mxu0 %vm2671_vm0, %v2670_v1  ;;  %2580 = vmatprep.mubr.msk.bf16.mxu1 %vm2671_vm0, %v2670_v1  ;;  %v2211_v52 = vunpack.c.l.bf16 %v2359_v45  ;;  %v2311_v56 = vunpack.c.l.bf16 %v2384_v50  ;;  %v2312_v60 = vunpack.c.h.bf16 %v2384_v50  ;;  %v544_v50 = vadd.f32 %v2741_v12, %v439_v40 }
  0x55   : > { %v631_v0 = vmax.f32 %v533_v55, 0.0  ;;  %v681_v6 = vmax.f32 %v583_v59, 0.0  ;;  %v2212_v55 = vunpack.c.h.bf16 %v2359_v45  ;;  %v589_v59 = vadd.f32 %v2741_v12, %v484_v49  ;;  %v2362_v45 = vld [vmem:[%s2727_s25 + $0x90] sm:$0xff]   ;;  %v2387_v49 = vld [vmem:[%s2727_s25 + $0x158] sm:$0xff]  }
  0x56   : > { %v435_v61 = vmul.f32 %v2211_v52, %v2732_v3 }
  0x57   : > { %v717_v13 = vpack.c.bf16 %v631_v0, %v630_v63  ;;  %v742_v17 = vpack.c.bf16 %v681_v6, %v680_v5  ;;  %v436_v0 = vmul.f32 %v2212_v55, %v2732_v3  ;;  %v687_v6 = vmax.f32 %v589_v59, 0.0 }
  0x58   : > { %v540_v9 = vadd.f32 %v2741_v12, %v435_v61  ;;  %v2224_v55 = vunpack.c.h.bf16 %v2362_v45  ;;  %v2324_v59 = vunpack.c.h.bf16 %v2387_v49  ;;  %v642_v61 = vmax.f32 %v544_v50, 0.0 }
  0x5a   : > { %v638_v21 = vmax.f32 %v540_v9, 0.0 }
  0x5b   : > { %2481 = vmatmul.mubr.msk.bf16.gmra.mrb[32].mxu0 %vm771_vm1, %v714_v14  ;;  %2581 = vmatmul.mubr.msk.bf16.gmra.mrb[32].mxu1 %vm771_vm1, %v739_v18  ;;  %v535_v14 = vadd.f32 %v2741_v12, %v430_v2  ;;  %v584_v18 = vadd.f32 %v2741_v12, %v479_v7  ;;  %v485_v2 = vmul.f32 %v2311_v56, %v2732_v3 }
  0x5c   : > { %2484 = vmatprep.mubr.msk.bf16.mxu0 %vm2671_vm0, %v2670_v1  ;;  %2584 = vmatprep.mubr.msk.bf16.mxu1 %vm2671_vm0, %v2670_v1  ;;  %v486_v7 = vmul.f32 %v2312_v60, %v2732_v3 }
  0x5d   : > { %v633_v23 = vmax.f32 %v535_v14, 0.0  ;;  %v682_v27 = vmax.f32 %v584_v18, 0.0  ;;  %v590_v14 = vadd.f32 %v2741_v12, %v485_v2  ;;  %v2315_v18 = vunpack.c.l.bf16 %v2385_v8 }
  0x5f   : > { %v718_v33 = vpack.c.bf16 %v633_v23, %v632_v22  ;;  %v743_v37 = vpack.c.bf16 %v683_v28, %v682_v27  ;;  %v438_v23 = vmul.f32 %v2216_v15, %v2732_v3  ;;  %v688_v25 = vmax.f32 %v590_v14, 0.0 }
  0x60   : > { %v487_v27 = vmul.f32 %v2315_v18, %v2732_v3  ;;  %v488_v28 = vmul.f32 %v2316_v19, %v2732_v3 }
  0x63   : > { %2485 = vmatmul.mubr.msk.bf16.gmra.mrb[36].mxu0 %vm771_vm1, %v715_v32  ;;  %2585 = vmatmul.mubr.msk.bf16.gmra.mrb[36].mxu1 %vm771_vm1, %v740_v38  ;;  %v2207_v32 = vunpack.c.l.bf16 %v2358_v26  ;;  %v587_v38 = vadd.f32 %v2741_v12, %v482_v29  ;;  %v2386_v29 = vld [vmem:[%s2727_s25 + $0x150] sm:$0xff]  }
  0x64   : > { %2488 = vmatprep.mubr.msk.bf16.mxu0 %vm2671_vm0, %v2670_v1  ;;  %2588 = vmatprep.mubr.msk.bf16.mxu1 %vm2671_vm0, %v2670_v1  ;;  %v2319_v35 = vunpack.c.l.bf16 %v2386_v29  ;;  %v2320_v39 = vunpack.c.h.bf16 %v2386_v29 }
  0x65   : > { %v433_v41 = vmul.f32 %v2207_v32, %v2732_v3  ;;  %v685_v47 = vmax.f32 %v587_v38, 0.0  ;;  %v593_v38 = vadd.f32 %v2741_v12, %v488_v28  ;;  %v2389_v28 = vld [vmem:[%s2727_s25 + $0x168] sm:$0xff]  }
  0x67   : > { %v538_v51 = vadd.f32 %v2741_v12, %v433_v41  ;;  %v744_v57 = vpack.c.bf16 %v685_v47, %v684_v46  ;;  %v640_v41 = vmax.f32 %v542_v30, 0.0  ;;  %v691_v47 = vmax.f32 %v593_v38, 0.0 }
  0x68   : > { %v2231_v30 = vunpack.c.l.bf16 %v2364_v24  ;;  %v2332_v38 = vunpack.c.h.bf16 %v2389_v28 }
  0x69   : > { %v636_v62 = vmax.f32 %v538_v51, 0.0  ;;  %v2223_v51 = vunpack.c.l.bf16 %v2362_v45  ;;  %v446_v45 = vmul.f32 %v2232_v34, %v2732_v3 }
  0x6b   : > { %2489 = vmatmul.mubr.msk.bf16.gmra.mrb[40].mxu0 %vm771_vm1, %v716_v54  ;;  %2589 = vmatmul.mubr.msk.bf16.gmra.mrb[40].mxu1 %vm771_vm1, %v741_v58  ;;  %v539_v54 = vadd.f32 %v2741_v12, %v434_v44  ;;  %v588_v58 = vadd.f32 %v2741_v12, %v483_v48  ;;  %v489_v44 = vmul.f32 %v2319_v35, %v2732_v3 }
  0x6c   : > { %2492 = vmatprep.mubr.msk.bf16.mxu0 %vm2671_vm0, %v2670_v1  ;;  %2592 = vmatprep.mubr.msk.bf16.mxu1 %vm2671_vm0, %v2670_v1  ;;  %v490_v48 = vmul.f32 %v2320_v39, %v2732_v3  ;;  %v441_v60 = vmul.f32 %v2223_v51, %v2732_v3 }
  0x6d   : > { %v637_v63 = vmax.f32 %v539_v54, 0.0  ;;  %v686_v5 = vmax.f32 %v588_v58, 0.0  ;;  %v594_v54 = vadd.f32 %v2741_v12, %v489_v44  ;;  %v2323_v58 = vunpack.c.l.bf16 %v2387_v49 }
  0x6e   : > { %v546_v8 = vadd.f32 %v2741_v12, %v441_v60 }
  0x6f   : > { %v720_v11 = vpack.c.bf16 %v637_v63, %v636_v62  ;;  %v745_v16 = vpack.c.bf16 %v687_v6, %v686_v5  ;;  %v442_v63 = vmul.f32 %v2224_v55, %v2732_v3  ;;  %v692_v2 = vmax.f32 %v594_v54, 0.0 }
  0x70   : > { %v491_v5 = vmul.f32 %v2323_v58, %v2732_v3  ;;  %v492_v6 = vmul.f32 %v2324_v59, %v2732_v3  ;;  %v644_v20 = vmax.f32 %v546_v8, 0.0 }
  0x73   : > { %2493 = vmatmul.mubr.msk.bf16.gmra.mrb[44].mxu0 %vm771_vm1, %v717_v13  ;;  %2593 = vmatmul.mubr.msk.bf16.gmra.mrb[44].mxu1 %vm771_vm1, %v742_v17  ;;  %v541_v13 = vadd.f32 %v2741_v12, %v436_v0  ;;  %v591_v17 = vadd.f32 %v2741_v12, %v486_v7  ;;  %v2363_v0 = vld [vmem:[%s2727_s25 + $0x98] sm:$0xff]   ;;  %v2388_v7 = vld [vmem:[%s2727_s25 + $0x160] sm:$0xff]  }
  0x74   : > { %2496 = vmatprep.mubr.msk.bf16.mxu0 %vm2671_vm0, %v2670_v1  ;;  %2596 = vmatprep.mubr.msk.bf16.mxu1 %vm2671_vm0, %v2670_v1  ;;  %v2227_v9 = vunpack.c.l.bf16 %v2363_v0  ;;  %v2327_v14 = vunpack.c.l.bf16 %v2388_v7  ;;  %v2328_v18 = vunpack.c.h.bf16 %v2388_v7 }
  0x75   : > { %v639_v22 = vmax.f32 %v541_v13, 0.0  ;;  %v689_v26 = vmax.f32 %v591_v17, 0.0  ;;  %v2228_v13 = vunpack.c.h.bf16 %v2363_v0  ;;  %v597_v17 = vadd.f32 %v2741_v12, %v492_v6  ;;  %v2391_v6 = vld [vmem:[%s2727_s25 + $0x178] sm:$0xff]  }
  0x76   : > { %v443_v19 = vmul.f32 %v2227_v9, %v2732_v3 }
  0x77   : > { %v721_v32 = vpack.c.bf16 %v639_v22, %v638_v21  ;;  %v746_v36 = vpack.c.bf16 %v689_v26, %v688_v25  ;;  %v444_v22 = vmul.f32 %v2228_v13, %v2732_v3  ;;  %v695_v26 = vmax.f32 %v597_v17, 0.0 }
  0x78   : > { %v548_v29 = vadd.f32 %v2741_v12, %v443_v19  ;;  %v2660_v19 = vld [vmem:[%s3320_s1] ss:$0 sm:$0xff] }
  0x7a   : > { %v646_v39 = vmax.f32 %v548_v29, 0.0 }
  0x7b   : > { %2497 = vmatmul.mubr.msk.bf16.gmra.mrb[48].mxu0 %vm771_vm1, %v718_v33  ;;  %2597 = vmatmul.mubr.msk.bf16.gmra.mrb[48].mxu1 %vm771_vm1, %v743_v37  ;;  %v543_v33 = vadd.f32 %v2741_v12, %v438_v23  ;;  %v592_v37 = vadd.f32 %v2741_v12, %v487_v27  ;;  %v493_v23 = vmul.f32 %v2327_v14, %v2732_v3 }
  0x7c   : > { %2500 = vmatprep.mubr.msk.bf16.mxu0 %vm2671_vm0, %v2670_v1  ;;  %2600 = vmatprep.mubr.msk.bf16.mxu1 %vm2671_vm0, %v2670_v1  ;;  %v494_v27 = vmul.f32 %v2328_v18, %v2732_v3 }
  0x7d   : > { %v641_v42 = vmax.f32 %v543_v33, 0.0  ;;  %v690_v46 = vmax.f32 %v592_v37, 0.0  ;;  %v598_v33 = vadd.f32 %v2741_v12, %v493_v23  ;;  %v2331_v37 = vunpack.c.l.bf16 %v2389_v28  ;;  %v2661_v28 = vld [vmem:[%s3321_s2] ss:$0 sm:$0xff] }
  0x7f   : > { %v722_v52 = vpack.c.bf16 %v641_v42, %v640_v41  ;;  %v747_v56 = vpack.c.bf16 %v691_v47, %v690_v46  ;;  %v696_v41 = vmax.f32 %v598_v33, 0.0  ;;  %v445_v42 = vmul.f32 %v2231_v30, %v2732_v3 }
  0x80   : > { %v495_v46 = vmul.f32 %v2331_v37, %v2732_v3  ;;  %v496_v47 = vmul.f32 %v2332_v38, %v2732_v3 }
  0x82   : > { %v601_v58 = vadd.f32 %v2741_v12, %v496_v47 }
  0x83   : > { %2501 = vmatmul.mubr.msk.bf16.gmra.mrb[52].mxu0 %vm771_vm1, %v719_v53  ;;  %2601 = vmatmul.mubr.msk.bf16.gmra.mrb[52].mxu1 %vm771_vm1, %v744_v57  ;;  %v545_v53 = vadd.f32 %v2741_v12, %v440_v43  ;;  %v595_v57 = vadd.f32 %v2741_v12, %v490_v48  ;;  %v2365_v43 = vld [vmem:[%s2727_s25 + $0xa8] sm:$0xff]   ;;  %v2390_v48 = vld [vmem:[%s2727_s25 + $0x170] sm:$0xff]  }
  0x84   : > { %2504 = vmatprep.mubr.msk.bf16.mxu0 %vm2671_vm0, %v2670_v1  ;;  %2604 = vmatprep.mubr.msk.bf16.mxu1 %vm2671_vm0, %v2670_v1  ;;  %v2235_v49 = vunpack.c.l.bf16 %v2365_v43  ;;  %v2236_v50 = vunpack.c.h.bf16 %v2365_v43  ;;  %v2336_v54 = vunpack.c.h.bf16 %v2390_v48 }
  0x85   : > { %v643_v62 = vmax.f32 %v545_v53, 0.0  ;;  %v693_v4 = vmax.f32 %v595_v57, 0.0  ;;  %v2335_v53 = vunpack.c.l.bf16 %v2390_v48  ;;  %v600_v57 = vadd.f32 %v2741_v12, %v495_v46  ;;  %v2368_v46 = vld [vmem:[%s2727_s25 + $0xc0] sm:$0xff]  }
  0x86   : > { %v447_v59 = vmul.f32 %v2235_v49, %v2732_v3  ;;  %v448_v60 = vmul.f32 %v2236_v50, %v2732_v3  ;;  %v2247_v50 = vunpack.c.l.bf16 %v2368_v46 }
  0x87   : > { %v723_v10 = vpack.c.bf16 %v643_v62, %v642_v61  ;;  %v748_v15 = vpack.c.bf16 %v693_v4, %v692_v2  ;;  %v497_v61 = vmul.f32 %v2335_v53, %v2732_v3  ;;  %v498_v62 = vmul.f32 %v2336_v54, %v2732_v3 }
  0x88   : > { %v698_v4 = vmax.f32 %v600_v57, 0.0  ;;  %v552_v7 = vadd.f32 %v2741_v12, %v447_v59  ;;  %v553_v3 = vadd.f32 %v2741_v12, %v448_v60  ;;  %v2248_v54 = vunpack.c.h.bf16 %v2368_v46 }
  0x89   : > { %v602_v9 = vadd.f32 %v2741_v12, %v497_v61 }
  0x8a   : > { %v650_v17 = vmax.f32 %v552_v7, 0.0  ;;  %v651_v18 = vmax.f32 %v553_v3, 0.0  ;;  %v454_v60 = vmul.f32 %v2660_v19, %v2248_v54 }
  0x8b   : > { %2505 = vmatmul.mubr.msk.bf16.gmra.mrb[56].mxu0 %vm771_vm1, %v720_v11  ;;  %2605 = vmatmul.mubr.msk.bf16.gmra.mrb[56].mxu1 %vm771_vm1, %v745_v16  ;;  %v547_v11 = vadd.f32 %v2741_v12, %v442_v63  ;;  %v596_v16 = vadd.f32 %v2741_v12, %v491_v5  ;;  %v2366_v63 = vld [vmem:[%s2727_s25 + $0xb0] sm:$0xff]   ;;  %v699_v5 = vmax.f32 %v601_v58, 0.0 }
  0x8c   : > { %2508 = vmatprep.mubr.msk.bf16.mxu0 %vm2671_vm0, %v2670_v1  ;;  %2608 = vmatprep.mubr.msk.bf16.mxu1 %vm2671_vm0, %v2670_v1  ;;  %v2239_v8 = vunpack.c.l.bf16 %v2366_v63 }
  0x8d   : > { %v645_v21 = vmax.f32 %v547_v11, 0.0  ;;  %v694_v25 = vmax.f32 %v596_v16, 0.0  ;;  %v2240_v11 = vunpack.c.h.bf16 %v2366_v63  ;;  %v751_v14 = vpack.c.bf16 %v699_v5, %v698_v4 }
  0x8e   : > { %v2340_v16 = vunpack.c.h.bf16 %v2391_v6 }
  0x8f   : > { %v724_v31 = vpack.c.bf16 %v645_v21, %v644_v20  ;;  %v749_v35 = vpack.c.bf16 %v695_v26, %v694_v25  ;;  %v449_v20 = vmul.f32 %v2660_v19, %v2239_v8  ;;  %v700_v21 = vmax.f32 %v602_v9, 0.0  ;;  %v2367_v25 = vld [vmem:[%s2727_s25 + $0xb8] sm:$0xff]   ;;  %v2392_v26 = vld [vmem:[%s2727_s25 + $0x180] sm:$0xff]  }
  0x90   : > { %v450_v23 = vmul.f32 %v2660_v19, %v2240_v11  ;;  %v500_v24 = vmul.f32 %v2660_v19, %v2340_v16  ;;  %v2244_v33 = vunpack.c.h.bf16 %v2367_v25  ;;  %v2344_v37 = vunpack.c.h.bf16 %v2392_v26 }
  0x91   : > { %v554_v29 = vadd.f32 %v2661_v28, %v449_v20 }
  0x93   : > { %2509 = vmatmul.mubr.msk.bf16.gmra.mrb[60].mxu0 %vm771_vm1, %v721_v32  ;;  %2609 = vmatmul.mubr.msk.bf16.gmra.mrb[60].mxu1 %vm771_vm1, %v746_v36  ;;  %v549_v32 = vadd.f32 %v2741_v12, %v444_v22  ;;  %v599_v36 = vadd.f32 %v2741_v12, %v494_v27  ;;  %v727_v27 = vpack.c.bf16 %v651_v18, %v650_v17  ;;  %v652_v38 = vmax.f32 %v554_v29, 0.0 }
  0x94   : > { %2512 = vmatprep.mubr.msk.bf16.mxu0 %vm2671_vm0, %v2670_v1  ;;  %2612 = vmatprep.mubr.msk.bf16.mxu1 %vm2671_vm0, %v2670_v1 }
  0x95   : > { %v647_v40 = vmax.f32 %v549_v32, 0.0  ;;  %v697_v44 = vmax.f32 %v599_v36, 0.0  ;;  %v2243_v32 = vunpack.c.l.bf16 %v2367_v25  ;;  %v2343_v36 = vunpack.c.l.bf16 %v2392_v26 }
  0x97   : > { %v725_v51 = vpack.c.bf16 %v647_v40, %v646_v39  ;;  %v750_v55 = vpack.c.bf16 %v697_v44, %v696_v41  ;;  %v451_v40 = vmul.f32 %v2660_v19, %v2243_v32  ;;  %v452_v41 = vmul.f32 %v2660_v19, %v2244_v33 }
  0x98   : > { %v501_v44 = vmul.f32 %v2660_v19, %v2343_v36 }
  0x99   : > { %v556_v48 = vadd.f32 %v2661_v28, %v451_v40  ;;  %v557_v49 = vadd.f32 %v2661_v28, %v452_v41 }
  0x9b   : > { %2513 = vmatmul.mubr.msk.bf16.gmra.mrb[64].mxu0 %vm771_vm1, %v722_v52  ;;  %2613 = vmatmul.mubr.msk.bf16.gmra.mrb[64].mxu1 %vm771_vm1, %v747_v56  ;;  %v550_v52 = vadd.f32 %v2741_v12, %v445_v42  ;;  %v551_v56 = vadd.f32 %v2741_v12, %v446_v45  ;;  %v502_v45 = vmul.f32 %v2660_v19, %v2344_v37  ;;  %v655_v57 = vmax.f32 %v557_v49, 0.0 }
  0x9c   : > { %2516 = vmatprep.mubr.msk.bf16.mxu0 %vm2671_vm0, %v2670_v1  ;;  %2616 = vmatprep.mubr.msk.bf16.mxu1 %vm2671_vm0, %v2670_v1 }
  0x9d   : > { %v648_v0 = vmax.f32 %v550_v52, 0.0  ;;  %v649_v2 = vmax.f32 %v551_v56, 0.0  ;;  %v606_v52 = vadd.f32 %v2661_v28, %v501_v44  ;;  %v607_v53 = vadd.f32 %v2661_v28, %v502_v45 }
  0x9e   : > { %v453_v56 = vmul.f32 %v2660_v19, %v2247_v50 }
  0x9f   : > { %v726_v13 = vpack.c.bf16 %v649_v2, %v648_v0  ;;  %v704_v58 = vmax.f32 %v606_v52, 0.0  ;;  %v705_v59 = vmax.f32 %v607_v53, 0.0  ;;  %v559_v0 = vadd.f32 %v2661_v28, %v454_v60 }
  0xa0   : > { %v558_v63 = vadd.f32 %v2661_v28, %v453_v56 }
  0xa1   : > { %v657_v4 = vmax.f32 %v559_v0, 0.0 }
  0xa2   : > { %v656_v2 = vmax.f32 %v558_v63, 0.0 }
  0xa3   : > { %2517 = vmatmul.mubr.msk.bf16.gmra.mrb[68].mxu0 %vm771_vm1, %v723_v10  ;;  %2617 = vmatmul.mubr.msk.bf16.gmra.mrb[68].mxu1 %vm771_vm1, %v748_v15  ;;  %v603_v10 = vadd.f32 %v2741_v12, %v498_v62  ;;  %v2339_v15 = vunpack.c.l.bf16 %v2391_v6  ;;  %v754_v62 = vpack.c.bf16 %v705_v59, %v704_v58 }
  0xa4   : > { %2520 = vmatprep.mubr.msk.bf16.mxu0 %vm2671_vm0, %v2670_v1  ;;  %2620 = vmatprep.mubr.msk.bf16.mxu1 %vm2671_vm0, %v2670_v1  ;;  %v730_v5 = vpack.c.bf16 %v657_v4, %v656_v2 }
  0xa5   : > { %v701_v22 = vmax.f32 %v603_v10, 0.0  ;;  %v499_v12 = vmul.f32 %v2660_v19, %v2339_v15 }
  0xa7   : > { %v752_v30 = vpack.c.bf16 %v701_v22, %v700_v21  ;;  %v604_v34 = vadd.f32 %v2661_v28, %v499_v12 }
  0xa9   : > { %v702_v42 = vmax.f32 %v604_v34, 0.0 }
  0xab   : > { %2521 = vmatmul.mubr.msk.bf16.gmra.mrb[72].mxu0 %vm771_vm1, %v724_v31  ;;  %2621 = vmatmul.mubr.msk.bf16.gmra.mrb[72].mxu1 %vm771_vm1, %v749_v35  ;;  %v555_v31 = vadd.f32 %v2661_v28, %v450_v23  ;;  %v605_v35 = vadd.f32 %v2661_v28, %v500_v24 }
  0xac   : > { %2524 = vmatprep.mubr.msk.bf16.mxu0 %vm2671_vm0, %v2670_v1  ;;  %2624 = vmatprep.mubr.msk.bf16.mxu1 %vm2671_vm0, %v2670_v1 }
  0xad   : > { %v653_v39 = vmax.f32 %v555_v31, 0.0  ;;  %v703_v43 = vmax.f32 %v605_v35, 0.0 }
  0xaf   : > { %v728_v47 = vpack.c.bf16 %v653_v39, %v652_v38 }
  0xb3   : > { %2525 = vmatmul.mubr.msk.bf16.gmra.mrb[76].mxu0 %vm771_vm1, %v725_v51  ;;  %2625 = vmatmul.mubr.msk.bf16.gmra.mrb[76].mxu1 %vm771_vm1, %v750_v55  ;;  %v753_v51 = vpack.c.bf16 %v703_v43, %v702_v42  ;;  %v654_v55 = vmax.f32 %v556_v48, 0.0 }
  0xb4   : > { %2528 = vmatprep.mubr.msk.bf16.mxu0 %vm2671_vm0, %v2670_v1  ;;  %2628 = vmatprep.mubr.msk.bf16.mxu1 %vm2671_vm0, %v2670_v1 }
  0xb5   : > { %v729_v61 = vpack.c.bf16 %v655_v57, %v654_v55 }
  0xbb   : > { %2529 = vmatmul.mubr.msk.bf16.gmra.mrb[80].mxu0 %vm771_vm1, %v726_v13  ;;  %2629 = vmatmul.mubr.msk.bf16.gmra.mrb[80].mxu1 %vm771_vm1, %v751_v14 }
  0xbc   : > { %2532 = vmatprep.mubr.msk.bf16.mxu0 %vm2671_vm0, %v2670_v1  ;;  %2632 = vmatprep.mubr.msk.bf16.mxu1 %vm2671_vm0, %v2670_v1 }
  0xc3   : > { %2533 = vmatmul.mubr.msk.bf16.gmra.mrb[84].mxu0 %vm771_vm1, %v727_v27  ;;  %2633 = vmatmul.mubr.msk.bf16.gmra.mrb[84].mxu1 %vm771_vm1, %v752_v30 }
  0xc4   : > { %2536 = vmatprep.mubr.msk.bf16.mxu0 %vm2671_vm0, %v2670_v1  ;;  %2636 = vmatprep.mubr.msk.bf16.mxu1 %vm2671_vm0, %v2670_v1 }
  0xcb   : > { %2537 = vmatmul.mubr.msk.bf16.gmra.mrb[88].mxu0 %vm771_vm1, %v728_v47  ;;  %2637 = vmatmul.mubr.msk.bf16.gmra.mrb[88].mxu1 %vm771_vm1, %v753_v51 }
  0xcc   : > { %2540 = vmatprep.mubr.msk.bf16.mxu0 %vm2671_vm0, %v2670_v1  ;;  %2640 = vmatprep.mubr.msk.bf16.mxu1 %vm2671_vm0, %v2670_v1 }
  0xd3   : > { %2541 = vmatmul.mubr.msk.bf16.gmra.mrb[92].mxu0 %vm771_vm1, %v729_v61  ;;  %2641 = vmatmul.mubr.msk.bf16.gmra.mrb[92].mxu1 %vm771_vm1, %v754_v62 }
  0xd4   : > { %2544 = vmatprep.mubr.msk.bf16.mxu0 %vm2671_vm0, %v2670_v1 }
  0xdb   : > { %2545 = vmatmul.mubr.msk.bf16.gmra.mrb[96].mxu0 %vm771_vm1, %v730_v5 }
  0xee   : > { %v953_v6 = vpop.f32.mrb[0].mxu0  ;;  %v1153_v7 = vpop.f32.mrb[0].mxu1 }
  0xef   : > { %v2051_v3 = vpack.c.bf16 %v953_v6, %v953_v6  ;;  %v2450_v8 = vpop.f32.mrb[1].mxu0  ;;  %v2101_v9 = vpack.c.bf16 %v1153_v7, %v1153_v7  ;;  %v2550_v1 = vpop.f32.mrb[1].mxu1 }
  0xf0   : > { %v956_v10 = vpop.f32.mrb[2].mxu0  ;;  %v1156_v11 = vpop.f32.mrb[2].mxu1 }
  0xf1   : > { %1737 = vst.msk [vmem:[%s3118_s10] sm:$0xf] %vm1736_vm2, %v2051_v3  ;;  %v2052_v13 = vpack.c.bf16 %v956_v10, %v956_v10  ;;  %v2451_v14 = vpop.f32.mrb[3].mxu0  ;;  %1787 = vst.msk [vmem:[%s3118_s10 + $0xc8] sm:$0xf] %vm1736_vm2, %v2101_v9  ;;  %v2102_v15 = vpack.c.bf16 %v1156_v11, %v1156_v11  ;;  %v2551_v16 = vpop.f32.mrb[3].mxu1 }
  0xf3   : > { %1738 = vst.msk [vmem:[%s3118_s10 + $0x4] sm:$0xf] %vm1736_vm2, %v2052_v13  ;;  %1788 = vst.msk [vmem:[%s3118_s10 + $0xcc] sm:$0xf] %vm1736_vm2, %v2102_v15 }
  0xf6   : > { %v961_v17 = vpop.f32.mrb[4].mxu0  ;;  %v1161_v18 = vpop.f32.mrb[4].mxu1 }
  0xf7   : > { %v2053_v19 = vpack.c.bf16 %v961_v17, %v961_v17  ;;  %v2454_v20 = vpop.f32.mrb[5].mxu0  ;;  %v2103_v21 = vpack.c.bf16 %v1161_v18, %v1161_v18  ;;  %v2554_v22 = vpop.f32.mrb[5].mxu1 }
  0xf8   : > { %v964_v23 = vpop.f32.mrb[6].mxu0  ;;  %v1164_v12 = vpop.f32.mrb[6].mxu1 }
  0xf9   : > { %1739 = vst.msk [vmem:[%s3118_s10 + $0x8] sm:$0xf] %vm1736_vm2, %v2053_v19  ;;  %v2054_v24 = vpack.c.bf16 %v964_v23, %v964_v23  ;;  %v2455_v25 = vpop.f32.mrb[7].mxu0  ;;  %1789 = vst.msk [vmem:[%s3118_s10 + $0xd0] sm:$0xf] %vm1736_vm2, %v2103_v21  ;;  %v2104_v26 = vpack.c.bf16 %v1164_v12, %v1164_v12  ;;  %v2555_v27 = vpop.f32.mrb[7].mxu1 }
  0xfb   : > { %1740 = vst.msk [vmem:[%s3118_s10 + $0xc] sm:$0xf] %vm1736_vm2, %v2054_v24  ;;  %1790 = vst.msk [vmem:[%s3118_s10 + $0xd4] sm:$0xf] %vm1736_vm2, %v2104_v26 }
  0xfe   : > { %v969_v28 = vpop.f32.mrb[8].mxu0  ;;  %v1169_v29 = vpop.f32.mrb[8].mxu1 }
  0xff   : > { %v2055_v30 = vpack.c.bf16 %v969_v28, %v969_v28  ;;  %v2458_v31 = vpop.f32.mrb[9].mxu0  ;;  %v2105_v32 = vpack.c.bf16 %v1169_v29, %v1169_v29  ;;  %v2558_v33 = vpop.f32.mrb[9].mxu1 }
 0x100   : > { %v972_v34 = vpop.f32.mrb[10].mxu0  ;;  %v1172_v35 = vpop.f32.mrb[10].mxu1 }
 0x101   : > { %1741 = vst.msk [vmem:[%s3118_s10 + $0x10] sm:$0xf] %vm1736_vm2, %v2055_v30  ;;  %v2056_v36 = vpack.c.bf16 %v972_v34, %v972_v34  ;;  %v2459_v37 = vpop.f32.mrb[11].mxu0  ;;  %1791 = vst.msk [vmem:[%s3118_s10 + $0xd8] sm:$0xf] %vm1736_vm2, %v2105_v32  ;;  %v2106_v38 = vpack.c.bf16 %v1172_v35, %v1172_v35  ;;  %v2559_v39 = vpop.f32.mrb[11].mxu1 }
 0x103   : > { %1742 = vst.msk [vmem:[%s3118_s10 + $0x14] sm:$0xf] %vm1736_vm2, %v2056_v36  ;;  %1792 = vst.msk [vmem:[%s3118_s10 + $0xdc] sm:$0xf] %vm1736_vm2, %v2106_v38 }
 0x106   : > { %v977_v40 = vpop.f32.mrb[12].mxu0  ;;  %v1177_v41 = vpop.f32.mrb[12].mxu1 }
 0x107   : > { %v2057_v42 = vpack.c.bf16 %v977_v40, %v977_v40  ;;  %v2462_v43 = vpop.f32.mrb[13].mxu0  ;;  %v2107_v44 = vpack.c.bf16 %v1177_v41, %v1177_v41  ;;  %v2562_v45 = vpop.f32.mrb[13].mxu1 }
 0x108   : > { %v980_v46 = vpop.f32.mrb[14].mxu0  ;;  %v1180_v47 = vpop.f32.mrb[14].mxu1 }
 0x109   : > { %1743 = vst.msk [vmem:[%s3118_s10 + $0x18] sm:$0xf] %vm1736_vm2, %v2057_v42  ;;  %v2058_v48 = vpack.c.bf16 %v980_v46, %v980_v46  ;;  %v2463_v49 = vpop.f32.mrb[15].mxu0  ;;  %1793 = vst.msk [vmem:[%s3118_s10 + $0xe0] sm:$0xf] %vm1736_vm2, %v2107_v44  ;;  %v2108_v50 = vpack.c.bf16 %v1180_v47, %v1180_v47  ;;  %v2563_v51 = vpop.f32.mrb[15].mxu1 }
 0x10b   : > { %1744 = vst.msk [vmem:[%s3118_s10 + $0x1c] sm:$0xf] %vm1736_vm2, %v2058_v48  ;;  %1794 = vst.msk [vmem:[%s3118_s10 + $0xe4] sm:$0xf] %vm1736_vm2, %v2108_v50 }
 0x10e   : > { %v985_v52 = vpop.f32.mrb[16].mxu0  ;;  %v1185_v53 = vpop.f32.mrb[16].mxu1 }
 0x10f   : > { %v2059_v54 = vpack.c.bf16 %v985_v52, %v985_v52  ;;  %v2466_v55 = vpop.f32.mrb[17].mxu0  ;;  %v2109_v56 = vpack.c.bf16 %v1185_v53, %v1185_v53  ;;  %v2566_v57 = vpop.f32.mrb[17].mxu1 }
 0x110   : > { %v988_v58 = vpop.f32.mrb[18].mxu0  ;;  %v1188_v59 = vpop.f32.mrb[18].mxu1 }
 0x111   : > { %1745 = vst.msk [vmem:[%s3118_s10 + $0x20] sm:$0xf] %vm1736_vm2, %v2059_v54  ;;  %v2060_v60 = vpack.c.bf16 %v988_v58, %v988_v58  ;;  %v2467_v61 = vpop.f32.mrb[19].mxu0  ;;  %1795 = vst.msk [vmem:[%s3118_s10 + $0xe8] sm:$0xf] %vm1736_vm2, %v2109_v56  ;;  %v2110_v62 = vpack.c.bf16 %v1188_v59, %v1188_v59  ;;  %v2567_v63 = vpop.f32.mrb[19].mxu1 }
 0x113   : > { %1746 = vst.msk [vmem:[%s3118_s10 + $0x24] sm:$0xf] %vm1736_vm2, %v2060_v60  ;;  %1796 = vst.msk [vmem:[%s3118_s10 + $0xec] sm:$0xf] %vm1736_vm2, %v2110_v62 }
 0x116   : > { %v993_v0 = vpop.f32.mrb[20].mxu0  ;;  %v1193_v2 = vpop.f32.mrb[20].mxu1 }
 0x117   : > { %v2061_v4 = vpack.c.bf16 %v993_v0, %v993_v0  ;;  %v2470_v5 = vpop.f32.mrb[21].mxu0  ;;  %v2111_v6 = vpack.c.bf16 %v1193_v2, %v1193_v2  ;;  %v2570_v7 = vpop.f32.mrb[21].mxu1 }
 0x118   : > { %v996_v3 = vpop.f32.mrb[22].mxu0  ;;  %v1196_v8 = vpop.f32.mrb[22].mxu1 }
 0x119   : > { %1747 = vst.msk [vmem:[%s3118_s10 + $0x28] sm:$0xf] %vm1736_vm2, %v2061_v4  ;;  %v2062_v9 = vpack.c.bf16 %v996_v3, %v996_v3  ;;  %v2471_v1 = vpop.f32.mrb[23].mxu0  ;;  %1797 = vst.msk [vmem:[%s3118_s10 + $0xf0] sm:$0xf] %vm1736_vm2, %v2111_v6  ;;  %v2112_v10 = vpack.c.bf16 %v1196_v8, %v1196_v8  ;;  %v2571_v11 = vpop.f32.mrb[23].mxu1 }
 0x11b   : > { %1748 = vst.msk [vmem:[%s3118_s10 + $0x2c] sm:$0xf] %vm1736_vm2, %v2062_v9  ;;  %1798 = vst.msk [vmem:[%s3118_s10 + $0xf4] sm:$0xf] %vm1736_vm2, %v2112_v10 }
 0x11e   : > { %v1001_v13 = vpop.f32.mrb[24].mxu0  ;;  %v1201_v14 = vpop.f32.mrb[24].mxu1 }
 0x11f   : > { %v2063_v15 = vpack.c.bf16 %v1001_v13, %v1001_v13  ;;  %v2474_v16 = vpop.f32.mrb[25].mxu0  ;;  %v2113_v17 = vpack.c.bf16 %v1201_v14, %v1201_v14  ;;  %v2574_v18 = vpop.f32.mrb[25].mxu1 }
 0x120   : > { %v1004_v19 = vpop.f32.mrb[26].mxu0  ;;  %v1204_v20 = vpop.f32.mrb[26].mxu1 }
 0x121   : > { %1749 = vst.msk [vmem:[%s3118_s10 + $0x30] sm:$0xf] %vm1736_vm2, %v2063_v15  ;;  %v2064_v21 = vpack.c.bf16 %v1004_v19, %v1004_v19  ;;  %v2475_v22 = vpop.f32.mrb[27].mxu0  ;;  %1799 = vst.msk [vmem:[%s3118_s10 + $0xf8] sm:$0xf] %vm1736_vm2, %v2113_v17  ;;  %v2114_v23 = vpack.c.bf16 %v1204_v20, %v1204_v20  ;;  %v2575_v12 = vpop.f32.mrb[27].mxu1 }
 0x123   : > { %1750 = vst.msk [vmem:[%s3118_s10 + $0x34] sm:$0xf] %vm1736_vm2, %v2064_v21  ;;  %1800 = vst.msk [vmem:[%s3118_s10 + $0xfc] sm:$0xf] %vm1736_vm2, %v2114_v23 }
 0x126   : > { %v1009_v24 = vpop.f32.mrb[28].mxu0  ;;  %v1209_v25 = vpop.f32.mrb[28].mxu1 }
 0x127   : > { %v2065_v26 = vpack.c.bf16 %v1009_v24, %v1009_v24  ;;  %v2478_v27 = vpop.f32.mrb[29].mxu0  ;;  %v2115_v28 = vpack.c.bf16 %v1209_v25, %v1209_v25  ;;  %v2578_v29 = vpop.f32.mrb[29].mxu1 }
 0x128   : > { %v1012_v30 = vpop.f32.mrb[30].mxu0  ;;  %v1212_v31 = vpop.f32.mrb[30].mxu1 }
 0x129   : > { %1751 = vst.msk [vmem:[%s3118_s10 + $0x38] sm:$0xf] %vm1736_vm2, %v2065_v26  ;;  %v2066_v32 = vpack.c.bf16 %v1012_v30, %v1012_v30  ;;  %v2479_v33 = vpop.f32.mrb[31].mxu0  ;;  %1801 = vst.msk [vmem:[%s3118_s10 + $0x100] sm:$0xf] %vm1736_vm2, %v2115_v28  ;;  %v2116_v34 = vpack.c.bf16 %v1212_v31, %v1212_v31  ;;  %v2579_v35 = vpop.f32.mrb[31].mxu1 }
 0x12b   : > { %1752 = vst.msk [vmem:[%s3118_s10 + $0x3c] sm:$0xf] %vm1736_vm2, %v2066_v32  ;;  %1802 = vst.msk [vmem:[%s3118_s10 + $0x104] sm:$0xf] %vm1736_vm2, %v2116_v34 }
 0x12e   : > { %v1017_v36 = vpop.f32.mrb[32].mxu0  ;;  %v1217_v37 = vpop.f32.mrb[32].mxu1 }
 0x12f   : > { %v2067_v38 = vpack.c.bf16 %v1017_v36, %v1017_v36  ;;  %v2482_v39 = vpop.f32.mrb[33].mxu0  ;;  %v2117_v40 = vpack.c.bf16 %v1217_v37, %v1217_v37  ;;  %v2582_v41 = vpop.f32.mrb[33].mxu1 }
 0x130   : > { %v1020_v42 = vpop.f32.mrb[34].mxu0  ;;  %v1220_v43 = vpop.f32.mrb[34].mxu1 }
 0x131   : > { %1753 = vst.msk [vmem:[%s3118_s10 + $0x40] sm:$0xf] %vm1736_vm2, %v2067_v38  ;;  %v2068_v44 = vpack.c.bf16 %v1020_v42, %v1020_v42  ;;  %v2483_v45 = vpop.f32.mrb[35].mxu0  ;;  %1803 = vst.msk [vmem:[%s3118_s10 + $0x108] sm:$0xf] %vm1736_vm2, %v2117_v40  ;;  %v2118_v46 = vpack.c.bf16 %v1220_v43, %v1220_v43  ;;  %v2583_v47 = vpop.f32.mrb[35].mxu1 }
 0x133   : > { %1754 = vst.msk [vmem:[%s3118_s10 + $0x44] sm:$0xf] %vm1736_vm2, %v2068_v44  ;;  %1804 = vst.msk [vmem:[%s3118_s10 + $0x10c] sm:$0xf] %vm1736_vm2, %v2118_v46 }
 0x136   : > { %v1025_v48 = vpop.f32.mrb[36].mxu0  ;;  %v1225_v49 = vpop.f32.mrb[36].mxu1 }
 0x137   : > { %v2069_v50 = vpack.c.bf16 %v1025_v48, %v1025_v48  ;;  %v2486_v51 = vpop.f32.mrb[37].mxu0  ;;  %v2119_v52 = vpack.c.bf16 %v1225_v49, %v1225_v49  ;;  %v2586_v53 = vpop.f32.mrb[37].mxu1 }
 0x138   : > { %v1028_v54 = vpop.f32.mrb[38].mxu0  ;;  %v1228_v55 = vpop.f32.mrb[38].mxu1 }
 0x139   : > { %1755 = vst.msk [vmem:[%s3118_s10 + $0x48] sm:$0xf] %vm1736_vm2, %v2069_v50  ;;  %v2070_v56 = vpack.c.bf16 %v1028_v54, %v1028_v54  ;;  %v2487_v57 = vpop.f32.mrb[39].mxu0  ;;  %1805 = vst.msk [vmem:[%s3118_s10 + $0x110] sm:$0xf] %vm1736_vm2, %v2119_v52  ;;  %v2120_v58 = vpack.c.bf16 %v1228_v55, %v1228_v55  ;;  %v2587_v59 = vpop.f32.mrb[39].mxu1 }
 0x13b   : > { %1756 = vst.msk [vmem:[%s3118_s10 + $0x4c] sm:$0xf] %vm1736_vm2, %v2070_v56  ;;  %1806 = vst.msk [vmem:[%s3118_s10 + $0x114] sm:$0xf] %vm1736_vm2, %v2120_v58 }
 0x13e   : > { %v1033_v60 = vpop.f32.mrb[40].mxu0  ;;  %v1233_v61 = vpop.f32.mrb[40].mxu1 }
 0x13f   : > { %v2071_v62 = vpack.c.bf16 %v1033_v60, %v1033_v60  ;;  %v2490_v63 = vpop.f32.mrb[41].mxu0  ;;  %v2121_v0 = vpack.c.bf16 %v1233_v61, %v1233_v61  ;;  %v2590_v2 = vpop.f32.mrb[41].mxu1 }
 0x140   : > { %v1036_v4 = vpop.f32.mrb[42].mxu0  ;;  %v1236_v5 = vpop.f32.mrb[42].mxu1 }
 0x141   : > { %1757 = vst.msk [vmem:[%s3118_s10 + $0x50] sm:$0xf] %vm1736_vm2, %v2071_v62  ;;  %v2072_v6 = vpack.c.bf16 %v1036_v4, %v1036_v4  ;;  %v2491_v7 = vpop.f32.mrb[43].mxu0  ;;  %1807 = vst.msk [vmem:[%s3118_s10 + $0x118] sm:$0xf] %vm1736_vm2, %v2121_v0  ;;  %v2122_v3 = vpack.c.bf16 %v1236_v5, %v1236_v5  ;;  %v2591_v8 = vpop.f32.mrb[43].mxu1 }
 0x143   : > { %1758 = vst.msk [vmem:[%s3118_s10 + $0x54] sm:$0xf] %vm1736_vm2, %v2072_v6  ;;  %1808 = vst.msk [vmem:[%s3118_s10 + $0x11c] sm:$0xf] %vm1736_vm2, %v2122_v3 }
 0x146   : > { %v1041_v9 = vpop.f32.mrb[44].mxu0  ;;  %v1241_v1 = vpop.f32.mrb[44].mxu1 }
 0x147   : > { %v2073_v10 = vpack.c.bf16 %v1041_v9, %v1041_v9  ;;  %v2494_v11 = vpop.f32.mrb[45].mxu0  ;;  %v2123_v13 = vpack.c.bf16 %v1241_v1, %v1241_v1  ;;  %v2594_v14 = vpop.f32.mrb[45].mxu1 }
 0x148   : > { %v1044_v15 = vpop.f32.mrb[46].mxu0  ;;  %v1244_v16 = vpop.f32.mrb[46].mxu1 }
 0x149   : > { %1759 = vst.msk [vmem:[%s3118_s10 + $0x58] sm:$0xf] %vm1736_vm2, %v2073_v10  ;;  %v2074_v17 = vpack.c.bf16 %v1044_v15, %v1044_v15  ;;  %v2495_v18 = vpop.f32.mrb[47].mxu0  ;;  %1809 = vst.msk [vmem:[%s3118_s10 + $0x120] sm:$0xf] %vm1736_vm2, %v2123_v13  ;;  %v2124_v19 = vpack.c.bf16 %v1244_v16, %v1244_v16  ;;  %v2595_v20 = vpop.f32.mrb[47].mxu1 }
 0x14b   : > { %1760 = vst.msk [vmem:[%s3118_s10 + $0x5c] sm:$0xf] %vm1736_vm2, %v2074_v17  ;;  %1810 = vst.msk [vmem:[%s3118_s10 + $0x124] sm:$0xf] %vm1736_vm2, %v2124_v19 }
 0x14e   : > { %v1049_v21 = vpop.f32.mrb[48].mxu0  ;;  %v1249_v22 = vpop.f32.mrb[48].mxu1 }
 0x14f   : > { %v2075_v23 = vpack.c.bf16 %v1049_v21, %v1049_v21  ;;  %v2498_v12 = vpop.f32.mrb[49].mxu0  ;;  %v2125_v24 = vpack.c.bf16 %v1249_v22, %v1249_v22  ;;  %v2598_v25 = vpop.f32.mrb[49].mxu1 }
 0x150   : > { %v1052_v26 = vpop.f32.mrb[50].mxu0  ;;  %v1252_v27 = vpop.f32.mrb[50].mxu1 }
 0x151   : > { %1761 = vst.msk [vmem:[%s3118_s10 + $0x60] sm:$0xf] %vm1736_vm2, %v2075_v23  ;;  %v2076_v28 = vpack.c.bf16 %v1052_v26, %v1052_v26  ;;  %v2499_v29 = vpop.f32.mrb[51].mxu0  ;;  %1811 = vst.msk [vmem:[%s3118_s10 + $0x128] sm:$0xf] %vm1736_vm2, %v2125_v24  ;;  %v2126_v30 = vpack.c.bf16 %v1252_v27, %v1252_v27  ;;  %v2599_v31 = vpop.f32.mrb[51].mxu1 }
 0x153   : > { %1762 = vst.msk [vmem:[%s3118_s10 + $0x64] sm:$0xf] %vm1736_vm2, %v2076_v28  ;;  %1812 = vst.msk [vmem:[%s3118_s10 + $0x12c] sm:$0xf] %vm1736_vm2, %v2126_v30 }
 0x156   : > { %v1057_v32 = vpop.f32.mrb[52].mxu0  ;;  %v1257_v33 = vpop.f32.mrb[52].mxu1 }
 0x157   : > { %v2077_v34 = vpack.c.bf16 %v1057_v32, %v1057_v32  ;;  %v2502_v35 = vpop.f32.mrb[53].mxu0  ;;  %v2127_v36 = vpack.c.bf16 %v1257_v33, %v1257_v33  ;;  %v2602_v37 = vpop.f32.mrb[53].mxu1 }
 0x158   : > { %v1060_v38 = vpop.f32.mrb[54].mxu0  ;;  %v1260_v39 = vpop.f32.mrb[54].mxu1 }
 0x159   : > { %1763 = vst.msk [vmem:[%s3118_s10 + $0x68] sm:$0xf] %vm1736_vm2, %v2077_v34  ;;  %v2078_v40 = vpack.c.bf16 %v1060_v38, %v1060_v38  ;;  %v2503_v41 = vpop.f32.mrb[55].mxu0  ;;  %1813 = vst.msk [vmem:[%s3118_s10 + $0x130] sm:$0xf] %vm1736_vm2, %v2127_v36  ;;  %v2128_v42 = vpack.c.bf16 %v1260_v39, %v1260_v39  ;;  %v2603_v43 = vpop.f32.mrb[55].mxu1 }
 0x15b   : > { %1764 = vst.msk [vmem:[%s3118_s10 + $0x6c] sm:$0xf] %vm1736_vm2, %v2078_v40  ;;  %1814 = vst.msk [vmem:[%s3118_s10 + $0x134] sm:$0xf] %vm1736_vm2, %v2128_v42 }
 0x15e   : > { %v1065_v44 = vpop.f32.mrb[56].mxu0  ;;  %v1265_v45 = vpop.f32.mrb[56].mxu1 }
 0x15f   : > { %v2079_v46 = vpack.c.bf16 %v1065_v44, %v1065_v44  ;;  %v2506_v47 = vpop.f32.mrb[57].mxu0  ;;  %v2129_v48 = vpack.c.bf16 %v1265_v45, %v1265_v45  ;;  %v2606_v49 = vpop.f32.mrb[57].mxu1 }
 0x160   : > { %v1068_v50 = vpop.f32.mrb[58].mxu0  ;;  %v1268_v51 = vpop.f32.mrb[58].mxu1 }
 0x161   : > { %1765 = vst.msk [vmem:[%s3118_s10 + $0x70] sm:$0xf] %vm1736_vm2, %v2079_v46  ;;  %v2080_v52 = vpack.c.bf16 %v1068_v50, %v1068_v50  ;;  %v2507_v53 = vpop.f32.mrb[59].mxu0  ;;  %1815 = vst.msk [vmem:[%s3118_s10 + $0x138] sm:$0xf] %vm1736_vm2, %v2129_v48  ;;  %v2130_v54 = vpack.c.bf16 %v1268_v51, %v1268_v51  ;;  %v2607_v55 = vpop.f32.mrb[59].mxu1 }
 0x163   : > { %1766 = vst.msk [vmem:[%s3118_s10 + $0x74] sm:$0xf] %vm1736_vm2, %v2080_v52  ;;  %1816 = vst.msk [vmem:[%s3118_s10 + $0x13c] sm:$0xf] %vm1736_vm2, %v2130_v54 }
 0x166   : > { %v1073_v56 = vpop.f32.mrb[60].mxu0  ;;  %v1273_v57 = vpop.f32.mrb[60].mxu1 }
 0x167   : > { %v2081_v58 = vpack.c.bf16 %v1073_v56, %v1073_v56  ;;  %v2510_v59 = vpop.f32.mrb[61].mxu0  ;;  %v2131_v60 = vpack.c.bf16 %v1273_v57, %v1273_v57  ;;  %v2610_v61 = vpop.f32.mrb[61].mxu1 }
 0x168   : > { %v1076_v62 = vpop.f32.mrb[62].mxu0  ;;  %v1276_v63 = vpop.f32.mrb[62].mxu1 }
 0x169   : > { %1767 = vst.msk [vmem:[%s3118_s10 + $0x78] sm:$0xf] %vm1736_vm2, %v2081_v58  ;;  %v2082_v0 = vpack.c.bf16 %v1076_v62, %v1076_v62  ;;  %v2511_v2 = vpop.f32.mrb[63].mxu0  ;;  %1817 = vst.msk [vmem:[%s3118_s10 + $0x140] sm:$0xf] %vm1736_vm2, %v2131_v60  ;;  %v2132_v4 = vpack.c.bf16 %v1276_v63, %v1276_v63  ;;  %v2611_v5 = vpop.f32.mrb[63].mxu1 }
 0x16b   : > { %1768 = vst.msk [vmem:[%s3118_s10 + $0x7c] sm:$0xf] %vm1736_vm2, %v2082_v0  ;;  %1818 = vst.msk [vmem:[%s3118_s10 + $0x144] sm:$0xf] %vm1736_vm2, %v2132_v4 }
 0x16e   : > { %v1081_v6 = vpop.f32.mrb[64].mxu0  ;;  %v1281_v7 = vpop.f32.mrb[64].mxu1 }
 0x16f   : > { %v2083_v3 = vpack.c.bf16 %v1081_v6, %v1081_v6  ;;  %v2514_v8 = vpop.f32.mrb[65].mxu0  ;;  %v2133_v9 = vpack.c.bf16 %v1281_v7, %v1281_v7  ;;  %v2614_v1 = vpop.f32.mrb[65].mxu1 }
 0x170   : > { %v1084_v10 = vpop.f32.mrb[66].mxu0  ;;  %v1284_v11 = vpop.f32.mrb[66].mxu1 }
 0x171   : > { %1769 = vst.msk [vmem:[%s3118_s10 + $0x80] sm:$0xf] %vm1736_vm2, %v2083_v3  ;;  %v2084_v13 = vpack.c.bf16 %v1084_v10, %v1084_v10  ;;  %v2515_v14 = vpop.f32.mrb[67].mxu0  ;;  %1819 = vst.msk [vmem:[%s3118_s10 + $0x148] sm:$0xf] %vm1736_vm2, %v2133_v9  ;;  %v2134_v15 = vpack.c.bf16 %v1284_v11, %v1284_v11  ;;  %v2615_v16 = vpop.f32.mrb[67].mxu1 }
 0x173   : > { %1770 = vst.msk [vmem:[%s3118_s10 + $0x84] sm:$0xf] %vm1736_vm2, %v2084_v13  ;;  %1820 = vst.msk [vmem:[%s3118_s10 + $0x14c] sm:$0xf] %vm1736_vm2, %v2134_v15 }
 0x176   : > { %v1089_v17 = vpop.f32.mrb[68].mxu0  ;;  %v1289_v18 = vpop.f32.mrb[68].mxu1 }
 0x177   : > { %v2085_v19 = vpack.c.bf16 %v1089_v17, %v1089_v17  ;;  %v2518_v20 = vpop.f32.mrb[69].mxu0  ;;  %v2135_v21 = vpack.c.bf16 %v1289_v18, %v1289_v18  ;;  %v2618_v22 = vpop.f32.mrb[69].mxu1 }
 0x178   : > { %v1092_v23 = vpop.f32.mrb[70].mxu0  ;;  %v1292_v12 = vpop.f32.mrb[70].mxu1 }
 0x179   : > { %1771 = vst.msk [vmem:[%s3118_s10 + $0x88] sm:$0xf] %vm1736_vm2, %v2085_v19  ;;  %v2086_v24 = vpack.c.bf16 %v1092_v23, %v1092_v23  ;;  %v2519_v25 = vpop.f32.mrb[71].mxu0  ;;  %1821 = vst.msk [vmem:[%s3118_s10 + $0x150] sm:$0xf] %vm1736_vm2, %v2135_v21  ;;  %v2136_v26 = vpack.c.bf16 %v1292_v12, %v1292_v12  ;;  %v2619_v27 = vpop.f32.mrb[71].mxu1 }
 0x17b   : > { %1772 = vst.msk [vmem:[%s3118_s10 + $0x8c] sm:$0xf] %vm1736_vm2, %v2086_v24  ;;  %1822 = vst.msk [vmem:[%s3118_s10 + $0x154] sm:$0xf] %vm1736_vm2, %v2136_v26 }
 0x17e   : > { %v1097_v28 = vpop.f32.mrb[72].mxu0  ;;  %v1297_v29 = vpop.f32.mrb[72].mxu1 }
 0x17f   : > { %v2087_v30 = vpack.c.bf16 %v1097_v28, %v1097_v28  ;;  %v2522_v31 = vpop.f32.mrb[73].mxu0  ;;  %v2137_v32 = vpack.c.bf16 %v1297_v29, %v1297_v29  ;;  %v2622_v33 = vpop.f32.mrb[73].mxu1 }
 0x180   : > { %v1100_v34 = vpop.f32.mrb[74].mxu0  ;;  %v1300_v35 = vpop.f32.mrb[74].mxu1 }
 0x181   : > { %1773 = vst.msk [vmem:[%s3118_s10 + $0x90] sm:$0xf] %vm1736_vm2, %v2087_v30  ;;  %v2088_v36 = vpack.c.bf16 %v1100_v34, %v1100_v34  ;;  %v2523_v37 = vpop.f32.mrb[75].mxu0  ;;  %1823 = vst.msk [vmem:[%s3118_s10 + $0x158] sm:$0xf] %vm1736_vm2, %v2137_v32  ;;  %v2138_v38 = vpack.c.bf16 %v1300_v35, %v1300_v35  ;;  %v2623_v39 = vpop.f32.mrb[75].mxu1 }
 0x183   : > { %1774 = vst.msk [vmem:[%s3118_s10 + $0x94] sm:$0xf] %vm1736_vm2, %v2088_v36  ;;  %1824 = vst.msk [vmem:[%s3118_s10 + $0x15c] sm:$0xf] %vm1736_vm2, %v2138_v38 }
 0x186   : > { %v1105_v40 = vpop.f32.mrb[76].mxu0  ;;  %v1305_v41 = vpop.f32.mrb[76].mxu1 }
 0x187   : > { %v2089_v42 = vpack.c.bf16 %v1105_v40, %v1105_v40  ;;  %v2526_v43 = vpop.f32.mrb[77].mxu0  ;;  %v2139_v44 = vpack.c.bf16 %v1305_v41, %v1305_v41  ;;  %v2626_v45 = vpop.f32.mrb[77].mxu1 }
 0x188   : > { %v1108_v46 = vpop.f32.mrb[78].mxu0  ;;  %v1308_v47 = vpop.f32.mrb[78].mxu1 }
 0x189   : > { %1775 = vst.msk [vmem:[%s3118_s10 + $0x98] sm:$0xf] %vm1736_vm2, %v2089_v42  ;;  %v2090_v48 = vpack.c.bf16 %v1108_v46, %v1108_v46  ;;  %v2527_v49 = vpop.f32.mrb[79].mxu0  ;;  %1825 = vst.msk [vmem:[%s3118_s10 + $0x160] sm:$0xf] %vm1736_vm2, %v2139_v44  ;;  %v2140_v50 = vpack.c.bf16 %v1308_v47, %v1308_v47  ;;  %v2627_v51 = vpop.f32.mrb[79].mxu1 }
 0x18b   : > { %1776 = vst.msk [vmem:[%s3118_s10 + $0x9c] sm:$0xf] %vm1736_vm2, %v2090_v48  ;;  %1826 = vst.msk [vmem:[%s3118_s10 + $0x164] sm:$0xf] %vm1736_vm2, %v2140_v50 }
 0x18e   : > { %v1113_v52 = vpop.f32.mrb[80].mxu0  ;;  %v1313_v53 = vpop.f32.mrb[80].mxu1 }
 0x18f   : > { %v2091_v54 = vpack.c.bf16 %v1113_v52, %v1113_v52  ;;  %v2530_v55 = vpop.f32.mrb[81].mxu0  ;;  %v2141_v56 = vpack.c.bf16 %v1313_v53, %v1313_v53  ;;  %v2630_v57 = vpop.f32.mrb[81].mxu1 }
 0x190   : > { %v1116_v58 = vpop.f32.mrb[82].mxu0  ;;  %v1316_v59 = vpop.f32.mrb[82].mxu1 }
 0x191   : > { %1777 = vst.msk [vmem:[%s3118_s10 + $0xa0] sm:$0xf] %vm1736_vm2, %v2091_v54  ;;  %v2092_v60 = vpack.c.bf16 %v1116_v58, %v1116_v58  ;;  %v2531_v61 = vpop.f32.mrb[83].mxu0  ;;  %1827 = vst.msk [vmem:[%s3118_s10 + $0x168] sm:$0xf] %vm1736_vm2, %v2141_v56  ;;  %v2142_v62 = vpack.c.bf16 %v1316_v59, %v1316_v59  ;;  %v2631_v63 = vpop.f32.mrb[83].mxu1 }
 0x193   : > { %1778 = vst.msk [vmem:[%s3118_s10 + $0xa4] sm:$0xf] %vm1736_vm2, %v2092_v60  ;;  %1828 = vst.msk [vmem:[%s3118_s10 + $0x16c] sm:$0xf] %vm1736_vm2, %v2142_v62 }
 0x196   : > { %v1121_v0 = vpop.f32.mrb[84].mxu0  ;;  %v1321_v2 = vpop.f32.mrb[84].mxu1 }
 0x197   : > { %v2093_v4 = vpack.c.bf16 %v1121_v0, %v1121_v0  ;;  %v2534_v5 = vpop.f32.mrb[85].mxu0  ;;  %v2143_v6 = vpack.c.bf16 %v1321_v2, %v1321_v2  ;;  %v2634_v7 = vpop.f32.mrb[85].mxu1 }
 0x198   : > { %v1124_v3 = vpop.f32.mrb[86].mxu0  ;;  %v1324_v8 = vpop.f32.mrb[86].mxu1 }
 0x199   : > { %1779 = vst.msk [vmem:[%s3118_s10 + $0xa8] sm:$0xf] %vm1736_vm2, %v2093_v4  ;;  %v2094_v9 = vpack.c.bf16 %v1124_v3, %v1124_v3  ;;  %v2535_v1 = vpop.f32.mrb[87].mxu0  ;;  %1829 = vst.msk [vmem:[%s3118_s10 + $0x170] sm:$0xf] %vm1736_vm2, %v2143_v6  ;;  %v2144_v10 = vpack.c.bf16 %v1324_v8, %v1324_v8  ;;  %v2635_v11 = vpop.f32.mrb[87].mxu1 }
 0x19b   : > { %1780 = vst.msk [vmem:[%s3118_s10 + $0xac] sm:$0xf] %vm1736_vm2, %v2094_v9  ;;  %1830 = vst.msk [vmem:[%s3118_s10 + $0x174] sm:$0xf] %vm1736_vm2, %v2144_v10 }
 0x19e   : > { %v1129_v13 = vpop.f32.mrb[88].mxu0  ;;  %v1329_v14 = vpop.f32.mrb[88].mxu1 }
 0x19f   : > { %v2095_v15 = vpack.c.bf16 %v1129_v13, %v1129_v13  ;;  %v2538_v16 = vpop.f32.mrb[89].mxu0  ;;  %v2145_v17 = vpack.c.bf16 %v1329_v14, %v1329_v14  ;;  %v2638_v18 = vpop.f32.mrb[89].mxu1 }
 0x1a0   : > { %v1132_v19 = vpop.f32.mrb[90].mxu0  ;;  %v1332_v20 = vpop.f32.mrb[90].mxu1 }
 0x1a1   : > { %1781 = vst.msk [vmem:[%s3118_s10 + $0xb0] sm:$0xf] %vm1736_vm2, %v2095_v15  ;;  %v2096_v21 = vpack.c.bf16 %v1132_v19, %v1132_v19  ;;  %v2539_v22 = vpop.f32.mrb[91].mxu0  ;;  %1831 = vst.msk [vmem:[%s3118_s10 + $0x178] sm:$0xf] %vm1736_vm2, %v2145_v17  ;;  %v2146_v23 = vpack.c.bf16 %v1332_v20, %v1332_v20  ;;  %v2639_v12 = vpop.f32.mrb[91].mxu1 }
 0x1a3   : > { %1782 = vst.msk [vmem:[%s3118_s10 + $0xb4] sm:$0xf] %vm1736_vm2, %v2096_v21  ;;  %1832 = vst.msk [vmem:[%s3118_s10 + $0x17c] sm:$0xf] %vm1736_vm2, %v2146_v23 }
 0x1a6   : > { %v1137_v24 = vpop.f32.mrb[92].mxu0  ;;  %v1337_v25 = vpop.f32.mrb[92].mxu1 }
 0x1a7   : > { %v2097_v26 = vpack.c.bf16 %v1137_v24, %v1137_v24  ;;  %v2542_v27 = vpop.f32.mrb[93].mxu0  ;;  %v2147_v28 = vpack.c.bf16 %v1337_v25, %v1337_v25  ;;  %v2642_v29 = vpop.f32.mrb[93].mxu1 }
 0x1a8   : > { %v1140_v30 = vpop.f32.mrb[94].mxu0  ;;  %v1340_v31 = vpop.f32.mrb[94].mxu1 }
 0x1a9   : > { %1783 = vst.msk [vmem:[%s3118_s10 + $0xb8] sm:$0xf] %vm1736_vm2, %v2097_v26  ;;  %v2098_v32 = vpack.c.bf16 %v1140_v30, %v1140_v30  ;;  %v2543_v33 = vpop.f32.mrb[95].mxu0  ;;  %1833 = vst.msk [vmem:[%s3118_s10 + $0x180] sm:$0xf] %vm1736_vm2, %v2147_v28  ;;  %v2148_v34 = vpack.c.bf16 %v1340_v31, %v1340_v31  ;;  %v2643_v35 = vpop.f32.mrb[95].mxu1 }
 0x1ab   : > { %1784 = vst.msk [vmem:[%s3118_s10 + $0xbc] sm:$0xf] %vm1736_vm2, %v2098_v32  ;;  %1834 = vst.msk [vmem:[%s3118_s10 + $0x184] sm:$0xf] %vm1736_vm2, %v2148_v34 }
 0x1ae   : > { %v1145_v36 = vpop.f32.mrb[96].mxu0 }
 0x1af   : > { %v2099_v37 = vpack.c.bf16 %v1145_v36, %v1145_v36  ;;  %v2546_v38 = vpop.f32.mrb[97].mxu0 }
 0x1b0   : > { %v1148_v39 = vpop.f32.mrb[98].mxu0 }
 0x1b1   : > { %1785 = vst.msk [vmem:[%s3118_s10 + $0xc0] sm:$0xf] %vm1736_vm2, %v2099_v37  ;;  %v2100_v40 = vpack.c.bf16 %v1148_v39, %v1148_v39  ;;  %v2547_v41 = vpop.f32.mrb[99].mxu0 }
 0x1b3   : > { %1786 = vst.msk [vmem:[%s3118_s10 + $0xc4] sm:$0xf] %vm1736_vm2, %v2100_v40 }
 0x1b4 PF: > { %s14_s15 = sadd.s32 1, %s2668_s15  }
 0x1b5   : > { %p11_p4 = scmp.ge.s32.totalorder %s14_s15, 4  }
 0x1b7   :  { %13 = sbr.rel (!%p11_p4) target bundleno = 1 (0x1), region = 66 }

// kernel: forward.14
= control target key start
LH: loop header
LB: loop body
LE: loop exit
PB: predicated region body
PF: predicated region fallthrough
CT: control target
= control target key end

     0   :  { %s614_s18 = smov 0   ;;  %s653_s0 = inlined_call_operand.vmem [shape: bf16[392,32], index: 0, kind: input, shape index: {}]   ;;  %s654_s1 = inlined_call_operand.vmem [shape: f32[1,32], index: 1, kind: input, shape index: {}]   ;;  %s655_s2 = inlined_call_operand.vmem [shape: f32[1,32], index: 2, kind: input, shape index: {}]   ;;  %s656_s3 = inlined_call_operand.vmem [shape: bf16[32,128], index: 3, kind: input, shape index: {}]   ;;  %s657_s4 = inlined_call_operand.vmem [shape: f32[1,128], index: 4, kind: input, shape index: {}]   ;;  %s658_s5 = inlined_call_operand.vmem [shape: bf16[392,128], index: 5, kind: output, shape index: {}]  }
   0x1 LB: > { %s481_s19 = sadd.s32 4294967295, %s582_s18   ;;  %p485_p0 = scmp.ge.s32.totalorder %s582_s18, 1  ;;  %s582_s18 = sphi %s614_s18, %s15_s18  }
   0x2   : > { %p188_p1 = scmp.lt.s32.totalorder %s582_s18, 8 }
   0x4   : > { %p189_p2 = pnand %p485_p0, %p188_p1 }
   0x5   : > { %v574_v0 = vld [vmem:[%s656_s3] sm:$0xff] (!%p189_p2)   ;;  %s216_s22 = smul.u32 (!%p189_p2), 7, %s481_s19  ;;  %v575_v1 = vld [vmem:[%s656_s3 + $0x8] sm:$0xff] (!%p189_p2)   ;;  %vm305_vm0 = vcmask (!%p189_p2), 261120  }
   0x6   : > { %192 = sbr.rel (%p189_p2) target bundleno = 250 (0xfa), region = 40  ;;  %550 = vmatprep.subr.bf16.mxu0 (!%p189_p2), %v574_v0  ;;  %562 = vmatprep.subr.bf16.mxu1 (!%p189_p2), %v574_v0  ;;  %v488_v2 = vld [vmem:[%s654_s1] ss:$0 sm:$0xff] (!%p189_p2) }
   0x7   : > { %p217_p3 = scmp.lt.s32.totalorder (!%p189_p2), %s216_s22, 48  ;;  %551 = vmatpush3.bf16.msra.mxu0 (!%p189_p2), %v574_v0  ;;  %564 = vmatpush3.bf16.msra.mxu1 (!%p189_p2), %v574_v0  ;;  %v489_v11 = vld [vmem:[%s655_s2] ss:$0 sm:$0xff] (!%p189_p2) }
   0x8   : > { %552 = vmatprep.subr.bf16.mxu0 (!%p189_p2), %v575_v1  ;;  %563 = vmatprep.subr.bf16.mxu1 (!%p189_p2), %v575_v1  ;;  %v490_v40 = vld [vmem:[%s657_s4] ss:$0 sm:$0xff] (!%p189_p2) }
   0xb   : > { %553 = vmatpush3.bf16.msra.mxu0 (!%p189_p2), %v575_v1  ;;  %565 = vmatpush3.bf16.msra.mxu1 (!%p189_p2), %v575_v1 }
   0xd   : > { %s660_s22 = smov (!%p217_p3, %s216_s22), 48 }
   0xe   : > { %s486_s25 = sshll.u32 %s660_s22, 2 }
   0xf   : > { %s220_s28 = scalar_lea.vmem %s653_s0, %s486_s25  ;;  %s226_s12 = scalar_lea.vmem %s658_s5, %s486_s25 }
  0x10   : > { %v514_v3 = vld [vmem:[%s220_s28] sm:$0xff]   ;;  %v541_v4 = vld [vmem:[%s220_s28 + $0x10] sm:$0xff]   ;;  %v540_v5 = vld [vmem:[%s220_s28 + $0x8] sm:$0xff]  }
  0x11   : > { %v515_v6 = vunpack.c.l.bf16 %v514_v3  ;;  %v516_v7 = vunpack.c.h.bf16 %v514_v3  ;;  %v523_v8 = vunpack.c.l.bf16 %v541_v4  ;;  %v524_v9 = vunpack.c.h.bf16 %v541_v4  ;;  %v235_v10 = vld [vmem:[%s220_s28 + $0x18] sm:$0xf] }
  0x12   : > { %v519_v12 = vunpack.c.l.bf16 %v540_v5  ;;  %v520_v13 = vunpack.c.h.bf16 %v540_v5  ;;  %v242_v14 = vunpack.c.l.bf16 %v235_v10 }
  0x13   : > { %v250_v15 = vmul.f32 %v515_v6, %v488_v2  ;;  %v251_v16 = vmul.f32 %v516_v7, %v488_v2  ;;  %v254_v17 = vmul.f32 %v523_v8, %v488_v2  ;;  %v255_v18 = vmul.f32 %v524_v9, %v488_v2 }
  0x14   : > { %v252_v19 = vmul.f32 %v519_v12, %v488_v2  ;;  %v253_v20 = vmul.f32 %v520_v13, %v488_v2  ;;  %v256_v21 = vmul.f32 %v488_v2, %v242_v14 }
  0x15   : > { %v264_v22 = vadd.f32 %v489_v11, %v250_v15  ;;  %v265_v23 = vadd.f32 %v489_v11, %v251_v16  ;;  %v268_v24 = vadd.f32 %v489_v11, %v254_v17  ;;  %v269_v25 = vadd.f32 %v489_v11, %v255_v18 }
  0x16   : > { %v266_v26 = vadd.f32 %v489_v11, %v252_v19  ;;  %v267_v27 = vadd.f32 %v489_v11, %v253_v20  ;;  %v270_v28 = vadd.f32 %v489_v11, %v256_v21 }
  0x17   : > { %v271_v29 = vmax.f32 %v264_v22, 0.0  ;;  %v272_v30 = vmax.f32 %v265_v23, 0.0  ;;  %v275_v31 = vmax.f32 %v268_v24, 0.0  ;;  %v276_v32 = vmax.f32 %v269_v25, 0.0 }
  0x18   : > { %v273_v33 = vmax.f32 %v266_v26, 0.0  ;;  %v274_v34 = vmax.f32 %v267_v27, 0.0  ;;  %v277_v35 = vmax.f32 %v270_v28, 0.0 }
  0x19   : > { %v278_v36 = vpack.c.bf16 %v272_v30, %v271_v29  ;;  %v280_v37 = vpack.c.bf16 %v276_v32, %v275_v31 }
  0x1a   : > { %v279_v38 = vpack.c.bf16 %v274_v34, %v273_v33  ;;  %v281_v39 = vpack.c.bf16 %v277_v35, %v277_v35 }
  0x1b   : > { %554 = vmatprep.mubr.msk.bf16.mxu0 %vm305_vm0, %v278_v36  ;;  %558 = vmatprep.mubr.msk.bf16.mxu1 %vm305_vm0, %v280_v37 }
  0x1c   : > { %555 = vmatmul.mubr.msk.bf16.vlgmr.msra.gmra.mrb[0].mxu0 %vm305_vm0, %v279_v38  ;;  %559 = vmatmul.mubr.msk.bf16.vlgmr.msra.gmra.mrb[0].mxu1 %vm305_vm0, %v281_v39 }
  0xef   : > { %v556_v41 = vpop.f32.mrb[0].mxu0  ;;  %v560_v42 = vpop.f32.mrb[0].mxu1 }
  0xf0   : > { %v361_v43 = vadd.f32 %v556_v41, %v490_v40  ;;  %v377_v44 = vadd.f32 %v560_v42, %v490_v40  ;;  %v352_v45 = vpop.f32.mrb[1].mxu0  ;;  %v368_v46 = vpop.f32.mrb[1].mxu1 }
  0xf1   : > { %v353_v47 = vadd.f32 %v490_v40, %v352_v45  ;;  %v369_v48 = vadd.f32 %v490_v40, %v368_v46  ;;  %v557_v49 = vpop.f32.mrb[2].mxu0  ;;  %v561_v50 = vpop.f32.mrb[2].mxu1 }
  0xf2   : > { %v388_v51 = vmax.f32 %v377_v44, 0.0  ;;  %v364_v52 = vadd.f32 %v557_v49, %v490_v40  ;;  %v355_v53 = vpop.f32.mrb[3].mxu0  ;;  %v371_v54 = vpop.f32.mrb[3].mxu1  ;;  %v384_v57 = vmax.f32 %v361_v43, 0.0 }
  0xf3   : > { %v356_v55 = vadd.f32 %v490_v40, %v355_v53  ;;  %v372_v56 = vadd.f32 %v490_v40, %v371_v54  ;;  %v382_v60 = vmax.f32 %v353_v47, 0.0  ;;  %v386_v61 = vmax.f32 %v369_v48, 0.0 }
  0xf4   : > { %v512_v58 = vpack.c.bf16 %v388_v51, %v388_v51  ;;  %v385_v59 = vmax.f32 %v364_v52, 0.0 }
  0xf5   : > { %v383_v62 = vmax.f32 %v356_v55, 0.0  ;;  %v387_v63 = vmax.f32 %v372_v56, 0.0 }
  0xf6   : > { %424 = vst [vmem:[%s226_s12 + $0x18] sm:$0xf] %v512_v58  ;;  %v533_v0 = vpack.c.bf16 %v385_v59, %v384_v57 }
  0xf7   : > { %v528_v1 = vpack.c.bf16 %v383_v62, %v382_v60  ;;  %v538_v2 = vpack.c.bf16 %v387_v63, %v386_v61 }
  0xf8   : > { %542 = vst [vmem:[%s226_s12 + $0x8] sm:$0xff] %v533_v0  }
  0xf9   : > { %529 = vst [vmem:[%s226_s12] sm:$0xff] %v528_v1   ;;  %543 = vst [vmem:[%s226_s12 + $0x10] sm:$0xff] %v538_v2  }
  0xfa PF: > { %s15_s18 = sadd.s32 1, %s582_s18  }
  0xfb   : > { %p12_p4 = scmp.ge.s32.totalorder %s15_s18, 9  }
  0xfd   :  { %14 = sbr.rel (!%p12_p4) target bundleno = 1 (0x1), region = 70 }

// kernel: forward.16
= control target key start
LH: loop header
LB: loop body
LE: loop exit
PB: predicated region body
PF: predicated region fallthrough
CT: control target
= control target key end

     0   :  { %s551_s15 = smov 0   ;;  %s594_s0 = inlined_call_operand.vmem [shape: bf16[392,32], index: 0, kind: input, shape index: {}]   ;;  %s595_s1 = inlined_call_operand.vmem [shape: f32[1,32], index: 1, kind: input, shape index: {}]   ;;  %s596_s2 = inlined_call_operand.vmem [shape: f32[1,32], index: 2, kind: input, shape index: {}]   ;;  %s597_s3 = inlined_call_operand.vmem [shape: bf16[32,32], index: 3, kind: input, shape index: {}]   ;;  %s598_s4 = inlined_call_operand.vmem [shape: bf16[392,32], index: 4, kind: output, shape index: {}]  }
   0x1 LB: > { %s441_s16 = sadd.s32 4294967295, %s524_s15   ;;  %p445_p0 = scmp.ge.s32.totalorder %s524_s15, 1  ;;  %s524_s15 = sphi %s551_s15, %s14_s15  }
   0x2   : > { %p163_p1 = scmp.lt.s32.totalorder %s524_s15, 8 }
   0x4   : > { %p164_p2 = pnand %p445_p0, %p163_p1 }
   0x5   : > { %v516_v0 = vld [vmem:[%s597_s3] sm:$0xff] (!%p164_p2)   ;;  %s189_s19 = smul.u32 (!%p164_p2), 7, %s441_s16  ;;  %v517_v1 = vld [vmem:[%s597_s3 + $0x8] sm:$0xff] (!%p164_p2)   ;;  %vm271_vm0 = vcmask (!%p164_p2), 261120   ;;  %vm377_vm1 = vcmask (!%p164_p2), 257024  }
   0x6   : > { %167 = sbr.rel (%p164_p2) target bundleno = 246 (0xf6), region = 36  ;;  %492 = vmatprep.subr.bf16.mxu0 (!%p164_p2), %v516_v0  ;;  %504 = vmatprep.subr.bf16.mxu1 (!%p164_p2), %v516_v0  ;;  %v448_v2 = vld [vmem:[%s595_s1] ss:$0 sm:$0xff] (!%p164_p2) }
   0x7   : > { %p190_p3 = scmp.lt.s32.totalorder (!%p164_p2), %s189_s19, 48  ;;  %493 = vmatpush3.bf16.msra.mxu0 (!%p164_p2), %v516_v0  ;;  %506 = vmatpush3.bf16.msra.mxu1 (!%p164_p2), %v516_v0  ;;  %v449_v11 = vld [vmem:[%s596_s2] ss:$0 sm:$0xff] (!%p164_p2) }
   0x8   : > { %494 = vmatprep.subr.bf16.mxu0 (!%p164_p2), %v517_v1  ;;  %505 = vmatprep.subr.bf16.mxu1 (!%p164_p2), %v517_v1 }
   0xb   : > { %495 = vmatpush3.bf16.msra.mxu0 (!%p164_p2), %v517_v1  ;;  %507 = vmatpush3.bf16.msra.mxu1 (!%p164_p2), %v517_v1 }
   0xd   : > { %s600_s19 = smov (!%p190_p3, %s189_s19), 48 }
   0xe   : > { %s446_s22 = sshll.u32 %s600_s19, 2 }
   0xf   : > { %s193_s25 = scalar_lea.vmem %s594_s0, %s446_s22  ;;  %s199_s6 = scalar_lea.vmem %s598_s4, %s446_s22 }
  0x10   : > { %v473_v3 = vld [vmem:[%s193_s25] sm:$0xff]   ;;  %v485_v4 = vld [vmem:[%s193_s25 + $0x10] sm:$0xff]   ;;  %v484_v5 = vld [vmem:[%s193_s25 + $0x8] sm:$0xff]  }
  0x11   : > { %v474_v6 = vunpack.c.l.bf16 %v473_v3  ;;  %v475_v7 = vunpack.c.h.bf16 %v473_v3  ;;  %v482_v8 = vunpack.c.l.bf16 %v485_v4  ;;  %v483_v9 = vunpack.c.h.bf16 %v485_v4  ;;  %v208_v10 = vld [vmem:[%s193_s25 + $0x18] sm:$0xf] }
  0x12   : > { %v478_v12 = vunpack.c.l.bf16 %v484_v5  ;;  %v479_v13 = vunpack.c.h.bf16 %v484_v5  ;;  %v215_v14 = vunpack.c.l.bf16 %v208_v10 }
  0x13   : > { %v223_v15 = vmul.f32 %v474_v6, %v448_v2  ;;  %v224_v16 = vmul.f32 %v475_v7, %v448_v2  ;;  %v227_v17 = vmul.f32 %v482_v8, %v448_v2  ;;  %v228_v18 = vmul.f32 %v483_v9, %v448_v2 }
  0x14   : > { %v225_v19 = vmul.f32 %v478_v12, %v448_v2  ;;  %v226_v20 = vmul.f32 %v479_v13, %v448_v2  ;;  %v229_v21 = vmul.f32 %v448_v2, %v215_v14 }
  0x15   : > { %v237_v22 = vadd.f32 %v449_v11, %v223_v15  ;;  %v238_v23 = vadd.f32 %v449_v11, %v224_v16  ;;  %v241_v24 = vadd.f32 %v449_v11, %v227_v17  ;;  %v242_v25 = vadd.f32 %v449_v11, %v228_v18 }
  0x16   : > { %v239_v26 = vadd.f32 %v449_v11, %v225_v19  ;;  %v240_v27 = vadd.f32 %v449_v11, %v226_v20  ;;  %v243_v28 = vadd.f32 %v449_v11, %v229_v21 }
  0x17   : > { %v244_v29 = vmax.f32 %v237_v22, 0.0  ;;  %v245_v30 = vmax.f32 %v238_v23, 0.0  ;;  %v248_v31 = vmax.f32 %v241_v24, 0.0  ;;  %v249_v32 = vmax.f32 %v242_v25, 0.0 }
  0x18   : > { %v246_v33 = vmax.f32 %v239_v26, 0.0  ;;  %v247_v34 = vmax.f32 %v240_v27, 0.0  ;;  %v250_v35 = vmax.f32 %v243_v28, 0.0 }
  0x19   : > { %v251_v36 = vpack.c.bf16 %v245_v30, %v244_v29  ;;  %v253_v37 = vpack.c.bf16 %v249_v32, %v248_v31 }
  0x1a   : > { %v252_v38 = vpack.c.bf16 %v247_v34, %v246_v33  ;;  %v254_v39 = vpack.c.bf16 %v250_v35, %v250_v35 }
  0x1b   : > { %496 = vmatprep.mubr.msk.bf16.mxu0 %vm271_vm0, %v251_v36  ;;  %500 = vmatprep.mubr.msk.bf16.mxu1 %vm271_vm0, %v253_v37 }
  0x1c   : > { %497 = vmatmul.mubr.msk.bf16.vlgmr.msra.gmra.mrb[0].mxu0 %vm271_vm0, %v252_v38  ;;  %501 = vmatmul.mubr.msk.bf16.vlgmr.msra.gmra.mrb[0].mxu1 %vm271_vm0, %v254_v39 }
  0xef   : > { %v498_v40 = vpop.f32.mrb[0].mxu0  ;;  %v502_v41 = vpop.f32.mrb[0].mxu1 }
  0xf0   : > { %v467_v42 = vpack.c.bf16 %v498_v40, %v498_v40  ;;  %v471_v43 = vpack.c.bf16 %v502_v41, %v502_v41  ;;  %v318_v44 = vpop.f32.mrb[1].mxu0  ;;  %v334_v45 = vpop.f32.mrb[1].mxu1 }
  0xf1   : > { %v465_v46 = vpack.c.bf16 %v318_v44, %v318_v44  ;;  %v469_v47 = vpack.c.bf16 %v334_v45, %v334_v45  ;;  %v499_v48 = vpop.f32.mrb[2].mxu0  ;;  %v503_v49 = vpop.f32.mrb[2].mxu1 }
  0xf2   : > { %380 = vst.msk [vmem:[%s199_s6 + $0x8] sm:$0xf] %vm377_vm1, %v467_v42  ;;  %384 = vst.msk [vmem:[%s199_s6 + $0x18] sm:$0xf] %vm377_vm1, %v471_v43  ;;  %v468_v50 = vpack.c.bf16 %v499_v48, %v499_v48  ;;  %v321_v51 = vpop.f32.mrb[3].mxu0  ;;  %v337_v52 = vpop.f32.mrb[3].mxu1 }
  0xf3   : > { %378 = vst.msk [vmem:[%s199_s6] sm:$0xf] %vm377_vm1, %v465_v46  ;;  %382 = vst.msk [vmem:[%s199_s6 + $0x10] sm:$0xf] %vm377_vm1, %v469_v47  ;;  %v466_v53 = vpack.c.bf16 %v321_v51, %v321_v51  ;;  %v470_v54 = vpack.c.bf16 %v337_v52, %v337_v52 }
  0xf4   : > { %381 = vst.msk [vmem:[%s199_s6 + $0xc] sm:$0xf] %vm377_vm1, %v468_v50 }
  0xf5   : > { %379 = vst.msk [vmem:[%s199_s6 + $0x4] sm:$0xf] %vm377_vm1, %v466_v53  ;;  %383 = vst.msk [vmem:[%s199_s6 + $0x14] sm:$0xf] %vm377_vm1, %v470_v54 }
  0xf6 PF: > { %s14_s15 = sadd.s32 1, %s524_s15  }
  0xf7   : > { %p11_p4 = scmp.ge.s32.totalorder %s14_s15, 9  }
  0xf9   :  { %13 = sbr.rel (!%p11_p4) target bundleno = 1 (0x1), region = 66 }

// kernel: forward.17
= control target key start
LH: loop header
LB: loop body
LE: loop exit
PB: predicated region body
PF: predicated region fallthrough
CT: control target
= control target key end

     0   :  { %v474_v0 = vmov 0.0   ;;  %vm475_vm0 = vmmov 0   ;;  %vm130_vm1 = vcmask 261120   ;;  %s633_s3 = inlined_call_operand.vmem [shape: bf16[32,128], index: 3, kind: input, shape index: {}]   ;;  %s634_s0 = inlined_call_operand.vmem [shape: bf16[98,32], index: 0, kind: input, shape index: {}]   ;;  %s635_s1 = inlined_call_operand.vmem [shape: f32[1,32], index: 1, kind: input, shape index: {}]   ;;  %s636_s2 = inlined_call_operand.vmem [shape: f32[1,32], index: 2, kind: input, shape index: {}]   ;;  %s637_s4 = inlined_call_operand.vmem [shape: f32[1,128], index: 4, kind: input, shape index: {}]   ;;  %s638_s5 = inlined_call_operand.vmem [shape: bf16[98,128], index: 5, kind: output, shape index: {}]  }
   0x1   :  { %434 = vmatprep.subr.bf16.mxu0 %v474_v0  ;;  %v472_v1 = vld [vmem:[%s633_s3] sm:$0xff]   ;;  %466 = vmatprep.subr.bf16.mxu1 %v474_v0  ;;  %v473_v2 = vld [vmem:[%s633_s3 + $0x8] sm:$0xff]   ;;  %v416_v22 = vld [vmem:[%s634_s0 + $0x10] sm:$0xff]  }
   0x2   :  { %438 = vmatprep.mubr.msk.bf16.mxu0 %vm475_vm0, %v474_v0  ;;  %454 = vmatprep.mubr.msk.bf16.mxu1 %vm475_vm0, %v474_v0  ;;  %v362_v3 = vld [vmem:[%s634_s0] sm:$0xff]   ;;  %v415_v8 = vld [vmem:[%s634_s0 + $0x8] sm:$0xff]   ;;  %v371_v34 = vunpack.c.l.bf16 %v416_v22  ;;  %v33_v35 = vld [vmem:[%s634_s0 + $0x30] sm:$0x1]  ;;  %v372_v41 = vunpack.c.h.bf16 %v416_v22 }
   0x3   :  { %435 = vmatpush3.bf16.msra.mxu0 %v472_v1  ;;  %468 = vmatpush3.bf16.msra.mxu1 %v472_v1  ;;  %v524_v4 = vld [vmem:[%s635_s1] ss:$0 sm:$0xff]  ;;  %v363_v5 = vunpack.c.l.bf16 %v362_v3  ;;  %v364_v6 = vunpack.c.h.bf16 %v362_v3  ;;  %v419_v9 = vld [vmem:[%s634_s0 + $0x28] sm:$0xff]   ;;  %v367_v13 = vunpack.c.l.bf16 %v415_v8  ;;  %v368_v14 = vunpack.c.h.bf16 %v415_v8  ;;  %v417_v51 = vld [vmem:[%s634_s0 + $0x18] sm:$0xff]  }
   0x4   :  { %436 = vmatprep.subr.bf16.mxu0 %v474_v0  ;;  %467 = vmatprep.subr.bf16.mxu1 %v474_v0  ;;  %v418_v7 = vld [vmem:[%s634_s0 + $0x20] sm:$0xff]   ;;  %v383_v17 = vunpack.c.l.bf16 %v419_v9  ;;  %v384_v18 = vunpack.c.h.bf16 %v419_v9  ;;  %v46_v45 = vunpack.c.l.bf16 %v33_v35  ;;  %v58_v46 = vmul.f32 %v371_v34, %v524_v4 }
   0x5   :  { %v540_v10 = vld [vmem:[%s636_s2] ss:$0 sm:$0xff]  ;;  %v379_v11 = vunpack.c.l.bf16 %v418_v7  ;;  %v380_v12 = vunpack.c.h.bf16 %v418_v7  ;;  %v54_v15 = vmul.f32 %v363_v5, %v524_v4  ;;  %v55_v16 = vmul.f32 %v364_v6, %v524_v4 }
   0x6   :  { %v56_v21 = vmul.f32 %v367_v13, %v524_v4  ;;  %v57_v25 = vmul.f32 %v368_v14, %v524_v4  ;;  %v64_v26 = vmul.f32 %v383_v17, %v524_v4  ;;  %v65_v30 = vmul.f32 %v384_v18, %v524_v4  ;;  %v597_v8 = vld [vmem:[%s637_s4] ss:$0 sm:$0xff] }
   0x7   :  { %437 = vmatpush3.bf16.msra.mxu0 %v473_v2  ;;  %469 = vmatpush3.bf16.msra.mxu1 %v473_v2  ;;  %v62_v19 = vmul.f32 %v379_v11, %v524_v4  ;;  %v63_v20 = vmul.f32 %v380_v12, %v524_v4  ;;  %v74_v23 = vadd.f32 %v540_v10, %v54_v15  ;;  %v375_v55 = vunpack.c.l.bf16 %v417_v51 }
   0x8   :  { %v75_v24 = vadd.f32 %v540_v10, %v55_v16  ;;  %v76_v29 = vadd.f32 %v540_v10, %v56_v21  ;;  %v77_v33 = vadd.f32 %v540_v10, %v57_v25  ;;  %v84_v38 = vadd.f32 %v540_v10, %v64_v26 }
   0x9   :  { %v82_v27 = vadd.f32 %v540_v10, %v62_v19  ;;  %v83_v28 = vadd.f32 %v540_v10, %v63_v20  ;;  %v87_v31 = vmax.f32 %v74_v23, 0.0  ;;  %v85_v39 = vadd.f32 %v540_v10, %v65_v30 }
   0xa   :  { %v88_v32 = vmax.f32 %v75_v24, 0.0  ;;  %v89_v43 = vmax.f32 %v76_v29, 0.0  ;;  %v90_v44 = vmax.f32 %v77_v33, 0.0  ;;  %v59_v47 = vmul.f32 %v372_v41, %v524_v4 }
   0xb   :  { %v95_v36 = vmax.f32 %v82_v27, 0.0  ;;  %v96_v37 = vmax.f32 %v83_v28, 0.0  ;;  %v97_v48 = vmax.f32 %v84_v38, 0.0  ;;  %v98_v49 = vmax.f32 %v85_v39, 0.0 }
   0xc   :  { %v100_v40 = vpack.c.bf16 %v88_v32, %v87_v31  ;;  %v66_v50 = vmul.f32 %v524_v4, %v46_v45  ;;  %v101_v52 = vpack.c.bf16 %v90_v44, %v89_v43  ;;  %v78_v53 = vadd.f32 %v540_v10, %v58_v46 }
   0xd   :  { %v104_v42 = vpack.c.bf16 %v96_v37, %v95_v36  ;;  %v79_v54 = vadd.f32 %v540_v10, %v59_v47  ;;  %v376_v56 = vunpack.c.h.bf16 %v417_v51  ;;  %v105_v57 = vpack.c.bf16 %v98_v49, %v97_v48 }
   0xe   :  { %439 = vmatmul.mubr.msk.bf16.vlgmr.msra.gmra.mrb[0].mxu0 %vm130_vm1, %v100_v40  ;;  %v86_v58 = vadd.f32 %v540_v10, %v66_v50  ;;  %v91_v59 = vmax.f32 %v78_v53, 0.0  ;;  %v60_v61 = vmul.f32 %v375_v55, %v524_v4 }
   0xf   :  { %442 = vmatprep.mubr.msk.bf16.mxu0 %vm475_vm0, %v474_v0  ;;  %455 = vmatmul.mubr.msk.bf16.vlgmr.msra.gmra.mrb[0].mxu1 %vm130_vm1, %v104_v42  ;;  %v92_v60 = vmax.f32 %v79_v54, 0.0  ;;  %v61_v62 = vmul.f32 %v376_v56, %v524_v4 }
  0x10   :  { %458 = vmatprep.mubr.msk.bf16.mxu1 %vm475_vm0, %v474_v0  ;;  %v99_v63 = vmax.f32 %v86_v58, 0.0  ;;  %v80_v2 = vadd.f32 %v540_v10, %v60_v61 }
  0x11   :  { %v102_v1 = vpack.c.bf16 %v92_v60, %v91_v59  ;;  %v81_v3 = vadd.f32 %v540_v10, %v61_v62 }
  0x12   :  { %v106_v5 = vpack.c.bf16 %v99_v63, %v99_v63  ;;  %v93_v6 = vmax.f32 %v80_v2, 0.0 }
  0x13   :  { %v94_v7 = vmax.f32 %v81_v3, 0.0 }
  0x15   :  { %v103_v4 = vpack.c.bf16 %v94_v7, %v93_v6 }
  0x16   :  { %443 = vmatmul.mubr.msk.bf16.gmra.mrb[4].mxu0 %vm130_vm1, %v101_v52 }
  0x17   :  { %446 = vmatprep.mubr.msk.bf16.mxu0 %vm475_vm0, %v474_v0  ;;  %459 = vmatmul.mubr.msk.bf16.gmra.mrb[4].mxu1 %vm130_vm1, %v105_v57 }
  0x18   :  { %462 = vmatprep.mubr.msk.bf16.mxu1 %vm475_vm0, %v474_v0 }
  0x1e   :  { %447 = vmatmul.mubr.msk.bf16.gmra.mrb[8].mxu0 %vm130_vm1, %v102_v1 }
  0x1f   :  { %450 = vmatprep.mubr.msk.bf16.mxu0 %vm475_vm0, %v474_v0  ;;  %463 = vmatmul.mubr.msk.bf16.gmra.mrb[8].mxu1 %vm130_vm1, %v106_v5 }
  0x26   :  { %451 = vmatmul.mubr.msk.bf16.gmra.mrb[12].mxu0 %vm130_vm1, %v103_v4 }
  0xe1   :  { %v186_v9 = vpop.f32.mrb[0].mxu0 }
  0xe2   :  { %v187_v10 = vadd.f32 %v597_v8, %v186_v9  ;;  %v440_v11 = vpop.f32.mrb[1].mxu0  ;;  %v218_v12 = vpop.f32.mrb[0].mxu1 }
  0xe3   :  { %v189_v13 = vpop.f32.mrb[2].mxu0  ;;  %v219_v14 = vadd.f32 %v597_v8, %v218_v12  ;;  %v456_v15 = vpop.f32.mrb[1].mxu1 }
  0xe4   :  { %v190_v0 = vadd.f32 %v597_v8, %v189_v13  ;;  %v441_v16 = vpop.f32.mrb[3].mxu0  ;;  %v221_v17 = vpop.f32.mrb[2].mxu1  ;;  %v240_v21 = vmax.f32 %v187_v10, 0.0 }
  0xe5   :  { %v248_v18 = vmax.f32 %v219_v14, 0.0  ;;  %v222_v19 = vadd.f32 %v597_v8, %v221_v17  ;;  %v457_v20 = vpop.f32.mrb[3].mxu1 }
  0xe6   :  { %v241_v22 = vmax.f32 %v190_v0, 0.0 }
  0xe7   :  { %v249_v23 = vmax.f32 %v222_v19, 0.0 }
  0xe8   :  { %v388_v24 = vpack.c.bf16 %v241_v22, %v240_v21 }
  0xe9   :  { %v194_v25 = vpop.f32.mrb[4].mxu0  ;;  %v408_v26 = vpack.c.bf16 %v249_v23, %v248_v18 }
  0xea   :  { %389 = vst [vmem:[%s638_s5] sm:$0xff] %v388_v24   ;;  %v195_v27 = vadd.f32 %v597_v8, %v194_v25  ;;  %v444_v28 = vpop.f32.mrb[5].mxu0  ;;  %v226_v29 = vpop.f32.mrb[4].mxu1 }
  0xeb   :  { %423 = vst [vmem:[%s638_s5 + $0x20] sm:$0xff] %v408_v26   ;;  %v197_v30 = vpop.f32.mrb[6].mxu0  ;;  %v227_v31 = vadd.f32 %v597_v8, %v226_v29  ;;  %v460_v32 = vpop.f32.mrb[5].mxu1 }
  0xec   :  { %v198_v33 = vadd.f32 %v597_v8, %v197_v30  ;;  %v445_v34 = vpop.f32.mrb[7].mxu0  ;;  %v229_v35 = vpop.f32.mrb[6].mxu1  ;;  %v242_v39 = vmax.f32 %v195_v27, 0.0 }
  0xed   :  { %v250_v36 = vmax.f32 %v227_v31, 0.0  ;;  %v230_v37 = vadd.f32 %v597_v8, %v229_v35  ;;  %v461_v38 = vpop.f32.mrb[7].mxu1 }
  0xee   :  { %v243_v40 = vmax.f32 %v198_v33, 0.0 }
  0xef   :  { %v251_v41 = vmax.f32 %v230_v37, 0.0 }
  0xf0   :  { %v393_v42 = vpack.c.bf16 %v243_v40, %v242_v39 }
  0xf1   :  { %v202_v43 = vpop.f32.mrb[8].mxu0  ;;  %v413_v44 = vpack.c.bf16 %v251_v41, %v250_v36 }
  0xf2   :  { %420 = vst [vmem:[%s638_s5 + $0x8] sm:$0xff] %v393_v42   ;;  %v203_v45 = vadd.f32 %v597_v8, %v202_v43  ;;  %v448_v46 = vpop.f32.mrb[9].mxu0  ;;  %v234_v47 = vpop.f32.mrb[8].mxu1 }
  0xf3   :  { %424 = vst [vmem:[%s638_s5 + $0x28] sm:$0xff] %v413_v44   ;;  %v205_v48 = vpop.f32.mrb[10].mxu0  ;;  %v235_v49 = vadd.f32 %v597_v8, %v234_v47  ;;  %v464_v50 = vpop.f32.mrb[9].mxu1 }
  0xf4   :  { %v206_v51 = vadd.f32 %v597_v8, %v205_v48  ;;  %v449_v52 = vpop.f32.mrb[11].mxu0  ;;  %v237_v53 = vpop.f32.mrb[10].mxu1  ;;  %v244_v56 = vmax.f32 %v203_v45, 0.0 }
  0xf5   :  { %v252_v54 = vmax.f32 %v235_v49, 0.0  ;;  %v465_v55 = vpop.f32.mrb[11].mxu1 }
  0xf6   :  { %v245_v57 = vmax.f32 %v206_v51, 0.0 }
  0xf7   :  { %v360_v58 = vpack.c.bf16 %v252_v54, %v252_v54 }
  0xf8   :  { %v398_v59 = vpack.c.bf16 %v245_v57, %v244_v56 }
  0xf9   :  { %318 = vst [vmem:[%s638_s5 + $0x30] sm:$0x1] %v360_v58  ;;  %v210_v60 = vpop.f32.mrb[12].mxu0 }
  0xfa   :  { %421 = vst [vmem:[%s638_s5 + $0x10] sm:$0xff] %v398_v59   ;;  %v211_v61 = vadd.f32 %v597_v8, %v210_v60  ;;  %v452_v62 = vpop.f32.mrb[13].mxu0 }
  0xfb   :  { %v213_v63 = vpop.f32.mrb[14].mxu0 }
  0xfc   :  { %v214_v1 = vadd.f32 %v597_v8, %v213_v63  ;;  %v453_v2 = vpop.f32.mrb[15].mxu0  ;;  %v246_v3 = vmax.f32 %v211_v61, 0.0 }
  0xfe   :  { %v247_v5 = vmax.f32 %v214_v1, 0.0 }
 0x100   :  { %v403_v6 = vpack.c.bf16 %v247_v5, %v246_v3 }
 0x102   :  { %422 = vst [vmem:[%s638_s5 + $0x18] sm:$0xff] %v403_v6  }

// kernel: forward.19
= control target key start
LH: loop header
LB: loop body
LE: loop exit
PB: predicated region body
PF: predicated region fallthrough
CT: control target
= control target key end

     0   :  { %10 = vsyncpa [#allocation3], 0  ;;  %s725_s0 = inlined_call_operand.vmem [shape: bf16[2,49,32], index: 0, kind: input, shape index: {}]   ;;  %s726_s1 = inlined_call_operand.vmem [shape: f32[1,32], index: 1, kind: input, shape index: {}]   ;;  %s727_s2 = inlined_call_operand.vmem [shape: f32[1,32], index: 2, kind: input, shape index: {}]   ;;  %s728_s3 = inlined_call_operand.vmem [shape: bf16[32,128], index: 3, kind: input, shape index: {}]   ;;  %s729_s4 = inlined_call_operand.vmem [shape: f32[1,128], index: 4, kind: input, shape index: {}]   ;;  %s730_s5 = inlined_call_operand.hbm [shape: f32[2,1,128], index: 5, kind: output, shape index: {}]  }
   0x1   :  { %12 = vsyncpa [#allocation3 + $0x1], 0  ;;  %s603_s18 = smov 0   ;;  %s605_s19 = smov 0  }
   0x2   :  { %s607_s20 = smov 0   ;;  %s609_s21 = smov 0  }
   0x3 LB: > { %s624_s22 = sadd.s32 4294967295, %s568_s21   ;;  %s424_s23 = sadd.s32 4294967294, %s568_s21   ;;  %s568_s21 = sphi %s609_s21, %s736_s21   ;;  %s564_s20 = sphi %s607_s20, %s735_s20   ;;  %s560_s19 = sphi %s605_s19, %s734_s19   ;;  %s556_s18 = sphi %s603_s18, %s733_s18  }
   0x4   : > { %s628_s24 = sadd.s32 1, %s568_s21   ;;  %s135_s25 = sadd.s32 1, %s564_s20 }
   0x5   : > { %s132_s26 = ssub.s32 %s568_s21, %s628_s24  ;;  %p145_p0 = scmp.ne.s32.totalorder %s564_s20, %s560_s19 }
   0x6   : > { %p133_p1 = scmp.eq.s32.totalorder %s132_s26, 0  ;;  %p146_p2 = scmp.eq.s32.totalorder %s624_s22, 1 }
   0x7   : > { %p151_p3 = scmp.ne.s32.totalorder %s560_s19, %s556_s18  ;;  %p152_p4 = scmp.eq.s32.totalorder %s424_s23, 1 }
   0x8   : > { %s639_s27 = scalar_select %p133_p1, %s564_s20, %s135_s25  }
   0x9   : > { %p641_p5 = por %p146_p2, %p145_p0  ;;  %p645_p6 = por %p152_p4, %p151_p3 }
   0xa   : > { %p427_p7 = scmp.ge.s32.totalorder %s568_s21, 1  ;;  %p190_p8 = scmp.lt.s32.totalorder %s568_s21, 3 }
   0xc   : > { %p191_p9 = pnand %p427_p7, %p190_p8 }
   0xd   : > { %v504_v0 = vld [vmem:[%s728_s3] sm:$0xff] (!%p191_p9)   ;;  %v570_v1 = vmov (!%p191_p9), 0.0   ;;  %v505_v2 = vld [vmem:[%s728_s3 + $0x8] sm:$0xff] (!%p191_p9)   ;;  %vm571_vm0 = vmmov (!%p191_p9), 0   ;;  %p217_p10 = scmp.lt.s32.totalorder (!%p191_p9), %s624_s22, 1  ;;  %vm272_vm1 = vcmask (!%p191_p9), 261120  }
   0xe   : > { %194 = sbr.rel (%p191_p9) target bundleno = 292 (0x124), region = 40  ;;  %454 = vmatprep.subr.bf16.mxu0 (!%p191_p9), %v570_v1  ;;  %458 = vmatprep.mubr.msk.bf16.mxu0 (!%p191_p9), %vm571_vm0, %v570_v1  ;;  %v429_v3 = vld [vmem:[%s726_s1] ss:$0 sm:$0xff] (!%p191_p9)  ;;  %vm284_vm2 = vcmask (!%p191_p9), 253952   ;;  %s215_s23 = sand.u32 (!%p191_p9), 1, %s560_s19  }
   0xf   : > { %455 = vmatpush3.bf16.msra.mxu0 (!%p191_p9), %v504_v0  ;;  %v430_v15 = vld [vmem:[%s727_s2] ss:$0 sm:$0xff] (!%p191_p9)  ;;  %s434_s30 = sshll.u32 (!%p191_p9), %s624_s22, 4  ;;  %s216_s6 = scalar_lea.vmem (!%p191_p9), [#allocation2], %s215_s23 }
  0x10   : > { %456 = vmatprep.subr.bf16.mxu0 (!%p191_p9), %v570_v1  ;;  %v299_v58 = vld [vmem:[%s729_s4] sm:$0x1] (!%p191_p9)  ;;  %s369_s7 = sshll.u32 (!%p191_p9), %s216_s6, 4  ;;  %s357_s11 = scalar_lea.sflag (!%p191_p9), [#allocation3], %s215_s23  ;;  %s685_s7 = int_to_ptr.vmem [resolvable:$true] %s369_s7 }
  0x11   : > { %s572_s12 = smov (!%p191_p9), [#allocation2]  }
  0x13   : > { %457 = vmatpush3.bf16.msra.mxu0 (!%p191_p9), %v505_v2 }
  0x15   : > { %s218_s9 = scalar_select %p217_p10, %s624_s22, 1 }
  0x16   : > { %s506_s22 = scalar_lea.vmem %s685_s7, 16 }
  0x17   : > { %s462_s10 = smul.u32 28, %s218_s9  ;;  %p507_p11 = scmp.ne.s32.totalorder %s685_s7, %s506_s22 }
  0x19   : > { %s221_s13 = scalar_lea.vmem %s725_s0, %s462_s10  ;;  %s683_s10 = scalar_lea.hbm %s730_s5, %s434_s30 }
  0x1a   : > { %v438_v4 = vld [vmem:[%s221_s13] sm:$0xff]   ;;  %v449_v5 = vld [vmem:[%s221_s13 + $0x8] sm:$0xff]   ;;  %v450_v6 = vld [vmem:[%s221_s13 + $0x10] sm:$0xff]   ;;  %p508_p12 = pnand %p507_p11, %p641_p5 }
  0x1b   : > { %v439_v7 = vunpack.c.l.bf16 %v438_v4  ;;  %v440_v8 = vunpack.c.h.bf16 %v438_v4  ;;  %v443_v9 = vunpack.c.l.bf16 %v449_v5  ;;  %v444_v10 = vunpack.c.h.bf16 %v449_v5  ;;  %v229_v11 = vld [vmem:[%s221_s13 + $0x18] sm:$0x1]  ;;  %s510_s13 = sshll.u32 %s572_s12, 4  ;;  %s511_s13 = int_to_ptr.vmem [resolvable:$false] %s510_s13 }
  0x1c   : > { %v447_v12 = vunpack.c.l.bf16 %v450_v6  ;;  %v448_v13 = vunpack.c.h.bf16 %v450_v6  ;;  %v236_v14 = vunpack.c.l.bf16 %v229_v11  ;;  %p509_p13 = pneg %p508_p12  ;;  %s512_s14 = scalar_lea.vmem %s511_s13, 32 }
  0x1d   : > { %v244_v16 = vmul.f32 %v439_v7, %v429_v3  ;;  %v245_v17 = vmul.f32 %v440_v8, %v429_v3  ;;  %v246_v18 = vmul.f32 %v443_v9, %v429_v3  ;;  %v247_v19 = vmul.f32 %v444_v10, %v429_v3  ;;  %p513_p0 = scmp.lt.s32.totalorder %s685_s7, %s511_s13  ;;  %p514_p1 = scmp.lt.s32.totalorder %s512_s14, %s506_s22 }
  0x1e   : > { %v248_v20 = vmul.f32 %v447_v12, %v429_v3  ;;  %v249_v21 = vmul.f32 %v448_v13, %v429_v3  ;;  %v250_v22 = vmul.f32 %v429_v3, %v236_v14 }
  0x1f   : > { %v258_v23 = vadd.f32 %v430_v15, %v244_v16  ;;  %v259_v24 = vadd.f32 %v430_v15, %v245_v17  ;;  %v260_v25 = vadd.f32 %v430_v15, %v246_v18  ;;  %v261_v26 = vadd.f32 %v430_v15, %v247_v19  ;;  %p515_p2 = por %p514_p1, %p513_p0 }
  0x20   : > { %v262_v27 = vadd.f32 %v430_v15, %v248_v20  ;;  %v263_v28 = vadd.f32 %v430_v15, %v249_v21  ;;  %v264_v33 = vadd.f32 %v430_v15, %v250_v22 }
  0x21   : > { %v265_v29 = vmax.f32 %v258_v23, 0.0  ;;  %v266_v30 = vmax.f32 %v259_v24, 0.0  ;;  %v267_v31 = vmax.f32 %v260_v25, 0.0  ;;  %v268_v32 = vmax.f32 %v261_v26, 0.0  ;;  %p516_p3 = pnand %p515_p2, %p509_p13 }
  0x22   : > { %v269_v34 = vmax.f32 %v262_v27, 0.0  ;;  %v270_v39 = vmax.f32 %v263_v28, 0.0  ;;  %v271_v42 = vmax.f32 %v264_v33, 0.0 }
  0x23   : > { %v273_v35 = vsel %vm272_vm1, %v265_v29, 0.0  ;;  %v274_v36 = vsel %vm272_vm1, %v266_v30, 0.0  ;;  %v276_v37 = vsel %vm272_vm1, %v267_v31, 0.0  ;;  %v278_v40 = vsel %vm272_vm1, %v268_v32, 0.0 }
  0x24   : > { %v275_v38 = vadd.f32 %v274_v36, %v273_v35  ;;  %v280_v43 = vsel %vm272_vm1, %v269_v34, 0.0  ;;  %v282_v45 = vsel %vm272_vm1, %v270_v39, 0.0  ;;  %v285_v47 = vsel %vm284_vm2, %v271_v42, 0.0 }
  0x26   : > { %v277_v41 = vadd.f32 %v276_v37, %v275_v38 }
  0x28   : > { %v279_v44 = vadd.f32 %v278_v40, %v277_v41 }
  0x2a   : > { %v281_v46 = vadd.f32 %v280_v43, %v279_v44 }
  0x2c   : > { %v283_v48 = vadd.f32 %v282_v45, %v281_v46 }
  0x2e   : > { %v286_v49 = vadd.f32 %v285_v47, %v283_v48 }
  0x30   : > { %v287_v50 = vrot.slane %v286_v49, 4 }
  0x32   : > { %v288_v51 = vadd.f32 %v287_v50, %v286_v49 }
  0x34   : > { %v289_v52 = vrot.slane %v288_v51, 2 }
  0x36   : > { %v290_v53 = vadd.f32 %v289_v52, %v288_v51 }
  0x38   : > { %v291_v54 = vrot.slane %v290_v53, 1 }
  0x3a   : > { %v292_v55 = vadd.f32 %v291_v54, %v290_v53 }
  0x3c   : > { %v293_v56 = vmul.f32 0.020408163, %v292_v55 }
  0x3e   : > { %v294_v57 = vpack.c.bf16 %v293_v56, %v293_v56 }
  0x40   : > { %459 = vmatmul.mubr.msk.bf16.vlgmr.msra.gmra.mrb[0].mxu0 %vm272_vm1, %v294_v57 }
 0x113   : > { %v349_v59 = vpop.f32.mrb[0].mxu0 }
 0x114   : > { %v350_v60 = vadd.f32 %v349_v59, %v299_v58  ;;  %v460_v61 = vpop.f32.mrb[1].mxu0 }
 0x115   : > { %v352_v62 = vpop.f32.mrb[2].mxu0 }
 0x116   : > { %355 = vst [vmem:[%s216_s6] sm:$0x1] %v350_v60  ;;  %v461_v63 = vpop.f32.mrb[3].mxu0 }
 0x117   : > { %519 = shalt.err (!%p516_p3)
}
 0x118   : > { %s520_s15 = scalar_lea.hbm %s683_s10, 16  ;;  %s524_s23 = scalar_lea.hbm %s730_s5, 32 }
 0x119   : > { %p521_p4 = scmp.ne.s32.totalorder %s683_s10, %s520_s15  ;;  %p525_p9 = scmp.lt.u32.totalorder %s683_s10, %s730_s5 }
 0x11a   : > { %p526_p10 = scmp.lt.u32.totalorder %s524_s23, %s520_s15  ;;  %p528_p12 = scmp.lt.u32.totalorder %s520_s15, %s683_s10 }
 0x11b   : > { %p522_p7 = pnand %p521_p4, %p641_p5 }
 0x11c   : > { %p527_p11 = por %p526_p10, %p525_p9 }
 0x11d   : > { %p523_p8 = pneg %p522_p7 }
 0x11e   : > { %p529_p13 = por %p528_p12, %p527_p11 }
 0x120   : > { %p530_p0 = pnand %p529_p13, %p523_p8 }
 0x122   : > { %533 = shalt.err (!%p530_p0)
}
 0x123   : > { %463 = dma.vmem_to_hbm [thread:$0]  (%p641_p5), %s685_s7, 16, %s683_s10, %s357_s11  }
 0x124 PF: > { %p469_p1 = scmp.ge.s32.totalorder %s568_s21, 2  ;;  %s381_s30 = sand.u32 1, %s556_s18  }
 0x125   : > { %s382_s6 = scalar_lea.sflag [#allocation3], %s381_s30 }
 0x126   : > { %p466_p2 = pnand %p469_p1, %p645_p6 }
 0x128   : > { %551 = dma.done.wait (!%p466_p2), %s382_s6, 16  }
 0x129   : > { %553 = vsyncadd (!%p466_p2), %s382_s6, 4294967280  ;;  %p15_p3 = scmp.ge.s32.totalorder %s628_s24, 4   ;;  %s733_s18 = smov %s560_s19 }
 0x12a   : > { %s734_s19 = smov %s564_s20  ;;  %s735_s20 = smov %s639_s27 }
 0x12b   : > { %s736_s21 = smov %s628_s24  ;;  %17 = sbr.rel (!%p15_p3) target bundleno = 3 (0x3), region = 75 }
 0x132   :  { %386 = vsyncpa [#allocation3], 1 }
 0x133   :  { %388 = vsyncpa [#allocation3 + $0x1], 1 }

</bundles_post_ra>
